<compile_context>
chip_gen: v6e
topology: v6e:2x2x1
jax: 0.10.0
libtpu: 0.0.40
codegen_flags: <defaults>
</compile_context>

<pallas_src>
import functools

import jax
import jax.numpy as jnp
from jax.experimental import pallas as pl
from jax.experimental.pallas import tpu as pltpu

H = 1024          # hidden width
OUT = 36          # true output width
OUT_PAD = 128     # lane-dense padded output width (multiple of 128)


def _mlp_kernel(x_ref,
                w1_ref, b1_ref,
                w2_ref, b2_ref,
                w3_ref, b3_ref,
                w4_ref, b4_ref,
                o_ref):
    """Fused 4-layer MLP for one batch tile; bf16 weights resident in VMEM.

    Dot operands are cast to bf16 (native MXU path); accumulation, bias add and
    ReLU stay in f32 (v5e-safe: no bf16 elementwise math).
    """
    h = x_ref[...].astype(jnp.bfloat16)
    h = jnp.dot(h, w1_ref[...], preferred_element_type=jnp.float32) + b1_ref[...]
    h = jnp.maximum(h, 0.0)

    h = jnp.dot(h.astype(jnp.bfloat16), w2_ref[...],
                preferred_element_type=jnp.float32) + b2_ref[...]
    h = jnp.maximum(h, 0.0)

    h = jnp.dot(h.astype(jnp.bfloat16), w3_ref[...],
                preferred_element_type=jnp.float32) + b3_ref[...]
    h = jnp.maximum(h, 0.0)

    h = jnp.dot(h.astype(jnp.bfloat16), w4_ref[...],
                preferred_element_type=jnp.float32) + b4_ref[...]
    o_ref[...] = h.astype(o_ref.dtype)


def prepare_params(params_torch_layout):
    """One-time conversion of PyTorch-layout params to kernel layout.

    PyTorch Linear stores W as [out, in]; we transpose to [in, out] here (not
    inside the jitted forward), cast weights to bf16, keep biases f32 [1, out],
    and zero-pad fc4 to OUT_PAD lanes.
    """
    prepped = {}
    for name in ("fc1", "fc2", "fc3", "fc4"):
        w, b = params_torch_layout[name]
        wt = jnp.asarray(w, jnp.float32).T                 # [in, out]
        br = jnp.asarray(b, jnp.float32).reshape(1, -1)    # [1, out]
        if name == "fc4":
            wt = jnp.pad(wt, ((0, 0), (0, OUT_PAD - wt.shape[1])))
            br = jnp.pad(br, ((0, 0), (0, OUT_PAD - br.shape[1])))
        prepped[name] = (wt.astype(jnp.bfloat16), br)
    return prepped


@functools.partial(jax.jit, static_argnames=("batch_tile",))
def _forward_padded(x_pad, w1, b1, w2, b2, w3, b3, w4, b4, *, batch_tile):
    Bp, num_inputs = x_pad.shape
    grid = (Bp // batch_tile,)

    def const_spec(arr):
        nd = arr.ndim
        # Constant index_map -> single-buffer the resident weights/biases.
        return pl.BlockSpec(arr.shape, lambda i, _nd=nd: (0,) * _nd,
                            pipeline_mode=pl.Buffered(1))

    flops = 2 * Bp * (num_inputs * H + H * H + H * H + H * OUT_PAD)
    bytes_accessed = (
        x_pad.size * x_pad.dtype.itemsize
        + sum(a.size * a.dtype.itemsize
              for a in (w1, b1, w2, b2, w3, b3, w4, b4))
        + Bp * OUT_PAD * 4)

    return pl.pallas_call(
        _mlp_kernel,
        out_shape=jax.ShapeDtypeStruct((Bp, OUT_PAD), jnp.float32),
        grid_spec=pltpu.PrefetchScalarGridSpec(
            num_scalar_prefetch=0,
            grid=grid,
            in_specs=[
                pl.BlockSpec((batch_tile, num_inputs), lambda i: (i, 0)),
                const_spec(w1), const_spec(b1),
                const_spec(w2), const_spec(b2),
                const_spec(w3), const_spec(b3),
                const_spec(w4), const_spec(b4),
            ],
            out_specs=pl.BlockSpec((batch_tile, OUT_PAD), lambda i: (i, 0)),
        ),
        compiler_params=pltpu.CompilerParams(
            dimension_semantics=("parallel",),   # batch grid shards across TCs (v7x)
            vmem_limit_bytes=48 << 20,           # v7x-safe (64 MiB physical per TC)
        ),
        cost_estimate=pl.CostEstimate(
            flops=flops, transcendentals=0, bytes_accessed=bytes_accessed),
    )(x_pad, w1, b1, w2, b2, w3, b3, w4, b4)


def _round_up(n, m):
    return ((n + m - 1) // m) * m


def model_simple_forward(x, prepped_params, *, batch_tile=256):
    """x: [B, num_inputs] f32; prepped_params from prepare_params().

    batch_tile: 256 for v6e/v7x, 128 recommended on v5e. Small batches shrink
    the tile (kept a multiple of 8); batch is zero-padded to a tile multiple.
    """
    B = x.shape[0]
    tile = min(batch_tile, _round_up(B, 8))
    Bp = _round_up(B, tile)
    if Bp != B:
        x = jnp.pad(x, ((0, Bp - B), (0, 0)))

    w1, b1 = prepped_params["fc1"]
    w2, b2 = prepped_params["fc2"]
    w3, b3 = prepped_params["fc3"]
    w4, b4 = prepped_params["fc4"]

    out = _forward_padded(x, w1, b1, w2, b2, w3, b3, w4, b4, batch_tile=tile)
    return out[:B, :OUT]


def init_params(key, num_inputs):
    """Deterministic init matching nn.Linear shapes: W [out, in], b [out]."""
    dims = [(num_inputs, 1024), (1024, 1024), (1024, 1024), (1024, 36)]
    names = ["fc1", "fc2", "fc3", "fc4"]
    params = {}
    for name, (fan_in, fan_out) in zip(names, dims):
        key, kw, kb = jax.random.split(key, 3)
        bound = 1.0 / jnp.sqrt(fan_in)
        w = jax.random.uniform(kw, (fan_out, fan_in), jnp.float32, -bound, bound)
        b = jax.random.uniform(kb, (fan_out,), jnp.float32, -bound, bound)
        params[name] = (w, b)
    return params


def reference_forward_f32(x, params):
    """Plain-JAX f32 reference mirroring the PyTorch forward."""
    h = x
    for name in ("fc1", "fc2", "fc3"):
        w, b = params[name]
        h = jnp.maximum(h @ w.T + b, 0.0)
    w, b = params["fc4"]
    return h @ w.T + b


def reference_forward_bf16(x, params):
    """Reference that mirrors the kernel's bf16-operand / f32-accumulate math."""
    h = x
    for name in ("fc1", "fc2", "fc3"):
        w, b = params[name]
        h = jnp.dot(h.astype(jnp.bfloat16), w.T.astype(jnp.bfloat16),
                    preferred_element_type=jnp.float32) + b
        h = jnp.maximum(h, 0.0)
    w, b = params["fc4"]
    return jnp.dot(h.astype(jnp.bfloat16), w.T.astype(jnp.bfloat16),
                   preferred_element_type=jnp.float32) + b


if __name__ == "__main__":
    key = jax.random.PRNGKey(0)
    num_inputs = 32
    batch = 16

    key, kx, kp = jax.random.split(key, 3)
    x = jax.random.normal(kx, (batch, num_inputs), jnp.float32)
    params = init_params(kp, num_inputs)          # PyTorch layout
    prepped = prepare_params(params)              # one-time: transpose/bf16/pad

    out = model_simple_forward(x, prepped)
    out = jax.block_until_ready(out)
    assert out.shape == (batch, OUT), out.shape

    ref_bf16 = reference_forward_bf16(x, params)
    ref_f32 = reference_forward_f32(x, params)
    assert jnp.allclose(out, ref_bf16, atol=1e-3, rtol=1e-3), (
        float(jnp.max(jnp.abs(out - ref_bf16))))
    assert jnp.allclose(out, ref_f32, atol=5e-2, rtol=5e-2), (
        float(jnp.max(jnp.abs(out - ref_f32))))

    print("KERNEL_OK")
</pallas_src>

<mosaic_0001>
module attributes {stable_mosaic.version = 11 : i64} {
  func.func @_mlp_kernel(%arg0: i32, %arg1: memref<16x32xf32, #tpu.memory_space<vmem>>, %arg2: memref<32x1024xbf16, #tpu.memory_space<vmem>>, %arg3: memref<1x1024xf32, #tpu.memory_space<vmem>>, %arg4: memref<1024x1024xbf16, #tpu.memory_space<vmem>>, %arg5: memref<1x1024xf32, #tpu.memory_space<vmem>>, %arg6: memref<1024x1024xbf16, #tpu.memory_space<vmem>>, %arg7: memref<1x1024xf32, #tpu.memory_space<vmem>>, %arg8: memref<1024x128xbf16, #tpu.memory_space<vmem>>, %arg9: memref<1x128xf32, #tpu.memory_space<vmem>>, %arg10: memref<16x128xf32, #tpu.memory_space<vmem>>) attributes {dimension_semantics = [#tpu.dimension_semantics<parallel>], iteration_bounds = array<i64: 1>, scalar_prefetch = 0 : i64, scratch_operands = 0 : i64, tpu.core_type = #tpu.core_type<tc>, window_params = [{transform_indices = @transform_0, window_bounds = array<i64: 16, 32>}, {pipeline_mode = #tpu.pipeline_mode<synchronous>, transform_indices = @transform_1, window_bounds = array<i64: 32, 1024>}, {pipeline_mode = #tpu.pipeline_mode<synchronous>, transform_indices = @transform_2, window_bounds = array<i64: 1, 1024>}, {pipeline_mode = #tpu.pipeline_mode<synchronous>, transform_indices = @transform_3, window_bounds = array<i64: 1024, 1024>}, {pipeline_mode = #tpu.pipeline_mode<synchronous>, transform_indices = @transform_4, window_bounds = array<i64: 1, 1024>}, {pipeline_mode = #tpu.pipeline_mode<synchronous>, transform_indices = @transform_5, window_bounds = array<i64: 1024, 1024>}, {pipeline_mode = #tpu.pipeline_mode<synchronous>, transform_indices = @transform_6, window_bounds = array<i64: 1, 1024>}, {pipeline_mode = #tpu.pipeline_mode<synchronous>, transform_indices = @transform_7, window_bounds = array<i64: 1024, 128>}, {pipeline_mode = #tpu.pipeline_mode<synchronous>, transform_indices = @transform_8, window_bounds = array<i64: 1, 128>}, {transform_indices = @transform_9, window_bounds = array<i64: 16, 128>}]} {
    %c0 = arith.constant 0 : index
    %c0_0 = arith.constant 0 : index
    %0 = vector.load %arg1[%c0, %c0_0] : memref<16x32xf32, #tpu.memory_space<vmem>>, vector<16x32xf32>
    %1 = arith.truncf %0 : vector<16x32xf32> to vector<16x32xbf16>
    %c0_1 = arith.constant 0 : index
    %c0_2 = arith.constant 0 : index
    %2 = vector.load %arg2[%c0_1, %c0_2] : memref<32x1024xbf16, #tpu.memory_space<vmem>>, vector<32x1024xbf16>
    %cst = arith.constant dense<0.000000e+00> : vector<16x1024xf32>
    %3 = tpu.matmul %1, %2, %cst {dimension_numbers = #tpu.dot_dimension_numbers<[1], [0], [0], [1], [0, 0, 1, 1], [], []>} : vector<16x32xbf16>, vector<32x1024xbf16>, vector<16x1024xf32> -> vector<16x1024xf32>
    %c0_3 = arith.constant 0 : index
    %c0_4 = arith.constant 0 : index
    %4 = vector.load %arg3[%c0_3, %c0_4] : memref<1x1024xf32, #tpu.memory_space<vmem>>, vector<1x1024xf32>
    %5 = vector.broadcast %4 : vector<1x1024xf32> to vector<16x1024xf32>
    %6 = arith.addf %3, %5 : vector<16x1024xf32>
    %cst_5 = arith.constant 0.000000e+00 : f32
    %7 = vector.broadcast %cst_5 : f32 to vector<16x1024xf32>
    %8 = arith.maximumf %6, %7 : vector<16x1024xf32>
    %9 = arith.truncf %8 : vector<16x1024xf32> to vector<16x1024xbf16>
    %c0_6 = arith.constant 0 : index
    %c0_7 = arith.constant 0 : index
    %10 = vector.load %arg4[%c0_6, %c0_7] : memref<1024x1024xbf16, #tpu.memory_space<vmem>>, vector<1024x1024xbf16>
    %cst_8 = arith.constant dense<0.000000e+00> : vector<16x1024xf32>
    %11 = tpu.matmul %9, %10, %cst_8 {dimension_numbers = #tpu.dot_dimension_numbers<[1], [0], [0], [1], [0, 0, 1, 1], [], []>} : vector<16x1024xbf16>, vector<1024x1024xbf16>, vector<16x1024xf32> -> vector<16x1024xf32>
    %c0_9 = arith.constant 0 : index
    %c0_10 = arith.constant 0 : index
    %12 = vector.load %arg5[%c0_9, %c0_10] : memref<1x1024xf32, #tpu.memory_space<vmem>>, vector<1x1024xf32>
    %13 = vector.broadcast %12 : vector<1x1024xf32> to vector<16x1024xf32>
    %14 = arith.addf %11, %13 : vector<16x1024xf32>
    %cst_11 = arith.constant 0.000000e+00 : f32
    %15 = vector.broadcast %cst_11 : f32 to vector<16x1024xf32>
    %16 = arith.maximumf %14, %15 : vector<16x1024xf32>
    %17 = arith.truncf %16 : vector<16x1024xf32> to vector<16x1024xbf16>
    %c0_12 = arith.constant 0 : index
    %c0_13 = arith.constant 0 : index
    %18 = vector.load %arg6[%c0_12, %c0_13] : memref<1024x1024xbf16, #tpu.memory_space<vmem>>, vector<1024x1024xbf16>
    %cst_14 = arith.constant dense<0.000000e+00> : vector<16x1024xf32>
    %19 = tpu.matmul %17, %18, %cst_14 {dimension_numbers = #tpu.dot_dimension_numbers<[1], [0], [0], [1], [0, 0, 1, 1], [], []>} : vector<16x1024xbf16>, vector<1024x1024xbf16>, vector<16x1024xf32> -> vector<16x1024xf32>
    %c0_15 = arith.constant 0 : index
    %c0_16 = arith.constant 0 : index
    %20 = vector.load %arg7[%c0_15, %c0_16] : memref<1x1024xf32, #tpu.memory_space<vmem>>, vector<1x1024xf32>
    %21 = vector.broadcast %20 : vector<1x1024xf32> to vector<16x1024xf32>
    %22 = arith.addf %19, %21 : vector<16x1024xf32>
    %cst_17 = arith.constant 0.000000e+00 : f32
    %23 = vector.broadcast %cst_17 : f32 to vector<16x1024xf32>
    %24 = arith.maximumf %22, %23 : vector<16x1024xf32>
    %25 = arith.truncf %24 : vector<16x1024xf32> to vector<16x1024xbf16>
    %c0_18 = arith.constant 0 : index
    %c0_19 = arith.constant 0 : index
    %26 = vector.load %arg8[%c0_18, %c0_19] : memref<1024x128xbf16, #tpu.memory_space<vmem>>, vector<1024x128xbf16>
    %cst_20 = arith.constant dense<0.000000e+00> : vector<16x128xf32>
    %27 = tpu.matmul %25, %26, %cst_20 {dimension_numbers = #tpu.dot_dimension_numbers<[1], [0], [0], [1], [0, 0, 1, 1], [], []>} : vector<16x1024xbf16>, vector<1024x128xbf16>, vector<16x128xf32> -> vector<16x128xf32>
    %c0_21 = arith.constant 0 : index
    %c0_22 = arith.constant 0 : index
    %28 = vector.load %arg9[%c0_21, %c0_22] : memref<1x128xf32, #tpu.memory_space<vmem>>, vector<1x128xf32>
    %29 = vector.broadcast %28 : vector<1x128xf32> to vector<16x128xf32>
    %30 = arith.addf %27, %29 : vector<16x128xf32>
    %c0_23 = arith.constant 0 : index
    %c0_24 = arith.constant 0 : index
    %31 = vector.load %arg10[%c0_23, %c0_24] : memref<16x128xf32, #tpu.memory_space<vmem>>, vector<16x128xf32>
    tpu.vector_store %arg10[%c0_23, %c0_24], %30 {strides = array<i32>} : memref<16x128xf32, #tpu.memory_space<vmem>>, vector<16x128xf32>,
    return
  }
  func.func @transform_0(%arg0: i32) -> (i32, i32) {
    %c0_i32 = arith.constant 0 : i32
    %c0_i32_0 = arith.constant 0 : i32
    return %arg0, %c0_i32 : i32, i32
  }
  func.func @transform_1(%arg0: i32) -> (i32, i32) {
    %c0_i32 = arith.constant 0 : i32
    %c0_i32_0 = arith.constant 0 : i32
    %c0_i32_1 = arith.constant 0 : i32
    return %c0_i32, %c0_i32_0 : i32, i32
  }
  func.func @transform_2(%arg0: i32) -> (i32, i32) {
    %c0_i32 = arith.constant 0 : i32
    %c0_i32_0 = arith.constant 0 : i32
    %c0_i32_1 = arith.constant 0 : i32
    return %c0_i32, %c0_i32_0 : i32, i32
  }
  func.func @transform_3(%arg0: i32) -> (i32, i32) {
    %c0_i32 = arith.constant 0 : i32
    %c0_i32_0 = arith.constant 0 : i32
    %c0_i32_1 = arith.constant 0 : i32
    return %c0_i32, %c0_i32_0 : i32, i32
  }
  func.func @transform_4(%arg0: i32) -> (i32, i32) {
    %c0_i32 = arith.constant 0 : i32
    %c0_i32_0 = arith.constant 0 : i32
    %c0_i32_1 = arith.constant 0 : i32
    return %c0_i32, %c0_i32_0 : i32, i32
  }
  func.func @transform_5(%arg0: i32) -> (i32, i32) {
    %c0_i32 = arith.constant 0 : i32
    %c0_i32_0 = arith.constant 0 : i32
    %c0_i32_1 = arith.constant 0 : i32
    return %c0_i32, %c0_i32_0 : i32, i32
  }
  func.func @transform_6(%arg0: i32) -> (i32, i32) {
    %c0_i32 = arith.constant 0 : i32
    %c0_i32_0 = arith.constant 0 : i32
    %c0_i32_1 = arith.constant 0 : i32
    return %c0_i32, %c0_i32_0 : i32, i32
  }
  func.func @transform_7(%arg0: i32) -> (i32, i32) {
    %c0_i32 = arith.constant 0 : i32
    %c0_i32_0 = arith.constant 0 : i32
    %c0_i32_1 = arith.constant 0 : i32
    return %c0_i32, %c0_i32_0 : i32, i32
  }
  func.func @transform_8(%arg0: i32) -> (i32, i32) {
    %c0_i32 = arith.constant 0 : i32
    %c0_i32_0 = arith.constant 0 : i32
    %c0_i32_1 = arith.constant 0 : i32
    return %c0_i32, %c0_i32_0 : i32, i32
  }
  func.func @transform_9(%arg0: i32) -> (i32, i32) {
    %c0_i32 = arith.constant 0 : i32
    %c0_i32_0 = arith.constant 0 : i32
    return %arg0, %c0_i32 : i32, i32
  }
}

</mosaic_0001>

<bundles_post_ra>
// kernel: _forward_padded.1
= control target key start
LH: loop header
LB: loop body
LE: loop exit
PB: predicated region body
PF: predicated region fallthrough
CT: control target
= control target key end

     0   :  { %14 = vsyncpa [#allocation3], 0  ;;  %s10800_s0 = inlined_call_operand.hbm [shape: f32[16,32], index: 0, kind: input, shape index: {}]   ;;  %s10801_s1 = inlined_call_operand.hbm [shape: bf16[32,1024], index: 1, kind: input, shape index: {}]   ;;  %s10802_s2 = inlined_call_operand.hbm [shape: f32[1,1024], index: 2, kind: input, shape index: {}]   ;;  %s10803_s3 = inlined_call_operand.hbm [shape: bf16[1024,1024], index: 3, kind: input, shape index: {}]   ;;  %s10804_s4 = inlined_call_operand.hbm [shape: f32[1,1024], index: 4, kind: input, shape index: {}]   ;;  %s10805_s5 = inlined_call_operand.hbm [shape: bf16[1024,1024], index: 5, kind: input, shape index: {}]   ;;  %s10806_s6 = inlined_call_operand.hbm [shape: f32[1,1024], index: 6, kind: input, shape index: {}]   ;;  %s10807_s7 = inlined_call_operand.hbm [shape: bf16[1024,128], index: 7, kind: input, shape index: {}]   ;;  %s10808_s8 = inlined_call_operand.hbm [shape: f32[1,128], index: 8, kind: input, shape index: {}]   ;;  %s10809_s9 = inlined_call_operand.hbm [shape: f32[16,128], index: 9, kind: output, shape index: {}]  }
   0x1   :  { %15 = vsyncpa [#allocation6], 0 }
   0x2   :  { %16 = vsyncpa [#allocation9], 0 }
   0x3   :  { %17 = vsyncpa [#allocation12], 0 }
   0x4   :  { %18 = vsyncpa [#allocation15], 0 }
   0x5   :  { %19 = vsyncpa [#allocation4], 0  ;;  %s10339_s30 = smov [#allocation5]  }
   0x6   :  { %s37_s10 = sshll.u32 %s10339_s30, 4  ;;  %s38_s10 = int_to_ptr.vmem [resolvable:$true] %s37_s10 }
   0x7   :  { %s10135_s11 = scalar_lea.vmem %s38_s10, 2048  ;;  %p10140_p1 = scmp.lt.s32.totalorder %s38_s10, %s38_s10 }
   0x8   :  { %p10136_p0 = scmp.ne.s32.totalorder %s38_s10, %s10135_s11  ;;  %p10141_p2 = scmp.lt.s32.totalorder %s10135_s11, %s10135_s11 }
   0xa   :  { %p10142_p3 = por %p10141_p2, %p10140_p1 }
   0xc   :  { %p10143_p4 = pnand %p10142_p3, %p10136_p0 }
   0xe   :  { %10146 = shalt.err (!%p10143_p4)
}
   0xf   :  { %s10340_s12 = smov 512   ;;  %s10341_s13 = smov 32  }
  0x10   :  { %43 = dma.hbm_to_vmem [thread:$0]  %s10801_s1, 2048, %s38_s10, [#allocation6], %s10340_s12, %s10340_s12, %s10341_s13  }
  0x11   :  { %s10342_s16 = smov [#allocation8]   ;;  %s10343_s18 = smov [#allocation11]  }
  0x12   :  { %s59_s17 = sshll.u32 %s10342_s16, 4  ;;  %s81_s19 = sshll.u32 %s10343_s18, 4  ;;  %s60_s17 = int_to_ptr.vmem [resolvable:$true] %s59_s17  ;;  %s82_s19 = int_to_ptr.vmem [resolvable:$true] %s81_s19 }
  0x13   :  { %s10155_s20 = scalar_lea.vmem %s60_s17, 65536  ;;  %p10160_p6 = scmp.lt.s32.totalorder %s60_s17, %s60_s17 }
  0x14   :  { %p10156_p5 = scmp.ne.s32.totalorder %s60_s17, %s10155_s20  ;;  %p10161_p7 = scmp.lt.s32.totalorder %s10155_s20, %s10155_s20 }
  0x16   :  { %p10162_p8 = por %p10161_p7, %p10160_p6 }
  0x18   :  { %p10163_p9 = pnand %p10162_p8, %p10156_p5 }
  0x1a   :  { %10166 = shalt.err (!%p10163_p9)
}
  0x1b   :  { %65 = dma.hbm_to_vmem [thread:$0]  %s10803_s3, 65536, %s60_s17, [#allocation9], %s10340_s12, %s10340_s12, %s10341_s13  }
  0x1c   :  { %s10175_s23 = scalar_lea.vmem %s82_s19, 65536  ;;  %p10180_p11 = scmp.lt.s32.totalorder %s82_s19, %s82_s19 }
  0x1d   :  { %p10176_p10 = scmp.ne.s32.totalorder %s82_s19, %s10175_s23  ;;  %p10181_p12 = scmp.lt.s32.totalorder %s10175_s23, %s10175_s23 }
  0x1f   :  { %p10182_p13 = por %p10181_p12, %p10180_p11 }
  0x21   :  { %p10183_p0 = pnand %p10182_p13, %p10176_p10 }
  0x23   :  { %10186 = shalt.err (!%p10183_p0)
}
  0x24   :  { %87 = dma.hbm_to_vmem [thread:$0]  %s10805_s5, 65536, %s82_s19, [#allocation12], %s10340_s12, %s10340_s12, %s10341_s13  }
  0x25   :  { %s10344_s25 = smov [#allocation14]  }
  0x26   :  { %s103_s26 = sshll.u32 %s10344_s25, 4  ;;  %s104_s26 = int_to_ptr.vmem [resolvable:$true] %s103_s26 }
  0x27   :  { %s10195_s27 = scalar_lea.vmem %s104_s26, 8192  ;;  %p10200_p2 = scmp.lt.s32.totalorder %s104_s26, %s104_s26 }
  0x28   :  { %p10196_p1 = scmp.ne.s32.totalorder %s104_s26, %s10195_s27  ;;  %p10201_p3 = scmp.lt.s32.totalorder %s10195_s27, %s10195_s27 }
  0x2a   :  { %p10202_p4 = por %p10201_p3, %p10200_p2 }
  0x2c   :  { %p10203_p5 = pnand %p10202_p4, %p10196_p1 }
  0x2e   :  { %10206 = shalt.err (!%p10203_p5)
}
  0x2f   :  { %s10345_s3 = smov 64   ;;  %s10346_s28 = smov 4  }
  0x30   :  { %109 = dma.hbm_to_vmem [thread:$0]  %s10807_s7, 8192, %s104_s26, [#allocation15], %s10345_s3, %s10345_s3, %s10346_s28  }
  0x31   :  { %s10347_s10 = smov [#allocation2]  }
  0x32   :  { %s25_s11 = sshll.u32 %s10347_s10, 4  ;;  %s26_s11 = int_to_ptr.vmem [resolvable:$true] %s25_s11 }
  0x33   :  { %s10215_s5 = scalar_lea.vmem %s26_s11, 256  ;;  %p10220_p7 = scmp.lt.s32.totalorder %s26_s11, %s26_s11 }
  0x34   :  { %p10216_p6 = scmp.ne.s32.totalorder %s26_s11, %s10215_s5  ;;  %p10221_p8 = scmp.lt.s32.totalorder %s10215_s5, %s10215_s5 }
  0x36   :  { %p10222_p9 = por %p10221_p8, %p10220_p7 }
  0x38   :  { %p10223_p10 = pnand %p10222_p9, %p10216_p6 }
  0x3a   :  { %10226 = shalt.err (!%p10223_p10)
}
  0x3b   :  { %s10348_s12 = smov 128   ;;  %s10349_s13 = smov 8  }
  0x3c   :  { %31 = dma.hbm_to_vmem [thread:$0]  %s10800_s0, 256, %s26_s11, [#allocation3], %s10348_s12, %s10348_s12, %s10349_s13  }
  0x3d   :  { %s10350_s7 = smov [#allocation7]   ;;  %s10351_s17 = smov [#allocation10]  }
  0x3e   :  { %s50_s16 = sshll.u32 %s10350_s7, 4  ;;  %s72_s18 = sshll.u32 %s10351_s17, 4  ;;  %s51_s16 = int_to_ptr.vmem [resolvable:$true] %s50_s16  ;;  %s73_s18 = int_to_ptr.vmem [resolvable:$true] %s72_s18 }
  0x3f   :  { %s10235_s19 = scalar_lea.vmem %s51_s16, 128  ;;  %p10240_p12 = scmp.lt.s32.totalorder %s51_s16, %s51_s16 }
  0x40   :  { %p10236_p11 = scmp.ne.s32.totalorder %s51_s16, %s10235_s19  ;;  %p10241_p13 = scmp.lt.s32.totalorder %s10235_s19, %s10235_s19 }
  0x42   :  { %p10242_p0 = por %p10241_p13, %p10240_p12 }
  0x44   :  { %p10243_p1 = pnand %p10242_p0, %p10236_p11 }
  0x46   :  { %10246 = shalt.err (!%p10243_p1)
}
  0x47   :  { %53 = dma.hbm_to_vmem [thread:$0]  %s10802_s2, 128, %s51_s16, [#allocation6]  }
  0x48   :  { %s10255_s22 = scalar_lea.vmem %s73_s18, 128  ;;  %p10260_p3 = scmp.lt.s32.totalorder %s73_s18, %s73_s18 }
  0x49   :  { %p10256_p2 = scmp.ne.s32.totalorder %s73_s18, %s10255_s22  ;;  %p10261_p4 = scmp.lt.s32.totalorder %s10255_s22, %s10255_s22 }
  0x4b   :  { %p10262_p5 = por %p10261_p4, %p10260_p3 }
  0x4d   :  { %p10263_p6 = pnand %p10262_p5, %p10256_p2 }
  0x4f   :  { %10266 = shalt.err (!%p10263_p6)
}
  0x50   :  { %75 = dma.hbm_to_vmem [thread:$0]  %s10804_s4, 128, %s73_s18, [#allocation9]  }
  0x51   :  { %s10352_s1 = smov [#allocation13]   ;;  %s10353_s25 = smov [#allocation16]  }
  0x52   :  { %s94_s24 = sshll.u32 %s10352_s1, 4  ;;  %s116_s26 = sshll.u32 %s10353_s25, 4  ;;  %s95_s24 = int_to_ptr.vmem [resolvable:$true] %s94_s24  ;;  %s117_s26 = int_to_ptr.vmem [resolvable:$true] %s116_s26 }
  0x53   :  { %s10275_s27 = scalar_lea.vmem %s95_s24, 128  ;;  %p10280_p8 = scmp.lt.s32.totalorder %s95_s24, %s95_s24 }
  0x54   :  { %p10276_p7 = scmp.ne.s32.totalorder %s95_s24, %s10275_s27  ;;  %p10281_p9 = scmp.lt.s32.totalorder %s10275_s27, %s10275_s27 }
  0x56   :  { %p10282_p10 = por %p10281_p9, %p10280_p8 }
  0x58   :  { %p10283_p11 = pnand %p10282_p10, %p10276_p7 }
  0x5a   :  { %10286 = shalt.err (!%p10283_p11)
}
  0x5b   :  { %97 = dma.hbm_to_vmem [thread:$0]  %s10806_s6, 128, %s95_s24, [#allocation12]  }
  0x5c   :  { %s10295_s28 = scalar_lea.vmem %s117_s26, 16  ;;  %s10299_s4 = scalar_lea.vmem %s117_s26, 32 }
  0x5d   :  { %p10296_p12 = scmp.ne.s32.totalorder %s117_s26, %s10295_s28  ;;  %p10300_p13 = scmp.lt.s32.totalorder %s117_s26, %s117_s26 }
  0x5e   :  { %p10301_p0 = scmp.lt.s32.totalorder %s10299_s4, %s10295_s28 }
  0x60   :  { %p10302_p1 = por %p10301_p0, %p10300_p13 }
  0x62   :  { %p10303_p2 = pnand %p10302_p1, %p10296_p12 }
  0x64   :  { %10306 = shalt.err (!%p10303_p2)
}
  0x65   :  { %119 = dma.hbm_to_vmem [thread:$0]  %s10808_s8, 16, %s117_s26, [#allocation15]  }
  0x66   :  { %10327 = dma.done.wait [#allocation3], 256  }
  0x67   :  { %10328 = vsyncadd [#allocation3], 4294967040 }
  0x68   :  { %10329 = dma.done.wait [#allocation6], 2176  }
  0x69   :  { %10330 = vsyncadd [#allocation6], 4294965120 }
  0x6a   :  { %10331 = dma.done.wait [#allocation9], 65664  }
  0x6b   :  { %10332 = vsyncadd [#allocation9], 4294901632 }
  0x6c   :  { %10333 = dma.done.wait [#allocation12], 65664  }
  0x6d   :  { %10334 = vsyncadd [#allocation12], 4294901632 }
  0x6e   :  { %10335 = dma.done.wait [#allocation15], 8208  }
  0x6f   :  { %10336 = vsyncadd [#allocation15], 4294959088  ;;  %v10354_v0 = vmov 0   ;;  %v159_v1 = vld [vmem:[#allocation5 + $0x40] sm:$0xff]  ;;  %v160_v3 = vld [vmem:[#allocation5 + $0x48] sm:$0xff]  ;;  %vm289_vm0 = vcmask 261120  }
  0x70   :  { %325 = vmatprep.mubr.bf16.mxu0 %v10354_v0  ;;  %368 = vmatprep.mubr.bf16.mxu1 %v10354_v0  ;;  %v163_v2 = vld [vmem:[#allocation5 + $0x60] sm:$0xff]  ;;  %v164_v5 = vld [vmem:[#allocation5 + $0x68] sm:$0xff]  ;;  %v148_v15 = vld [vmem:[#allocation2] sm:$0xff]  ;;  %s10355_s6 = smov [#allocation17]  }
  0x71   :  { %v8856_v4 = vcombine.high %v159_v1, %v163_v2  ;;  %v8855_v6 = vcombine.low %v159_v1, %v163_v2  ;;  %v151_v7 = vld [vmem:[#allocation5] sm:$0xff]  ;;  %v8858_v9 = vcombine.high %v160_v3, %v164_v5  ;;  %v8857_v10 = vcombine.low %v160_v3, %v164_v5  ;;  %v152_v12 = vld [vmem:[#allocation5 + $0x8] sm:$0xff]  ;;  %v161_v16 = vld [vmem:[#allocation5 + $0x50] sm:$0xff]  ;;  %s8831_s8 = sshll.u32 %s10355_s6, 4  ;;  %s8832_s8 = int_to_ptr.vmem [resolvable:$true] %s8831_s8 }
  0x72   :  { %v155_v8 = vld [vmem:[#allocation5 + $0x20] sm:$0xff]  ;;  %v156_v13 = vld [vmem:[#allocation5 + $0x28] sm:$0xff]  ;;  %v165_v17 = vld [vmem:[#allocation5 + $0x70] sm:$0xff]  ;;  %s10307_s10 = scalar_lea.vmem %s8832_s8, 256  ;;  %p10312_p4 = scmp.lt.s32.totalorder %s8832_s8, %s8832_s8 }
  0x73   :  { %v8848_v11 = vcombine.high %v151_v7, %v155_v8  ;;  %305 = vmatprep.subr.bf16.mxu0 %v8856_v4  ;;  %v8850_v14 = vcombine.high %v152_v12, %v156_v13  ;;  %348 = vmatprep.subr.bf16.mxu1 %v8858_v9  ;;  %v8847_v18 = vcombine.low %v151_v7, %v155_v8  ;;  %v149_v19 = vld [vmem:[#allocation2 + $0x8] sm:$0xff]  ;;  %v153_v25 = vld [vmem:[#allocation5 + $0x10] sm:$0xff]  ;;  %v545_v34 = vld [vmem:[#allocation8 + $0x1c0] sm:$0xff]  ;;  %p10308_p3 = scmp.ne.s32.totalorder %s8832_s8, %s10307_s10  ;;  %p10313_p5 = scmp.lt.s32.totalorder %s10307_s10, %s10307_s10 }
  0x74   :  { %306 = vmatpush1.bf16.msra.mxu0 %v8855_v6  ;;  %v162_v20 = vld [vmem:[#allocation5 + $0x58] sm:$0xff]  ;;  %349 = vmatpush1.bf16.msra.mxu1 %v8857_v10  ;;  %v8849_v22 = vcombine.low %v152_v12, %v156_v13  ;;  %v8860_v23 = vcombine.high %v161_v16, %v165_v17  ;;  %v157_v26 = vld [vmem:[#allocation5 + $0x30] sm:$0xff]  ;;  %v150_v27 = vpack.c.bf16 %v149_v19, %v148_v15  ;;  %v549_v35 = vld [vmem:[#allocation8 + $0x1e0] sm:$0xff] }
  0x75   :  { %v166_v21 = vld [vmem:[#allocation5 + $0x78] sm:$0xff]  ;;  %307 = vmatprep.subr.bf16.mxu0 %v8848_v11  ;;  %350 = vmatprep.subr.bf16.mxu1 %v8850_v14  ;;  %v8859_v30 = vcombine.low %v161_v16, %v165_v17  ;;  %v8852_v32 = vcombine.high %v153_v25, %v157_v26  ;;  %v673_v36 = vld [vmem:[#allocation8 + $0x5c0] sm:$0xff]  ;;  %v8851_v38 = vcombine.low %v153_v25, %v157_v26  ;;  %p10314_p6 = por %p10313_p5, %p10312_p4 }
  0x76   :  { %v8862_v24 = vcombine.high %v162_v20, %v166_v21  ;;  %v154_v28 = vld [vmem:[#allocation5 + $0x18] sm:$0xff]  ;;  %v8861_v31 = vcombine.low %v162_v20, %v166_v21  ;;  %v677_v37 = vld [vmem:[#allocation8 + $0x5e0] sm:$0xff]  ;;  %v8924_v40 = vcombine.high %v545_v34, %v549_v35  ;;  %v8923_v46 = vcombine.low %v545_v34, %v549_v35 }
  0x77   :  { %v158_v29 = vld [vmem:[#allocation5 + $0x38] sm:$0xff]  ;;  %v9052_v41 = vcombine.high %v673_v36, %v677_v37  ;;  %v537_v42 = vld [vmem:[#allocation8 + $0x180] sm:$0xff]  ;;  %v9051_v47 = vcombine.low %v673_v36, %v677_v37  ;;  %p10315_p7 = pnand %p10314_p6, %p10308_p3 }
  0x78   :  { %308 = vmatpush1.bf16.msra.mxu0 %v8847_v18  ;;  %351 = vmatpush1.bf16.msra.mxu1 %v8849_v22  ;;  %v8854_v33 = vcombine.high %v154_v28, %v158_v29  ;;  %v8853_v39 = vcombine.low %v154_v28, %v158_v29  ;;  %v541_v43 = vld [vmem:[#allocation8 + $0x1a0] sm:$0xff] }
  0x79   :  { %391 = vmatprep.subr.bf16.mxu0 %v8860_v23  ;;  %434 = vmatprep.subr.bf16.mxu1 %v8862_v24  ;;  %v665_v44 = vld [vmem:[#allocation8 + $0x580] sm:$0xff]  ;;  %v8916_v48 = vcombine.high %v537_v42, %v541_v43  ;;  %v8915_v54 = vcombine.low %v537_v42, %v541_v43 }
  0x7a   :  { %v669_v45 = vld [vmem:[#allocation8 + $0x5a0] sm:$0xff] }
  0x7b   :  { %8863 = vmatmul.mubr.msk.bf16.vlgmr.msra.gmra.mxu0 %vm289_vm0, %v150_v27  ;;  %8864 = vmatmul.mubr.msk.bf16.vlgmr.msra.gmra.mxu1 %vm289_vm0, %v150_v27  ;;  %v9044_v49 = vcombine.high %v665_v44, %v669_v45  ;;  %v529_v50 = vld [vmem:[#allocation8 + $0x140] sm:$0xff]  ;;  %v9043_v55 = vcombine.low %v665_v44, %v669_v45 }
  0x7c   :  { %392 = vmatpush1.bf16.msra.mxu0 %v8859_v30  ;;  %435 = vmatpush1.bf16.msra.mxu1 %v8861_v31  ;;  %v533_v51 = vld [vmem:[#allocation8 + $0x160] sm:$0xff] }
  0x7d   :  { %393 = vmatprep.subr.bf16.mxu0 %v8852_v32  ;;  %436 = vmatprep.subr.bf16.mxu1 %v8854_v33  ;;  %v657_v52 = vld [vmem:[#allocation8 + $0x540] sm:$0xff]  ;;  %v8908_v56 = vcombine.high %v529_v50, %v533_v51  ;;  %v8907_v62 = vcombine.low %v529_v50, %v533_v51 }
  0x7e   :  { %411 = vmatprep.mubr.bf16.mxu0 %v10354_v0  ;;  %454 = vmatprep.mubr.bf16.mxu1 %v10354_v0  ;;  %v661_v53 = vld [vmem:[#allocation8 + $0x560] sm:$0xff] }
  0x7f   :  { %v9036_v57 = vcombine.high %v657_v52, %v661_v53  ;;  %v521_v58 = vld [vmem:[#allocation8 + $0x100] sm:$0xff]  ;;  %v9035_v1 = vcombine.low %v657_v52, %v661_v53 }
  0x80   :  { %394 = vmatpush1.bf16.msra.mxu0 %v8851_v38  ;;  %437 = vmatpush1.bf16.msra.mxu1 %v8853_v39  ;;  %v525_v59 = vld [vmem:[#allocation8 + $0x120] sm:$0xff] }
  0x81   :  { %3603 = vmatprep.subr.bf16.mxu0 %v8924_v40  ;;  %3646 = vmatprep.subr.bf16.mxu1 %v9052_v41  ;;  %v649_v60 = vld [vmem:[#allocation8 + $0x500] sm:$0xff]  ;;  %v8900_v2 = vcombine.high %v521_v58, %v525_v59  ;;  %v8899_v6 = vcombine.low %v521_v58, %v525_v59 }
  0x82   :  { %v653_v61 = vld [vmem:[#allocation8 + $0x520] sm:$0xff] }
  0x83   :  { %8865 = vmatmul.mubr.msk.bf16.vlgmr.msra.gmra.mxu0 %vm289_vm0, %v150_v27  ;;  %8866 = vmatmul.mubr.msk.bf16.vlgmr.msra.gmra.mxu1 %vm289_vm0, %v150_v27  ;;  %v513_v63 = vld [vmem:[#allocation8 + $0xc0] sm:$0xff]  ;;  %v9028_v5 = vcombine.high %v649_v60, %v653_v61  ;;  %v9027_v9 = vcombine.low %v649_v60, %v653_v61 }
  0x84   :  { %3604 = vmatpush1.bf16.msra.mxu0 %v8923_v46  ;;  %3647 = vmatpush1.bf16.msra.mxu1 %v9051_v47  ;;  %v517_v0 = vld [vmem:[#allocation8 + $0xe0] sm:$0xff] }
  0x85   :  { %3605 = vmatprep.subr.bf16.mxu0 %v8916_v48  ;;  %3648 = vmatprep.subr.bf16.mxu1 %v9044_v49  ;;  %v641_v3 = vld [vmem:[#allocation8 + $0x4c0] sm:$0xff]  ;;  %v8892_v10 = vcombine.high %v513_v63, %v517_v0  ;;  %v8891_v14 = vcombine.low %v513_v63, %v517_v0 }
  0x86   :  { %v645_v4 = vld [vmem:[#allocation8 + $0x4e0] sm:$0xff] }
  0x87   :  { %v505_v7 = vld [vmem:[#allocation8 + $0x80] sm:$0xff]  ;;  %v9020_v13 = vcombine.high %v641_v3, %v645_v4  ;;  %v9019_v17 = vcombine.low %v641_v3, %v645_v4 }
  0x88   :  { %3606 = vmatpush1.bf16.msra.mxu0 %v8915_v54  ;;  %3649 = vmatpush1.bf16.msra.mxu1 %v9043_v55  ;;  %v509_v8 = vld [vmem:[#allocation8 + $0xa0] sm:$0xff] }
  0x89   :  { %3607 = vmatprep.subr.bf16.mxu0 %v8908_v56  ;;  %3650 = vmatprep.subr.bf16.mxu1 %v9036_v57  ;;  %v633_v11 = vld [vmem:[#allocation8 + $0x480] sm:$0xff]  ;;  %v8884_v18 = vcombine.high %v505_v7, %v509_v8  ;;  %v8883_v22 = vcombine.low %v505_v7, %v509_v8 }
  0x8a   :  { %v637_v12 = vld [vmem:[#allocation8 + $0x4a0] sm:$0xff] }
  0x8b   :  { %v497_v15 = vld [vmem:[#allocation8 + $0x40] sm:$0xff]  ;;  %v9012_v21 = vcombine.high %v633_v11, %v637_v12  ;;  %v9011_v25 = vcombine.low %v633_v11, %v637_v12 }
  0x8c   :  { %3608 = vmatpush1.bf16.msra.mxu0 %v8907_v62  ;;  %3651 = vmatpush1.bf16.msra.mxu1 %v9035_v1  ;;  %v501_v16 = vld [vmem:[#allocation8 + $0x60] sm:$0xff] }
  0x8d   :  { %3609 = vmatprep.subr.bf16.mxu0 %v8900_v2  ;;  %3652 = vmatprep.subr.bf16.mxu1 %v9028_v5  ;;  %v625_v19 = vld [vmem:[#allocation8 + $0x440] sm:$0xff]  ;;  %v8876_v26 = vcombine.high %v497_v15, %v501_v16  ;;  %v8875_v30 = vcombine.low %v497_v15, %v501_v16 }
  0x8e   :  { %v629_v20 = vld [vmem:[#allocation8 + $0x460] sm:$0xff] }
  0x8f   :  { %v489_v23 = vld [vmem:[#allocation8] sm:$0xff]  ;;  %v9004_v29 = vcombine.high %v625_v19, %v629_v20  ;;  %v9003_v33 = vcombine.low %v625_v19, %v629_v20 }
  0x90   :  { %3610 = vmatpush1.bf16.msra.mxu0 %v8899_v6  ;;  %3653 = vmatpush1.bf16.msra.mxu1 %v9027_v9  ;;  %v493_v24 = vld [vmem:[#allocation8 + $0x20] sm:$0xff] }
  0x91   :  { %3611 = vmatprep.subr.bf16.mxu0 %v8892_v10  ;;  %3654 = vmatprep.subr.bf16.mxu1 %v9020_v13  ;;  %v617_v27 = vld [vmem:[#allocation8 + $0x400] sm:$0xff]  ;;  %v8868_v34 = vcombine.high %v489_v23, %v493_v24  ;;  %v8867_v38 = vcombine.low %v489_v23, %v493_v24 }
  0x92   :  { %v621_v28 = vld [vmem:[#allocation8 + $0x420] sm:$0xff] }
  0x93   :  { %v609_v31 = vld [vmem:[#allocation8 + $0x3c0] sm:$0xff]  ;;  %v8996_v37 = vcombine.high %v617_v27, %v621_v28  ;;  %v8995_v41 = vcombine.low %v617_v27, %v621_v28 }
  0x94   :  { %3612 = vmatpush1.bf16.msra.mxu0 %v8891_v14  ;;  %3655 = vmatpush1.bf16.msra.mxu1 %v9019_v17  ;;  %v613_v32 = vld [vmem:[#allocation8 + $0x3e0] sm:$0xff] }
  0x95   :  { %3613 = vmatprep.subr.bf16.mxu0 %v8884_v18  ;;  %3656 = vmatprep.subr.bf16.mxu1 %v9012_v21  ;;  %v737_v35 = vld [vmem:[#allocation8 + $0x7c0] sm:$0xff]  ;;  %v8988_v42 = vcombine.high %v609_v31, %v613_v32  ;;  %v8987_v46 = vcombine.low %v609_v31, %v613_v32 }
  0x96   :  { %v741_v36 = vld [vmem:[#allocation8 + $0x7e0] sm:$0xff] }
  0x97   :  { %v601_v39 = vld [vmem:[#allocation8 + $0x380] sm:$0xff]  ;;  %v9116_v45 = vcombine.high %v737_v35, %v741_v36  ;;  %v9115_v49 = vcombine.low %v737_v35, %v741_v36 }
  0x98   :  { %3614 = vmatpush1.bf16.msra.mxu0 %v8883_v22  ;;  %3657 = vmatpush1.bf16.msra.mxu1 %v9011_v25  ;;  %v605_v40 = vld [vmem:[#allocation8 + $0x3a0] sm:$0xff] }
  0x99   :  { %3615 = vmatprep.subr.bf16.mxu0 %v8876_v26  ;;  %3658 = vmatprep.subr.bf16.mxu1 %v9004_v29  ;;  %v729_v43 = vld [vmem:[#allocation8 + $0x780] sm:$0xff]  ;;  %v8980_v50 = vcombine.high %v601_v39, %v605_v40  ;;  %v8979_v54 = vcombine.low %v601_v39, %v605_v40 }
  0x9a   :  { %v733_v44 = vld [vmem:[#allocation8 + $0x7a0] sm:$0xff] }
  0x9b   :  { %v593_v47 = vld [vmem:[#allocation8 + $0x340] sm:$0xff]  ;;  %v9108_v53 = vcombine.high %v729_v43, %v733_v44  ;;  %v9107_v57 = vcombine.low %v729_v43, %v733_v44  ;;  %v169_v44 = vlaneseq }
  0x9c   :  { %3616 = vmatpush1.bf16.msra.mxu0 %v8875_v30  ;;  %3659 = vmatpush1.bf16.msra.mxu1 %v9003_v33  ;;  %v597_v48 = vld [vmem:[#allocation8 + $0x360] sm:$0xff] }
  0x9d   :  { %3617 = vmatprep.subr.bf16.mxu0 %v8868_v34  ;;  %3660 = vmatprep.subr.bf16.mxu1 %v8996_v37  ;;  %v721_v51 = vld [vmem:[#allocation8 + $0x740] sm:$0xff]  ;;  %v8972_v58 = vcombine.high %v593_v47, %v597_v48  ;;  %v8971_v62 = vcombine.low %v593_v47, %v597_v48 }
  0x9e   :  { %v725_v52 = vld [vmem:[#allocation8 + $0x760] sm:$0xff] }
  0x9f   :  { %v585_v55 = vld [vmem:[#allocation8 + $0x300] sm:$0xff]  ;;  %v9100_v61 = vcombine.high %v721_v51, %v725_v52  ;;  %v9099_v1 = vcombine.low %v721_v51, %v725_v52 }
  0xa0   :  { %3618 = vmatpush1.bf16.msra.mxu0 %v8867_v38  ;;  %3661 = vmatpush1.bf16.msra.mxu1 %v8995_v41  ;;  %v589_v56 = vld [vmem:[#allocation8 + $0x320] sm:$0xff] }
  0xa1   :  { %3619 = vmatprep.subr.bf16.mxu0 %v8988_v42  ;;  %3662 = vmatprep.subr.bf16.mxu1 %v9116_v45  ;;  %v713_v59 = vld [vmem:[#allocation8 + $0x700] sm:$0xff]  ;;  %v8964_v2 = vcombine.high %v585_v55, %v589_v56  ;;  %v8963_v6 = vcombine.low %v585_v55, %v589_v56  ;;  %v10460_v45 = vshrl.u32 %v169_v44, 7 }
  0xa2   :  { %v717_v60 = vld [vmem:[#allocation8 + $0x720] sm:$0xff] }
  0xa3   :  { %v577_v63 = vld [vmem:[#allocation8 + $0x2c0] sm:$0xff]  ;;  %v9092_v5 = vcombine.high %v713_v59, %v717_v60  ;;  %v9091_v7 = vcombine.low %v713_v59, %v717_v60  ;;  %v10466_v47 = vsub.s32 0, %v10460_v45  ;;  %v10469_v48 = vsub.s32 3, %v10460_v45 }
  0xa4   :  { %3620 = vmatpush2.bf16.msra.mxu0 %v8987_v46  ;;  %3663 = vmatpush2.bf16.msra.mxu1 %v9115_v49  ;;  %v581_v0 = vld [vmem:[#allocation8 + $0x2e0] sm:$0xff]  ;;  %v10463_v46 = vsub.s32 1, %v10460_v45  ;;  %v10471_v49 = vld [vmem:[#allocation7] sm:$0xff]  ;;  %v10485_v59 = vsub.s32 5, %v10460_v45 }
  0xa5   :  { %3621 = vmatprep.subr.bf16.mxu0 %v8980_v50  ;;  %3664 = vmatprep.subr.bf16.mxu1 %v9108_v53  ;;  %v705_v3 = vld [vmem:[#allocation8 + $0x6c0] sm:$0xff]  ;;  %v8956_v8 = vcombine.high %v577_v63, %v581_v0  ;;  %v8955_v10 = vcombine.low %v577_v63, %v581_v0  ;;  %v10474_v50 = vsub.s32 2, %v10460_v45  ;;  %v184_v56 = vrot.slane %v10471_v49, %v10469_v48 }
  0xa6   :  { %v709_v4 = vld [vmem:[#allocation8 + $0x6e0] sm:$0xff]  ;;  %v176_v53 = vrot.slane %v10471_v49, %v10463_v46 }
  0xa7   :  { %v9084_v9 = vcombine.high %v705_v3, %v709_v4  ;;  %v9083_v11 = vcombine.low %v705_v3, %v709_v4  ;;  %v569_v12 = vld [vmem:[#allocation8 + $0x280] sm:$0xff] }
  0xa8   :  { %3622 = vmatpush2.bf16.msra.mxu0 %v8979_v54  ;;  %3665 = vmatpush2.bf16.msra.mxu1 %v9107_v57  ;;  %v573_v13 = vld [vmem:[#allocation8 + $0x2a0] sm:$0xff]  ;;  %v172_v54 = vrot.slane %v10471_v49, %v10466_v47  ;;  %v180_v57 = vrot.slane %v10471_v49, %v10474_v50 }
  0xa9   :  { %3623 = vmatprep.subr.bf16.mxu0 %v8972_v58  ;;  %3666 = vmatprep.subr.bf16.mxu1 %v9100_v61  ;;  %v697_v14 = vld [vmem:[#allocation8 + $0x680] sm:$0xff]  ;;  %v8948_v15 = vcombine.high %v569_v12, %v573_v13  ;;  %v8947_v17 = vcombine.low %v569_v12, %v573_v13  ;;  %v10488_v61 = vsub.s32 7, %v10460_v45 }
  0xaa   :  { %v701_v16 = vld [vmem:[#allocation8 + $0x6a0] sm:$0xff] }
  0xab   :  { %v9075_v18 = vcombine.low %v697_v14, %v701_v16  ;;  %v9076_v19 = vcombine.high %v697_v14, %v701_v16  ;;  %v561_v20 = vld [vmem:[#allocation8 + $0x240] sm:$0xff]  ;;  %v200_v12 = vrot.slane %v10471_v49, %v10488_v61 }
  0xac   :  { %3624 = vmatpush2.bf16.msra.mxu0 %v8971_v62  ;;  %3667 = vmatpush2.bf16.msra.mxu1 %v9099_v1  ;;  %v565_v21 = vld [vmem:[#allocation8 + $0x260] sm:$0xff] }
  0xad   :  { %3625 = vmatprep.subr.bf16.mxu0 %v8964_v2  ;;  %3668 = vmatprep.subr.bf16.mxu1 %v9092_v5  ;;  %v689_v22 = vld [vmem:[#allocation8 + $0x640] sm:$0xff]  ;;  %v8940_v23 = vcombine.high %v561_v20, %v565_v21  ;;  %v8939_v25 = vcombine.low %v561_v20, %v565_v21 }
  0xae   :  { %v693_v24 = vld [vmem:[#allocation8 + $0x660] sm:$0xff] }
  0xaf   :  { %v9067_v26 = vcombine.low %v689_v22, %v693_v24  ;;  %v9068_v27 = vcombine.high %v689_v22, %v693_v24  ;;  %v553_v28 = vld [vmem:[#allocation8 + $0x200] sm:$0xff] }
  0xb0   :  { %3626 = vmatpush2.bf16.msra.mxu0 %v8963_v6  ;;  %3669 = vmatpush2.bf16.msra.mxu1 %v9091_v7  ;;  %v557_v29 = vld [vmem:[#allocation8 + $0x220] sm:$0xff] }
  0xb1   :  { %3627 = vmatprep.subr.bf16.mxu0 %v8956_v8  ;;  %3670 = vmatprep.subr.bf16.mxu1 %v9084_v9  ;;  %v681_v30 = vld [vmem:[#allocation8 + $0x600] sm:$0xff]  ;;  %v8932_v31 = vcombine.high %v553_v28, %v557_v29  ;;  %v8931_v33 = vcombine.low %v553_v28, %v557_v29  ;;  %v192_v8 = vrot.slane %v10471_v49, %v10485_v59 }
  0xb2   :  { %v685_v32 = vld [vmem:[#allocation8 + $0x620] sm:$0xff] }
  0xb3   :  { %v9059_v34 = vcombine.low %v681_v30, %v685_v32  ;;  %v9060_v35 = vcombine.high %v681_v30, %v685_v32  ;;  %v10444_v36 = vld [vmem:[#allocation8 + $0x9c0] sm:$0xff] }
  0xb4   :  { %3628 = vmatpush2.bf16.msra.mxu0 %v8955_v10  ;;  %3671 = vmatpush2.bf16.msra.mxu1 %v9083_v11  ;;  %v10446_v37 = vld [vmem:[#allocation8 + $0x9e0] sm:$0xff] }
  0xb5   :  { %3629 = vmatprep.subr.bf16.mxu0 %v8948_v15  ;;  %3672 = vmatprep.subr.bf16.mxu1 %v9076_v19  ;;  %v10448_v38 = vld [vmem:[#allocation8 + $0xdc0] sm:$0xff]  ;;  %v9180_v39 = vcombine.high %v10444_v36, %v10446_v37  ;;  %v9179_v41 = vcombine.low %v10444_v36, %v10446_v37 }
  0xb6   :  { %v10452_v40 = vld [vmem:[#allocation8 + $0xde0] sm:$0xff] }
  0xb7   :  { %v9307_v42 = vcombine.low %v10448_v38, %v10452_v40  ;;  %v9308_v43 = vcombine.high %v10448_v38, %v10452_v40  ;;  %v793_v16 = vld [vmem:[#allocation8 + $0x980] sm:$0xff] }
  0xb8   :  { %3630 = vmatpush2.bf16.msra.mxu0 %v8947_v17  ;;  %3673 = vmatpush2.bf16.msra.mxu1 %v9075_v18  ;;  %v797_v17 = vld [vmem:[#allocation8 + $0x9a0] sm:$0xff] }
  0xb9   :  { %3631 = vmatprep.subr.bf16.mxu0 %v8940_v23  ;;  %3674 = vmatprep.subr.bf16.mxu1 %v9068_v27  ;;  %v921_v22 = vld [vmem:[#allocation8 + $0xd80] sm:$0xff] }
  0xba   :  { %v925_v23 = vld [vmem:[#allocation8 + $0xda0] sm:$0xff] }
  0xbb   :  { %v905_v36 = vld [vmem:[#allocation8 + $0xd00] sm:$0xff] }
  0xbc   :  { %3632 = vmatpush2.bf16.msra.mxu0 %v8939_v25  ;;  %3675 = vmatpush2.bf16.msra.mxu1 %v9067_v26  ;;  %v909_v37 = vld [vmem:[#allocation8 + $0xd20] sm:$0xff] }
  0xbd   :  { %3633 = vmatprep.subr.bf16.mxu0 %v8932_v31  ;;  %3676 = vmatprep.subr.bf16.mxu1 %v9060_v35  ;;  %v9172_v31 = vcombine.high %v793_v16, %v797_v17  ;;  %v9300_v35 = vcombine.high %v921_v22, %v925_v23 }
  0xc0   :  { %3634 = vmatpush2.bf16.msra.mxu0 %v8931_v33  ;;  %3677 = vmatpush2.bf16.msra.mxu1 %v9059_v34 }
  0xc1   :  { %3689 = vmatprep.subr.bf16.mxu0 %v9180_v39  ;;  %3732 = vmatprep.subr.bf16.mxu1 %v9308_v43  ;;  %v785_v39 = vld [vmem:[#allocation8 + $0x940] sm:$0xff] }
  0xc2   :  { %v789_v43 = vld [vmem:[#allocation8 + $0x960] sm:$0xff] }
 0x13b   :  { %v327_v51 = vpop.f32.mrf.mxu0  ;;  %v370_v52 = vpop.f32.mrf.mxu1 }
 0x13c   :  { %v328_v1 = vadd.f32 %v327_v51, %v172_v54  ;;  %v371_v5 = vadd.f32 %v370_v52, %v180_v57  ;;  %v913_v51 = vld [vmem:[#allocation8 + $0xd40] sm:$0xff] }
 0x13d   :  { %v329_v55 = vpop.f32.mrf.mxu0  ;;  %v372_v58 = vpop.f32.mrf.mxu1  ;;  %v917_v52 = vld [vmem:[#allocation8 + $0xd60] sm:$0xff] }
 0x13e   :  { %v330_v62 = vadd.f32 %v329_v55, %v176_v53  ;;  %v373_v2 = vadd.f32 %v372_v58, %v184_v56  ;;  %v465_v19 = vmax.f32 %v328_v1, 0.0  ;;  %v467_v25 = vmax.f32 %v371_v5, 0.0  ;;  %v777_v1 = vld [vmem:[#allocation8 + $0x900] sm:$0xff] }
 0x13f   :  { %v331_v60 = vpop.f32.mrf.mxu0  ;;  %v374_v0 = vpop.f32.mrf.mxu1  ;;  %v9299_v58 = vcombine.low %v921_v22, %v925_v23  ;;  %v9291_v38 = vcombine.low %v913_v51, %v917_v52 }
 0x140   :  { %v332_v63 = vadd.f32 %v331_v60, %v172_v54  ;;  %v375_v3 = vadd.f32 %v374_v0, %v180_v57  ;;  %v466_v13 = vmax.f32 %v330_v62, 0.0  ;;  %v468_v20 = vmax.f32 %v373_v2, 0.0  ;;  %v781_v2 = vld [vmem:[#allocation8 + $0x920] sm:$0xff] }
 0x141   :  { %v333_v4 = vpop.f32.mrf.mxu0  ;;  %v376_v7 = vpop.f32.mrf.mxu1  ;;  %v9171_v54 = vcombine.low %v793_v16, %v797_v17  ;;  %v9164_v60 = vcombine.high %v785_v39, %v789_v43  ;;  %v9292_v0 = vcombine.high %v913_v51, %v917_v52  ;;  %v9156_v40 = vcombine.high %v777_v1, %v781_v2  ;;  %v761_v16 = vld [vmem:[#allocation8 + $0x880] sm:$0xff] }
 0x142   :  { %v334_v6 = vadd.f32 %v333_v4, %v176_v53  ;;  %v473_v9 = vmax.f32 %v332_v63, 0.0  ;;  %v377_v10 = vadd.f32 %v376_v7, %v184_v56  ;;  %v475_v14 = vmax.f32 %v375_v3, 0.0  ;;  %v769_v7 = vld [vmem:[#allocation8 + $0x8c0] sm:$0xff] }
 0x143   :  { %v10492_v11 = vpop.f32.mrf.mxu0  ;;  %v10496_v18 = vpop.f32.mrf.mxu1  ;;  %v9163_v4 = vcombine.low %v785_v39, %v789_v43  ;;  %v765_v17 = vld [vmem:[#allocation8 + $0x8a0] sm:$0xff] }
 0x144   :  { %v474_v15 = vmax.f32 %v334_v6, 0.0  ;;  %v476_v21 = vmax.f32 %v377_v10, 0.0  ;;  %v10500_v29 = vpack.c.bf16 %v473_v9, %v465_v19  ;;  %v10506_v34 = vpack.c.bf16 %v475_v14, %v467_v25  ;;  %v897_v9 = vld [vmem:[#allocation8 + $0xcc0] sm:$0xff] }
 0x145   :  { %v415_v24 = vpop.f32.mrf.mxu0  ;;  %v458_v28 = vpop.f32.mrf.mxu1  ;;  %v9284_v6 = vcombine.high %v905_v36, %v909_v37  ;;  %v901_v10 = vld [vmem:[#allocation8 + $0xce0] sm:$0xff]  ;;  %v9140_v23 = vcombine.high %v761_v16, %v765_v17 }
 0x146   :  { %v10498_v26 = vpack.c.bf16 %v474_v15, %v466_v13  ;;  %v416_v27 = vadd.f32 %v415_v24, %v192_v8  ;;  %v10502_v30 = vpack.c.bf16 %v476_v21, %v468_v20  ;;  %v459_v33 = vadd.f32 %v458_v28, %v200_v12  ;;  %v889_v19 = vld [vmem:[#allocation8 + $0xc80] sm:$0xff] }
 0x147   :  { %v10504_v32 = vpop.f32.mrf.mxu0  ;;  %v10509_v44 = vpop.f32.mrf.mxu1  ;;  %v9283_v13 = vcombine.low %v905_v36, %v909_v37  ;;  %v9276_v15 = vcombine.high %v897_v9, %v901_v10  ;;  %v893_v20 = vld [vmem:[#allocation8 + $0xca0] sm:$0xff]  ;;  %v9275_v22 = vcombine.low %v897_v9, %v901_v10 }
 0x148   :  { %3635 = vmatprep.mubr.bf16.mxu0 %v10498_v26  ;;  %3678 = vmatprep.mubr.bf16.mxu1 %v10502_v30  ;;  %v470_v55 = vmax.f32 %v416_v27, 0.0  ;;  %v472_v62 = vmax.f32 %v459_v33, 0.0  ;;  %v9268_v24 = vcombine.high %v889_v19, %v893_v20  ;;  %v753_v25 = vld [vmem:[#allocation8 + $0x840] sm:$0xff]  ;;  %v9139_v33 = vcombine.low %v761_v16, %v765_v17 }
 0x149   :  { %3636 = vmatmul.mubr.bf16.vlgmr.msra.gmra.mxu0 %v10500_v29  ;;  %v419_v53 = vpop.f32.mrf.mxu0  ;;  %3679 = vmatmul.mubr.bf16.vlgmr.msra.gmra.mxu1 %v10506_v34  ;;  %v462_v57 = vpop.f32.mrf.mxu1  ;;  %v757_v27 = vld [vmem:[#allocation8 + $0x860] sm:$0xff] }
 0x14a   :  { %3690 = vmatpush1.bf16.msra.mxu0 %v9179_v41  ;;  %v420_v56 = vadd.f32 %v419_v53, %v192_v8  ;;  %3733 = vmatpush1.bf16.msra.mxu1 %v9307_v42  ;;  %v463_v63 = vadd.f32 %v462_v57, %v200_v12  ;;  %v773_v8 = vld [vmem:[#allocation8 + $0x8e0] sm:$0xff]  ;;  %v9155_v12 = vcombine.low %v777_v1, %v781_v2 }
 0x14b   :  { %3691 = vmatprep.subr.bf16.mxu0 %v9172_v31  ;;  %3734 = vmatprep.subr.bf16.mxu1 %v9300_v35  ;;  %v9148_v14 = vcombine.high %v769_v7, %v773_v8  ;;  %v9147_v21 = vcombine.low %v769_v7, %v773_v8  ;;  %v881_v28 = vld [vmem:[#allocation8 + $0xc40] sm:$0xff]  ;;  %v9267_v35 = vcombine.low %v889_v19, %v893_v20 }
 0x14c   :  { %v478_v3 = vmax.f32 %v420_v56, 0.0  ;;  %v480_v41 = vmax.f32 %v463_v63, 0.0  ;;  %v885_v31 = vld [vmem:[#allocation8 + $0xc60] sm:$0xff]  ;;  %v9132_v39 = vcombine.high %v753_v25, %v757_v27 }
 0x14d   :  { %v9260_v43 = vcombine.high %v881_v28, %v885_v31  ;;  %v745_v51 = vld [vmem:[#allocation8 + $0x800] sm:$0xff]  ;;  %v9259_v56 = vcombine.low %v881_v28, %v885_v31 }
 0x14e   :  { %3692 = vmatpush1.bf16.msra.mxu0 %v9171_v54  ;;  %v10520_v5 = vpack.c.bf16 %v478_v3, %v470_v55  ;;  %3735 = vmatpush1.bf16.msra.mxu1 %v9299_v58  ;;  %v10522_v42 = vpack.c.bf16 %v480_v41, %v472_v62  ;;  %v749_v52 = vld [vmem:[#allocation8 + $0x820] sm:$0xff]  ;;  %v9131_v55 = vcombine.low %v753_v25, %v757_v27 }
 0x14f   :  { %3693 = vmatprep.subr.bf16.mxu0 %v9164_v60  ;;  %3736 = vmatprep.subr.bf16.mxu1 %v9292_v0  ;;  %v873_v53 = vld [vmem:[#allocation8 + $0xc00] sm:$0xff]  ;;  %v9124_v57 = vcombine.high %v745_v51, %v749_v52  ;;  %v9123_v1 = vcombine.low %v745_v51, %v749_v52 }
 0x150   :  { %3721 = vmatprep.mubr.bf16.mxu0 %v10520_v5  ;;  %3764 = vmatprep.mubr.bf16.mxu1 %v10522_v42  ;;  %v877_v54 = vld [vmem:[#allocation8 + $0xc20] sm:$0xff] }
 0x151   :  { %v9252_v58 = vcombine.high %v873_v53, %v877_v54  ;;  %v865_v60 = vld [vmem:[#allocation8 + $0xbc0] sm:$0xff]  ;;  %v9251_v2 = vcombine.low %v873_v53, %v877_v54 }
 0x152   :  { %3694 = vmatpush1.bf16.msra.mxu0 %v9163_v4  ;;  %3737 = vmatpush1.bf16.msra.mxu1 %v9291_v38  ;;  %v869_v62 = vld [vmem:[#allocation8 + $0xbe0] sm:$0xff] }
 0x153   :  { %3695 = vmatprep.subr.bf16.mxu0 %v9156_v40  ;;  %3738 = vmatprep.subr.bf16.mxu1 %v9284_v6  ;;  %v993_v63 = vld [vmem:[#allocation8 + $0xfc0] sm:$0xff]  ;;  %v9244_v3 = vcombine.high %v865_v60, %v869_v62  ;;  %v9243_v40 = vcombine.low %v865_v60, %v869_v62 }
 0x154   :  { %v997_v0 = vld [vmem:[#allocation8 + $0xfe0] sm:$0xff] }
 0x155   :  { %v9372_v36 = vcombine.high %v993_v63, %v997_v0  ;;  %v857_v37 = vld [vmem:[#allocation8 + $0xb80] sm:$0xff]  ;;  %v9371_v6 = vcombine.low %v993_v63, %v997_v0  ;;  %v10530_v63 = vsub.s32 6, %v10460_v45 }
 0x156   :  { %3696 = vmatpush1.bf16.msra.mxu0 %v9155_v12  ;;  %3739 = vmatpush1.bf16.msra.mxu1 %v9283_v13  ;;  %v861_v41 = vld [vmem:[#allocation8 + $0xba0] sm:$0xff] }
 0x157   :  { %3697 = vmatprep.subr.bf16.mxu0 %v9148_v14  ;;  %3740 = vmatprep.subr.bf16.mxu1 %v9276_v15  ;;  %v985_v4 = vld [vmem:[#allocation8 + $0xf80] sm:$0xff]  ;;  %v9236_v7 = vcombine.high %v857_v37, %v861_v41  ;;  %v9235_v14 = vcombine.low %v857_v37, %v861_v41 }
 0x158   :  { %v989_v38 = vld [vmem:[#allocation8 + $0xfa0] sm:$0xff] }
 0x159   :  { %v9364_v8 = vcombine.high %v985_v4, %v989_v38  ;;  %v849_v9 = vld [vmem:[#allocation8 + $0xb40] sm:$0xff]  ;;  %v9363_v15 = vcombine.low %v985_v4, %v989_v38 }
 0x15a   :  { %3698 = vmatpush1.bf16.msra.mxu0 %v9147_v21  ;;  %3741 = vmatpush1.bf16.msra.mxu1 %v9275_v22  ;;  %v853_v10 = vld [vmem:[#allocation8 + $0xb60] sm:$0xff] }
 0x15b   :  { %3699 = vmatprep.subr.bf16.mxu0 %v9140_v23  ;;  %3742 = vmatprep.subr.bf16.mxu1 %v9268_v24  ;;  %v977_v12 = vld [vmem:[#allocation8 + $0xf40] sm:$0xff]  ;;  %v9228_v16 = vcombine.high %v849_v9, %v853_v10  ;;  %v9227_v23 = vcombine.low %v849_v9, %v853_v10 }
 0x15c   :  { %v981_v13 = vld [vmem:[#allocation8 + $0xf60] sm:$0xff] }
 0x15d   :  { %v9356_v17 = vcombine.high %v977_v12, %v981_v13  ;;  %v841_v19 = vld [vmem:[#allocation8 + $0xb00] sm:$0xff]  ;;  %v9355_v24 = vcombine.low %v977_v12, %v981_v13 }
 0x15e   :  { %3700 = vmatpush1.bf16.msra.mxu0 %v9139_v33  ;;  %3743 = vmatpush1.bf16.msra.mxu1 %v9267_v35  ;;  %v845_v20 = vld [vmem:[#allocation8 + $0xb20] sm:$0xff] }
 0x15f   :  { %3701 = vmatprep.subr.bf16.mxu0 %v9132_v39  ;;  %3744 = vmatprep.subr.bf16.mxu1 %v9260_v43  ;;  %v969_v21 = vld [vmem:[#allocation8 + $0xf00] sm:$0xff]  ;;  %v9220_v25 = vcombine.high %v841_v19, %v845_v20  ;;  %v9219_v39 = vcombine.low %v841_v19, %v845_v20  ;;  %v546_v19 = vld [vmem:[#allocation8 + $0x1c8] sm:$0xff] }
 0x160   :  { %v973_v22 = vld [vmem:[#allocation8 + $0xf20] sm:$0xff]  ;;  %v550_v20 = vld [vmem:[#allocation8 + $0x1e8] sm:$0xff] }
 0x161   :  { %v9348_v27 = vcombine.high %v969_v21, %v973_v22  ;;  %v833_v28 = vld [vmem:[#allocation8 + $0xac0] sm:$0xff]  ;;  %v9347_v43 = vcombine.low %v969_v21, %v973_v22  ;;  %v674_v21 = vld [vmem:[#allocation8 + $0x5c8] sm:$0xff] }
 0x162   :  { %3702 = vmatpush1.bf16.msra.mxu0 %v9131_v55  ;;  %3745 = vmatpush1.bf16.msra.mxu1 %v9259_v56  ;;  %v837_v31 = vld [vmem:[#allocation8 + $0xae0] sm:$0xff]  ;;  %v678_v22 = vld [vmem:[#allocation8 + $0x5e8] sm:$0xff] }
 0x163   :  { %3703 = vmatprep.subr.bf16.mxu0 %v9124_v57  ;;  %3746 = vmatprep.subr.bf16.mxu1 %v9252_v58  ;;  %v961_v33 = vld [vmem:[#allocation8 + $0xec0] sm:$0xff]  ;;  %v9212_v51 = vcombine.high %v833_v28, %v837_v31  ;;  %v9211_v57 = vcombine.low %v833_v28, %v837_v31  ;;  %v10527_v58 = vsub.s32 4, %v10460_v45  ;;  %v538_v31 = vld [vmem:[#allocation8 + $0x188] sm:$0xff] }
 0x164   :  { %v965_v35 = vld [vmem:[#allocation8 + $0xee0] sm:$0xff] }
 0x165   :  { %v9340_v52 = vcombine.high %v961_v33, %v965_v35  ;;  %v825_v53 = vld [vmem:[#allocation8 + $0xa80] sm:$0xff]  ;;  %v9339_v60 = vcombine.low %v961_v33, %v965_v35  ;;  %v188_v41 = vrot.slane %v10471_v49, %v10527_v58  ;;  %v8925_v33 = vcombine.low %v546_v19, %v550_v20  ;;  %v666_v35 = vld [vmem:[#allocation8 + $0x588] sm:$0xff] }
 0x166   :  { %3704 = vmatpush1.bf16.msra.mxu0 %v9123_v1  ;;  %3747 = vmatpush1.bf16.msra.mxu1 %v9251_v2  ;;  %v829_v54 = vld [vmem:[#allocation8 + $0xaa0] sm:$0xff] }
 0x167   :  { %3705 = vmatprep.subr.bf16.mxu0 %v9244_v3  ;;  %3748 = vmatprep.subr.bf16.mxu1 %v9372_v36  ;;  %v953_v55 = vld [vmem:[#allocation8 + $0xe80] sm:$0xff]  ;;  %v9204_v62 = vcombine.high %v825_v53, %v829_v54  ;;  %v9203_v37 = vcombine.low %v825_v53, %v829_v54  ;;  %v414_v13 = vadd.f32 %v10492_v11, %v188_v41  ;;  %v530_v54 = vld [vmem:[#allocation8 + $0x148] sm:$0xff] }
 0x168   :  { %v957_v56 = vld [vmem:[#allocation8 + $0xea0] sm:$0xff] }
 0x169   :  { %v9332_v0 = vcombine.high %v953_v55, %v957_v56  ;;  %v817_v1 = vld [vmem:[#allocation8 + $0xa40] sm:$0xff]  ;;  %v9331_v4 = vcombine.low %v953_v55, %v957_v56  ;;  %v534_v55 = vld [vmem:[#allocation8 + $0x168] sm:$0xff] }
 0x16a   :  { %3706 = vmatpush2.bf16.msra.mxu0 %v9243_v40  ;;  %3749 = vmatpush2.bf16.msra.mxu1 %v9371_v6  ;;  %v821_v2 = vld [vmem:[#allocation8 + $0xa60] sm:$0xff]  ;;  %v196_v40 = vrot.slane %v10471_v49, %v10530_v63 }
 0x16b   :  { %3707 = vmatprep.subr.bf16.mxu0 %v9236_v7  ;;  %3750 = vmatprep.subr.bf16.mxu1 %v9364_v8  ;;  %v945_v3 = vld [vmem:[#allocation8 + $0xe40] sm:$0xff]  ;;  %v9196_v38 = vcombine.high %v817_v1, %v821_v2  ;;  %v9195_v10 = vcombine.low %v817_v1, %v821_v2  ;;  %v8910_v1 = vcombine.high %v530_v54, %v534_v55 }
 0x16c   :  { %v949_v36 = vld [vmem:[#allocation8 + $0xe60] sm:$0xff]  ;;  %v461_v49 = vadd.f32 %v10509_v44, %v196_v40  ;;  %v542_v44 = vld [vmem:[#allocation8 + $0x1a8] sm:$0xff] }
 0x16d   :  { %v9324_v45 = vcombine.high %v945_v3, %v949_v36  ;;  %v809_v6 = vld [vmem:[#allocation8 + $0xa00] sm:$0xff]  ;;  %v9323_v12 = vcombine.low %v945_v3, %v949_v36  ;;  %v8918_v53 = vcombine.high %v538_v31, %v542_v44  ;;  %v522_v3 = vld [vmem:[#allocation8 + $0x108] sm:$0xff] }
 0x16e   :  { %3708 = vmatpush2.bf16.msra.mxu0 %v9235_v14  ;;  %3751 = vmatpush2.bf16.msra.mxu1 %v9363_v15  ;;  %v813_v7 = vld [vmem:[#allocation8 + $0xa20] sm:$0xff]  ;;  %v418_v14 = vadd.f32 %v10504_v32, %v188_v41  ;;  %v8926_v32 = vcombine.high %v546_v19, %v550_v20  ;;  %v479_v28 = vmax.f32 %v461_v49, 0.0  ;;  %v526_v36 = vld [vmem:[#allocation8 + $0x128] sm:$0xff] }
 0x16f   :  { %3709 = vmatprep.subr.bf16.mxu0 %v9228_v16  ;;  %3752 = vmatprep.subr.bf16.mxu1 %v9356_v17  ;;  %v937_v8 = vld [vmem:[#allocation8 + $0xe00] sm:$0xff]  ;;  %v9188_v15 = vcombine.high %v809_v6, %v813_v7  ;;  %v457_v16 = vadd.f32 %v10496_v18, %v196_v40  ;;  %v9054_v18 = vcombine.high %v674_v21, %v678_v22  ;;  %v654_v41 = vld [vmem:[#allocation8 + $0x528] sm:$0xff] }
 0x170   :  { %v941_v9 = vld [vmem:[#allocation8 + $0xe20] sm:$0xff]  ;;  %v8902_v40 = vcombine.high %v522_v3, %v526_v36  ;;  %v634_v49 = vld [vmem:[#allocation8 + $0x488] sm:$0xff] }
 0x171   :  { %v9316_v17 = vcombine.high %v937_v8, %v941_v9  ;;  %v9315_v11 = vcombine.low %v937_v8, %v941_v9  ;;  %v642_v8 = vld [vmem:[#allocation8 + $0x4c8] sm:$0xff] }
 0x172   :  { %3710 = vmatpush2.bf16.msra.mxu0 %v9227_v23  ;;  %3753 = vmatpush2.bf16.msra.mxu1 %v9355_v24  ;;  %v9187_v23 = vcombine.low %v809_v6, %v813_v7  ;;  %v469_v24 = vmax.f32 %v414_v13, 0.0  ;;  %v514_v6 = vld [vmem:[#allocation8 + $0xc8] sm:$0xff] }
 0x173   :  { %3711 = vmatprep.subr.bf16.mxu0 %v9220_v25  ;;  %3754 = vmatprep.subr.bf16.mxu1 %v9348_v27  ;;  %v477_v25 = vmax.f32 %v418_v14, 0.0  ;;  %v471_v27 = vmax.f32 %v457_v16, 0.0  ;;  %v518_v7 = vld [vmem:[#allocation8 + $0xe8] sm:$0xff] }
 0x174   :  { %v646_v9 = vld [vmem:[#allocation8 + $0x4e8] sm:$0xff]  ;;  %v8894_v13 = vcombine.high %v514_v6, %v518_v7  ;;  %v8893_v19 = vcombine.low %v514_v6, %v518_v7 }
 0x175   :  { %v9022_v14 = vcombine.high %v642_v8, %v646_v9  ;;  %v510_v16 = vld [vmem:[#allocation8 + $0xa8] sm:$0xff]  ;;  %v9021_v20 = vcombine.low %v642_v8, %v646_v9 }
 0x176   :  { %3712 = vmatpush2.bf16.msra.mxu0 %v9219_v39  ;;  %3755 = vmatpush2.bf16.msra.mxu1 %v9347_v43  ;;  %v670_v39 = vld [vmem:[#allocation8 + $0x5a8] sm:$0xff]  ;;  %v10540_v43 = vpack.c.bf16 %v477_v25, %v469_v24 }
 0x177   :  { %3713 = vmatprep.subr.bf16.mxu0 %v9212_v51  ;;  %3756 = vmatprep.subr.bf16.mxu1 %v9340_v52  ;;  %v9053_v51 = vcombine.low %v674_v21, %v678_v22  ;;  %v10542_v52 = vpack.c.bf16 %v479_v28, %v471_v27  ;;  %v9046_v56 = vcombine.high %v666_v35, %v670_v39  ;;  %v502_v24 = vld [vmem:[#allocation8 + $0x68] sm:$0xff] }
 0x178   :  { %v626_v25 = vld [vmem:[#allocation8 + $0x448] sm:$0xff] }
 0x179   :  { %v594_v6 = vld [vmem:[#allocation8 + $0x348] sm:$0xff] }
 0x17a   :  { %3714 = vmatpush2.bf16.msra.mxu0 %v9211_v57  ;;  %3757 = vmatpush2.bf16.msra.mxu1 %v9339_v60  ;;  %v658_v57 = vld [vmem:[#allocation8 + $0x548] sm:$0xff] }
 0x17b   :  { %3715 = vmatprep.subr.bf16.mxu0 %v9204_v62  ;;  %3758 = vmatprep.subr.bf16.mxu1 %v9332_v0  ;;  %v662_v60 = vld [vmem:[#allocation8 + $0x568] sm:$0xff]  ;;  %v8917_v62 = vcombine.low %v538_v31, %v542_v44  ;;  %v9045_v0 = vcombine.low %v666_v35, %v670_v39 }
 0x17c   :  { %v9038_v2 = vcombine.high %v658_v57, %v662_v60  ;;  %v490_v31 = vld [vmem:[#allocation8 + $0x8] sm:$0xff] }
 0x17d   :  { %v494_v44 = vld [vmem:[#allocation8 + $0x28] sm:$0xff] }
 0x17e   :  { %3716 = vmatpush2.bf16.msra.mxu0 %v9203_v37  ;;  %3759 = vmatpush2.bf16.msra.mxu1 %v9331_v4  ;;  %v650_v37 = vld [vmem:[#allocation8 + $0x508] sm:$0xff]  ;;  %v8909_v4 = vcombine.low %v530_v54, %v534_v55 }
 0x17f   :  { %3717 = vmatprep.subr.bf16.mxu0 %v9196_v38  ;;  %3760 = vmatprep.subr.bf16.mxu1 %v9324_v45  ;;  %v9037_v38 = vcombine.low %v658_v57, %v662_v60  ;;  %v9030_v45 = vcombine.high %v650_v37, %v654_v41  ;;  %v622_v35 = vld [vmem:[#allocation8 + $0x428] sm:$0xff] }
 0x180   :  { %v610_v55 = vld [vmem:[#allocation8 + $0x3c8] sm:$0xff] }
 0x181   :  { %v738_v57 = vld [vmem:[#allocation8 + $0x7c8] sm:$0xff] }
 0x182   :  { %3718 = vmatpush2.bf16.msra.mxu0 %v9195_v10  ;;  %3761 = vmatpush2.bf16.msra.mxu1 %v9323_v12  ;;  %v8901_v10 = vcombine.low %v522_v3, %v526_v36  ;;  %v9029_v12 = vcombine.low %v650_v37, %v654_v41  ;;  %v742_v60 = vld [vmem:[#allocation8 + $0x7e8] sm:$0xff] }
 0x183   :  { %3719 = vmatprep.subr.bf16.mxu0 %v9188_v15  ;;  %3762 = vmatprep.subr.bf16.mxu1 %v9316_v17  ;;  %v506_v15 = vld [vmem:[#allocation8 + $0x88] sm:$0xff] }
 0x184   :  { %v638_v17 = vld [vmem:[#allocation8 + $0x4a8] sm:$0xff]  ;;  %v8886_v21 = vcombine.high %v506_v15, %v510_v16 }
 0x185   :  { %v9014_v22 = vcombine.high %v634_v49, %v638_v17  ;;  %v9013_v27 = vcombine.low %v634_v49, %v638_v17  ;;  %v602_v3 = vld [vmem:[#allocation8 + $0x388] sm:$0xff] }
 0x186   :  { %3720 = vmatpush2.bf16.msra.mxu0 %v9187_v23  ;;  %3763 = vmatpush2.bf16.msra.mxu1 %v9315_v11  ;;  %v498_v23 = vld [vmem:[#allocation8 + $0x48] sm:$0xff] }
 0x187   :  { %3775 = vmatprep.subr.bf16.mxu0 %v8926_v32  ;;  %3818 = vmatprep.subr.bf16.mxu1 %v9054_v18  ;;  %v630_v11 = vld [vmem:[#allocation8 + $0x468] sm:$0xff]  ;;  %v8885_v32 = vcombine.low %v506_v15, %v510_v16  ;;  %v8878_v28 = vcombine.high %v498_v23, %v502_v24  ;;  %v8877_v39 = vcombine.low %v498_v23, %v502_v24 }
 0x188   :  { %v9006_v18 = vcombine.high %v626_v25, %v630_v11  ;;  %v606_v36 = vld [vmem:[#allocation8 + $0x3a8] sm:$0xff] }
 0x189   :  { %3722 = vmatmul.mubr.bf16.vlgmr.msra.gmra.mxu0 %v10540_v43  ;;  %3765 = vmatmul.mubr.bf16.vlgmr.msra.gmra.mxu1 %v10542_v52  ;;  %v730_v37 = vld [vmem:[#allocation8 + $0x788] sm:$0xff] }
 0x18a   :  { %3776 = vmatpush1.bf16.msra.mxu0 %v8925_v33  ;;  %3807 = vmatprep.mubr.bf16.mxu0 %v10498_v26  ;;  %v618_v33 = vld [vmem:[#allocation8 + $0x408] sm:$0xff] }
 0x18b   :  { %3819 = vmatpush1.bf16.msra.mxu1 %v9053_v51  ;;  %3850 = vmatprep.mubr.bf16.mxu1 %v10502_v30  ;;  %v9005_v51 = vcombine.low %v626_v25, %v630_v11  ;;  %v8998_v54 = vcombine.high %v618_v33, %v622_v35  ;;  %v734_v41 = vld [vmem:[#allocation8 + $0x7a8] sm:$0xff] }
 0x18c   :  { %3777 = vmatprep.subr.bf16.mxu0 %v8918_v53  ;;  %3820 = vmatprep.subr.bf16.mxu1 %v9046_v56  ;;  %v8870_v53 = vcombine.high %v490_v31, %v494_v44  ;;  %v614_v56 = vld [vmem:[#allocation8 + $0x3e8] sm:$0xff] }
 0x18d   :  { %v598_v7 = vld [vmem:[#allocation8 + $0x368] sm:$0xff] }
 0x18e   :  { %3778 = vmatpush1.bf16.msra.mxu0 %v8917_v62  ;;  %v8869_v62 = vcombine.low %v490_v31, %v494_v44  ;;  %v722_v8 = vld [vmem:[#allocation8 + $0x748] sm:$0xff] }
 0x18f   :  { %3821 = vmatpush1.bf16.msra.mxu1 %v9045_v0  ;;  %3779 = vmatprep.subr.bf16.mxu0 %v8910_v1  ;;  %v8997_v0 = vcombine.low %v618_v33, %v622_v35  ;;  %v8990_v1 = vcombine.high %v610_v55, %v614_v56  ;;  %v726_v9 = vld [vmem:[#allocation8 + $0x768] sm:$0xff] }
 0x190   :  { %3822 = vmatprep.subr.bf16.mxu1 %v9038_v2  ;;  %v9118_v2 = vcombine.high %v738_v57, %v742_v60  ;;  %v586_v15 = vld [vmem:[#allocation8 + $0x308] sm:$0xff] }
 0x191   :  { %v590_v16 = vld [vmem:[#allocation8 + $0x328] sm:$0xff] }
 0x192   :  { %3780 = vmatpush1.bf16.msra.mxu0 %v8909_v4  ;;  %v8989_v4 = vcombine.low %v610_v55, %v614_v56  ;;  %v714_v49 = vld [vmem:[#allocation8 + $0x708] sm:$0xff] }
 0x193   :  { %3823 = vmatpush1.bf16.msra.mxu1 %v9037_v38  ;;  %3781 = vmatprep.subr.bf16.mxu0 %v8902_v40  ;;  %v9117_v38 = vcombine.low %v738_v57, %v742_v60  ;;  %v8982_v40 = vcombine.high %v602_v3, %v606_v36  ;;  %v718_v17 = vld [vmem:[#allocation8 + $0x728] sm:$0xff] }
 0x194   :  { %3824 = vmatprep.subr.bf16.mxu1 %v9030_v45  ;;  %v9110_v45 = vcombine.high %v730_v37, %v734_v41  ;;  %v578_v23 = vld [vmem:[#allocation8 + $0x2c8] sm:$0xff] }
 0x195   :  { %v582_v24 = vld [vmem:[#allocation8 + $0x2e8] sm:$0xff] }
 0x196   :  { %3782 = vmatpush1.bf16.msra.mxu0 %v8901_v10  ;;  %v8981_v10 = vcombine.low %v602_v3, %v606_v36  ;;  %v706_v25 = vld [vmem:[#allocation8 + $0x6c8] sm:$0xff] }
 0x197   :  { %3825 = vmatpush1.bf16.msra.mxu1 %v9029_v12  ;;  %3783 = vmatprep.subr.bf16.mxu0 %v8894_v13  ;;  %v9109_v12 = vcombine.low %v730_v37, %v734_v41  ;;  %v8974_v13 = vcombine.high %v594_v6, %v598_v7  ;;  %v710_v11 = vld [vmem:[#allocation8 + $0x6e8] sm:$0xff] }
 0x198   :  { %3826 = vmatprep.subr.bf16.mxu1 %v9022_v14  ;;  %v9102_v14 = vcombine.high %v722_v8, %v726_v9  ;;  %v570_v31 = vld [vmem:[#allocation8 + $0x288] sm:$0xff] }
 0x199   :  { %v574_v44 = vld [vmem:[#allocation8 + $0x2a8] sm:$0xff] }
 0x19a   :  { %3784 = vmatpush1.bf16.msra.mxu0 %v8893_v19  ;;  %v8973_v19 = vcombine.low %v594_v6, %v598_v7  ;;  %v698_v33 = vld [vmem:[#allocation8 + $0x688] sm:$0xff] }
 0x19b   :  { %3827 = vmatpush1.bf16.msra.mxu1 %v9021_v20  ;;  %3785 = vmatprep.subr.bf16.mxu0 %v8886_v21  ;;  %v9101_v20 = vcombine.low %v722_v8, %v726_v9  ;;  %v8966_v21 = vcombine.high %v586_v15, %v590_v16  ;;  %v702_v35 = vld [vmem:[#allocation8 + $0x6a8] sm:$0xff] }
 0x19c   :  { %3828 = vmatprep.subr.bf16.mxu1 %v9014_v22  ;;  %v9094_v22 = vcombine.high %v714_v49, %v718_v17  ;;  %v562_v55 = vld [vmem:[#allocation8 + $0x248] sm:$0xff] }
 0x19d   :  { %v566_v56 = vld [vmem:[#allocation8 + $0x268] sm:$0xff] }
 0x19e   :  { %3786 = vmatpush1.bf16.msra.mxu0 %v8885_v32  ;;  %v8965_v32 = vcombine.low %v586_v15, %v590_v16  ;;  %v690_v57 = vld [vmem:[#allocation8 + $0x648] sm:$0xff] }
 0x19f   :  { %3829 = vmatpush1.bf16.msra.mxu1 %v9013_v27  ;;  %3787 = vmatprep.subr.bf16.mxu0 %v8878_v28  ;;  %v9093_v27 = vcombine.low %v714_v49, %v718_v17  ;;  %v8958_v28 = vcombine.high %v578_v23, %v582_v24  ;;  %v694_v60 = vld [vmem:[#allocation8 + $0x668] sm:$0xff] }
 0x1a0   :  { %3830 = vmatprep.subr.bf16.mxu1 %v9006_v18  ;;  %v9086_v18 = vcombine.high %v706_v25, %v710_v11  ;;  %v554_v3 = vld [vmem:[#allocation8 + $0x208] sm:$0xff] }
 0x1a1   :  { %v558_v36 = vld [vmem:[#allocation8 + $0x228] sm:$0xff] }
 0x1a2   :  { %3788 = vmatpush1.bf16.msra.mxu0 %v8877_v39  ;;  %v8957_v39 = vcombine.low %v578_v23, %v582_v24  ;;  %v682_v37 = vld [vmem:[#allocation8 + $0x608] sm:$0xff] }
 0x1a3   :  { %3831 = vmatpush1.bf16.msra.mxu1 %v9005_v51  ;;  %3789 = vmatprep.subr.bf16.mxu0 %v8870_v53  ;;  %v9085_v51 = vcombine.low %v706_v25, %v710_v11  ;;  %v8950_v53 = vcombine.high %v570_v31, %v574_v44  ;;  %v686_v41 = vld [vmem:[#allocation8 + $0x628] sm:$0xff] }
 0x1a4   :  { %3832 = vmatprep.subr.bf16.mxu1 %v8998_v54  ;;  %v9078_v54 = vcombine.high %v698_v33, %v702_v35  ;;  %v802_v6 = vld [vmem:[#allocation8 + $0x9c8] sm:$0xff] }
 0x1a5   :  { %v806_v7 = vld [vmem:[#allocation8 + $0x9e8] sm:$0xff] }
 0x1a6   :  { %3790 = vmatpush1.bf16.msra.mxu0 %v8869_v62  ;;  %v8949_v62 = vcombine.low %v570_v31, %v574_v44  ;;  %v930_v8 = vld [vmem:[#allocation8 + $0xdc8] sm:$0xff]  ;;  %v9181_v49 = vcombine.low %v802_v6, %v806_v7 }
 0x1a7   :  { %3833 = vmatpush1.bf16.msra.mxu1 %v8997_v0  ;;  %3791 = vmatprep.subr.bf16.mxu0 %v8990_v1  ;;  %v9077_v0 = vcombine.low %v698_v33, %v702_v35  ;;  %v8942_v1 = vcombine.high %v562_v55, %v566_v56  ;;  %v934_v9 = vld [vmem:[#allocation8 + $0xde8] sm:$0xff] }
 0x1a8   :  { %3834 = vmatprep.subr.bf16.mxu1 %v9118_v2  ;;  %v9070_v2 = vcombine.high %v690_v57, %v694_v60  ;;  %v794_v15 = vld [vmem:[#allocation8 + $0x988] sm:$0xff] }
 0x1a9   :  { %v798_v16 = vld [vmem:[#allocation8 + $0x9a8] sm:$0xff] }
 0x1aa   :  { %3792 = vmatpush2.bf16.msra.mxu0 %v8989_v4  ;;  %v8941_v4 = vcombine.low %v562_v55, %v566_v56  ;;  %v922_v17 = vld [vmem:[#allocation8 + $0xd88] sm:$0xff] }
 0x1ab   :  { %3835 = vmatpush2.bf16.msra.mxu1 %v9117_v38  ;;  %3793 = vmatprep.subr.bf16.mxu0 %v8982_v40  ;;  %v9069_v38 = vcombine.low %v690_v57, %v694_v60  ;;  %v8934_v40 = vcombine.high %v554_v3, %v558_v36  ;;  %v790_v23 = vld [vmem:[#allocation8 + $0x968] sm:$0xff] }
 0x1ac   :  { %3836 = vmatprep.subr.bf16.mxu1 %v9110_v45  ;;  %v9062_v45 = vcombine.high %v682_v37, %v686_v41  ;;  %v914_v25 = vld [vmem:[#allocation8 + $0xd48] sm:$0xff] }
 0x1ad   :  { %v918_v11 = vld [vmem:[#allocation8 + $0xd68] sm:$0xff] }
 0x1ae   :  { %3794 = vmatpush2.bf16.msra.mxu0 %v8981_v10  ;;  %v8933_v10 = vcombine.low %v554_v3, %v558_v36  ;;  %v778_v31 = vld [vmem:[#allocation8 + $0x908] sm:$0xff] }
 0x1af   :  { %3837 = vmatpush2.bf16.msra.mxu1 %v9109_v12  ;;  %3795 = vmatprep.subr.bf16.mxu0 %v8974_v13  ;;  %v9061_v12 = vcombine.low %v682_v37, %v686_v41  ;;  %v9182_v13 = vcombine.high %v802_v6, %v806_v7  ;;  %v782_v44 = vld [vmem:[#allocation8 + $0x928] sm:$0xff] }
 0x1b0   :  { %3838 = vmatprep.subr.bf16.mxu1 %v9102_v14  ;;  %v9310_v14 = vcombine.high %v930_v8, %v934_v9  ;;  %v906_v33 = vld [vmem:[#allocation8 + $0xd08] sm:$0xff] }
 0x1b1   :  { %v910_v35 = vld [vmem:[#allocation8 + $0xd28] sm:$0xff] }
 0x1b2   :  { %3796 = vmatpush2.bf16.msra.mxu0 %v8973_v19  ;;  %v926_v19 = vld [vmem:[#allocation8 + $0xda8] sm:$0xff] }
 0x1b3   :  { %3839 = vmatpush2.bf16.msra.mxu1 %v9101_v20  ;;  %3797 = vmatprep.subr.bf16.mxu0 %v8966_v21  ;;  %v9309_v20 = vcombine.low %v930_v8, %v934_v9  ;;  %v9174_v21 = vcombine.high %v794_v15, %v798_v16  ;;  %v9302_v24 = vcombine.high %v922_v17, %v926_v19  ;;  %v770_v55 = vld [vmem:[#allocation8 + $0x8c8] sm:$0xff] }
 0x1b4   :  { %3840 = vmatprep.subr.bf16.mxu1 %v9094_v22  ;;  %v786_v22 = vld [vmem:[#allocation8 + $0x948] sm:$0xff] }
 0x1b5   :  { %v774_v56 = vld [vmem:[#allocation8 + $0x8e8] sm:$0xff] }
 0x1b6   :  { %3798 = vmatpush2.bf16.msra.mxu0 %v8965_v32  ;;  %v9173_v32 = vcombine.low %v794_v15, %v798_v16  ;;  %v898_v57 = vld [vmem:[#allocation8 + $0xcc8] sm:$0xff] }
 0x1b7   :  { %3841 = vmatpush2.bf16.msra.mxu1 %v9093_v27  ;;  %3799 = vmatprep.subr.bf16.mxu0 %v8958_v28  ;;  %v9301_v27 = vcombine.low %v922_v17, %v926_v19  ;;  %v9166_v28 = vcombine.high %v786_v22, %v790_v23  ;;  %v902_v60 = vld [vmem:[#allocation8 + $0xce8] sm:$0xff] }
 0x1b8   :  { %3842 = vmatprep.subr.bf16.mxu1 %v9086_v18  ;;  %v9294_v18 = vcombine.high %v914_v25, %v918_v11  ;;  %v762_v3 = vld [vmem:[#allocation8 + $0x888] sm:$0xff] }
 0x1b9   :  { %v766_v36 = vld [vmem:[#allocation8 + $0x8a8] sm:$0xff] }
 0x1ba   :  { %3800 = vmatpush2.bf16.msra.mxu0 %v8957_v39  ;;  %v9165_v39 = vcombine.low %v786_v22, %v790_v23  ;;  %v890_v37 = vld [vmem:[#allocation8 + $0xc88] sm:$0xff] }
 0x1bb   :  { %3843 = vmatpush2.bf16.msra.mxu1 %v9085_v51  ;;  %3801 = vmatprep.subr.bf16.mxu0 %v8950_v53  ;;  %v9293_v51 = vcombine.low %v914_v25, %v918_v11  ;;  %v9158_v53 = vcombine.high %v778_v31, %v782_v44  ;;  %v894_v41 = vld [vmem:[#allocation8 + $0xca8] sm:$0xff] }
 0x1bc   :  { %3844 = vmatprep.subr.bf16.mxu1 %v9078_v54  ;;  %v9286_v54 = vcombine.high %v906_v33, %v910_v35  ;;  %v754_v6 = vld [vmem:[#allocation8 + $0x848] sm:$0xff] }
 0x1bd   :  { %v758_v7 = vld [vmem:[#allocation8 + $0x868] sm:$0xff] }
 0x1be   :  { %3802 = vmatpush2.bf16.msra.mxu0 %v8949_v62  ;;  %v9157_v62 = vcombine.low %v778_v31, %v782_v44  ;;  %v882_v8 = vld [vmem:[#allocation8 + $0xc48] sm:$0xff]  ;;  %v9133_v19 = vcombine.low %v754_v6, %v758_v7 }
 0x1bf   :  { %3845 = vmatpush2.bf16.msra.mxu1 %v9077_v0  ;;  %3803 = vmatprep.subr.bf16.mxu0 %v8942_v1  ;;  %v9285_v0 = vcombine.low %v906_v33, %v910_v35  ;;  %v9150_v1 = vcombine.high %v770_v55, %v774_v56  ;;  %v886_v9 = vld [vmem:[#allocation8 + $0xc68] sm:$0xff] }
 0x1c0   :  { %3846 = vmatprep.subr.bf16.mxu1 %v9070_v2  ;;  %v9278_v2 = vcombine.high %v898_v57, %v902_v60  ;;  %v746_v15 = vld [vmem:[#allocation8 + $0x808] sm:$0xff] }
 0x1c1   :  { %v750_v16 = vld [vmem:[#allocation8 + $0x828] sm:$0xff] }
 0x1c2   :  { %3804 = vmatpush2.bf16.msra.mxu0 %v8941_v4  ;;  %v9149_v4 = vcombine.low %v770_v55, %v774_v56  ;;  %v878_v17 = vld [vmem:[#allocation8 + $0xc28] sm:$0xff] }
 0x1c3   :  { %3847 = vmatpush2.bf16.msra.mxu1 %v9069_v38  ;;  %3805 = vmatprep.subr.bf16.mxu0 %v8934_v40  ;;  %v9277_v38 = vcombine.low %v898_v57, %v902_v60  ;;  %v9142_v40 = vcombine.high %v762_v3, %v766_v36  ;;  %v866_v23 = vld [vmem:[#allocation8 + $0xbc8] sm:$0xff] }
 0x1c4   :  { %3848 = vmatprep.subr.bf16.mxu1 %v9062_v45  ;;  %v9270_v45 = vcombine.high %v890_v37, %v894_v41  ;;  %v994_v25 = vld [vmem:[#allocation8 + $0xfc8] sm:$0xff] }
 0x1c5   :  { %v998_v11 = vld [vmem:[#allocation8 + $0xfe8] sm:$0xff] }
 0x1c6   :  { %3806 = vmatpush2.bf16.msra.mxu0 %v8933_v10  ;;  %v9141_v10 = vcombine.low %v762_v3, %v766_v36  ;;  %v858_v31 = vld [vmem:[#allocation8 + $0xb88] sm:$0xff] }
 0x1c7   :  { %3849 = vmatpush2.bf16.msra.mxu1 %v9061_v12  ;;  %3861 = vmatprep.subr.bf16.mxu0 %v9182_v13  ;;  %v9269_v12 = vcombine.low %v890_v37, %v894_v41  ;;  %v9134_v13 = vcombine.high %v754_v6, %v758_v7  ;;  %v862_v44 = vld [vmem:[#allocation8 + $0xba8] sm:$0xff] }
 0x1c8   :  { %3904 = vmatprep.subr.bf16.mxu1 %v9310_v14  ;;  %v9262_v14 = vcombine.high %v882_v8, %v886_v9  ;;  %v986_v33 = vld [vmem:[#allocation8 + $0xf88] sm:$0xff] }
 0x1c9   :  { %3808 = vmatmul.mubr.bf16.vlgmr.msra.gmra.mxu0 %v10500_v29  ;;  %v990_v35 = vld [vmem:[#allocation8 + $0xfa8] sm:$0xff] }
 0x1ca   :  { %3851 = vmatmul.mubr.bf16.vlgmr.msra.gmra.mxu1 %v10506_v34  ;;  %3862 = vmatpush1.bf16.msra.mxu0 %v9181_v49  ;;  %v874_v49 = vld [vmem:[#allocation8 + $0xc08] sm:$0xff] }
 0x1cb   :  { %3893 = vmatprep.mubr.bf16.mxu0 %v10520_v5  ;;  %3905 = vmatpush1.bf16.msra.mxu1 %v9309_v20  ;;  %v9261_v20 = vcombine.low %v882_v8, %v886_v9  ;;  %v9254_v22 = vcombine.high %v874_v49, %v878_v17  ;;  %v850_v55 = vld [vmem:[#allocation8 + $0xb48] sm:$0xff] }
 0x1cc   :  { %3936 = vmatprep.mubr.bf16.mxu1 %v10522_v42  ;;  %3863 = vmatprep.subr.bf16.mxu0 %v9174_v21  ;;  %v9126_v21 = vcombine.high %v746_v15, %v750_v16  ;;  %v854_v56 = vld [vmem:[#allocation8 + $0xb68] sm:$0xff] }
 0x1cd   :  { %3906 = vmatprep.subr.bf16.mxu1 %v9302_v24  ;;  %v870_v24 = vld [vmem:[#allocation8 + $0xbe8] sm:$0xff] }
 0x1ce   :  { %3864 = vmatpush1.bf16.msra.mxu0 %v9173_v32  ;;  %v9125_v32 = vcombine.low %v746_v15, %v750_v16  ;;  %v978_v57 = vld [vmem:[#allocation8 + $0xf48] sm:$0xff] }
 0x1cf   :  { %3907 = vmatpush1.bf16.msra.mxu1 %v9301_v27  ;;  %3865 = vmatprep.subr.bf16.mxu0 %v9166_v28  ;;  %v9253_v27 = vcombine.low %v874_v49, %v878_v17  ;;  %v9246_v28 = vcombine.high %v866_v23, %v870_v24  ;;  %v982_v60 = vld [vmem:[#allocation8 + $0xf68] sm:$0xff] }
 0x1d0   :  { %3908 = vmatprep.subr.bf16.mxu1 %v9294_v18  ;;  %v9374_v18 = vcombine.high %v994_v25, %v998_v11  ;;  %v842_v3 = vld [vmem:[#allocation8 + $0xb08] sm:$0xff] }
 0x1d1   :  { %v846_v36 = vld [vmem:[#allocation8 + $0xb28] sm:$0xff] }
 0x1d2   :  { %3866 = vmatpush1.bf16.msra.mxu0 %v9165_v39  ;;  %v9245_v39 = vcombine.low %v866_v23, %v870_v24  ;;  %v970_v37 = vld [vmem:[#allocation8 + $0xf08] sm:$0xff] }
 0x1d3   :  { %3909 = vmatpush1.bf16.msra.mxu1 %v9293_v51  ;;  %3867 = vmatprep.subr.bf16.mxu0 %v9158_v53  ;;  %v9373_v51 = vcombine.low %v994_v25, %v998_v11  ;;  %v9238_v53 = vcombine.high %v858_v31, %v862_v44  ;;  %v974_v41 = vld [vmem:[#allocation8 + $0xf28] sm:$0xff] }
 0x1d4   :  { %3910 = vmatprep.subr.bf16.mxu1 %v9286_v54  ;;  %v9366_v54 = vcombine.high %v986_v33, %v990_v35  ;;  %v834_v6 = vld [vmem:[#allocation8 + $0xac8] sm:$0xff] }
 0x1d5   :  { %v838_v7 = vld [vmem:[#allocation8 + $0xae8] sm:$0xff] }
 0x1d6   :  { %3868 = vmatpush1.bf16.msra.mxu0 %v9157_v62  ;;  %v9237_v62 = vcombine.low %v858_v31, %v862_v44  ;;  %v962_v8 = vld [vmem:[#allocation8 + $0xec8] sm:$0xff] }
 0x1d7   :  { %3911 = vmatpush1.bf16.msra.mxu1 %v9285_v0  ;;  %3869 = vmatprep.subr.bf16.mxu0 %v9150_v1  ;;  %v9365_v0 = vcombine.low %v986_v33, %v990_v35  ;;  %v9230_v1 = vcombine.high %v850_v55, %v854_v56  ;;  %v966_v9 = vld [vmem:[#allocation8 + $0xee8] sm:$0xff] }
 0x1d8   :  { %3912 = vmatprep.subr.bf16.mxu1 %v9278_v2  ;;  %v9358_v2 = vcombine.high %v978_v57, %v982_v60  ;;  %v826_v15 = vld [vmem:[#allocation8 + $0xa88] sm:$0xff] }
 0x1d9   :  { %v830_v16 = vld [vmem:[#allocation8 + $0xaa8] sm:$0xff] }
 0x1da   :  { %3870 = vmatpush1.bf16.msra.mxu0 %v9149_v4  ;;  %v9229_v4 = vcombine.low %v850_v55, %v854_v56  ;;  %v954_v49 = vld [vmem:[#allocation8 + $0xe88] sm:$0xff]  ;;  %v547_v55 = vld [vmem:[#allocation8 + $0x1d0] sm:$0xff] }
 0x1db   :  { %3913 = vmatpush1.bf16.msra.mxu1 %v9277_v38  ;;  %3871 = vmatprep.subr.bf16.mxu0 %v9142_v40  ;;  %v9357_v38 = vcombine.low %v978_v57, %v982_v60  ;;  %v9222_v40 = vcombine.high %v842_v3, %v846_v36  ;;  %v958_v17 = vld [vmem:[#allocation8 + $0xea8] sm:$0xff]  ;;  %v551_v56 = vld [vmem:[#allocation8 + $0x1f0] sm:$0xff] }
 0x1dc   :  { %3914 = vmatprep.subr.bf16.mxu1 %v9270_v45  ;;  %v9350_v45 = vcombine.high %v970_v37, %v974_v41  ;;  %v818_v23 = vld [vmem:[#allocation8 + $0xa48] sm:$0xff]  ;;  %v675_v57 = vld [vmem:[#allocation8 + $0x5d0] sm:$0xff] }
 0x1dd   :  { %v822_v24 = vld [vmem:[#allocation8 + $0xa68] sm:$0xff]  ;;  %v679_v60 = vld [vmem:[#allocation8 + $0x5f0] sm:$0xff] }
 0x1de   :  { %3872 = vmatpush1.bf16.msra.mxu0 %v9141_v10  ;;  %v9221_v10 = vcombine.low %v842_v3, %v846_v36  ;;  %v946_v25 = vld [vmem:[#allocation8 + $0xe48] sm:$0xff]  ;;  %v9056_v3 = vcombine.high %v675_v57, %v679_v60  ;;  %v539_v36 = vld [vmem:[#allocation8 + $0x190] sm:$0xff] }
 0x1df   :  { %3915 = vmatpush1.bf16.msra.mxu1 %v9269_v12  ;;  %3873 = vmatprep.subr.bf16.mxu0 %v9134_v13  ;;  %v9349_v12 = vcombine.low %v970_v37, %v974_v41  ;;  %v9214_v13 = vcombine.high %v834_v6, %v838_v7  ;;  %v950_v11 = vld [vmem:[#allocation8 + $0xe68] sm:$0xff]  ;;  %v543_v37 = vld [vmem:[#allocation8 + $0x1b0] sm:$0xff]  ;;  %v8927_v41 = vcombine.low %v547_v55, %v551_v56 }
 0x1e0   :  { %3916 = vmatprep.subr.bf16.mxu1 %v9262_v14  ;;  %v9342_v14 = vcombine.high %v962_v8, %v966_v9  ;;  %v810_v31 = vld [vmem:[#allocation8 + $0xa08] sm:$0xff] }
 0x1e1   :  { %v814_v44 = vld [vmem:[#allocation8 + $0xa28] sm:$0xff] }
 0x1e2   :  { %3874 = vmatpush1.bf16.msra.mxu0 %v9133_v19  ;;  %v9213_v19 = vcombine.low %v834_v6, %v838_v7  ;;  %v938_v33 = vld [vmem:[#allocation8 + $0xe08] sm:$0xff]  ;;  %v8920_v6 = vcombine.high %v539_v36, %v543_v37  ;;  %v531_v7 = vld [vmem:[#allocation8 + $0x150] sm:$0xff] }
 0x1e3   :  { %3917 = vmatpush1.bf16.msra.mxu1 %v9261_v20  ;;  %3875 = vmatprep.subr.bf16.mxu0 %v9126_v21  ;;  %v9341_v20 = vcombine.low %v962_v8, %v966_v9  ;;  %v9206_v21 = vcombine.high %v826_v15, %v830_v16  ;;  %v942_v35 = vld [vmem:[#allocation8 + $0xe28] sm:$0xff]  ;;  %v535_v8 = vld [vmem:[#allocation8 + $0x170] sm:$0xff] }
 0x1e4   :  { %3918 = vmatprep.subr.bf16.mxu1 %v9254_v22  ;;  %v9334_v22 = vcombine.high %v954_v49, %v958_v17 }
 0x1e6   :  { %3876 = vmatpush1.bf16.msra.mxu0 %v9125_v32  ;;  %v9205_v32 = vcombine.low %v826_v15, %v830_v16  ;;  %v8919_v16 = vcombine.low %v539_v36, %v543_v37 }
 0x1e7   :  { %3919 = vmatpush1.bf16.msra.mxu1 %v9253_v27  ;;  %3877 = vmatprep.subr.bf16.mxu0 %v9246_v28  ;;  %v9333_v27 = vcombine.low %v954_v49, %v958_v17  ;;  %v9198_v28 = vcombine.high %v818_v23, %v822_v24 }
 0x1e8   :  { %3920 = vmatprep.subr.bf16.mxu1 %v9374_v18  ;;  %v9326_v18 = vcombine.high %v946_v25, %v950_v11 }
 0x1ea   :  { %3878 = vmatpush2.bf16.msra.mxu0 %v9245_v39  ;;  %v9197_v39 = vcombine.low %v818_v23, %v822_v24  ;;  %v523_v23 = vld [vmem:[#allocation8 + $0x110] sm:$0xff] }
 0x1eb   :  { %3921 = vmatpush2.bf16.msra.mxu1 %v9373_v51  ;;  %3879 = vmatprep.subr.bf16.mxu0 %v9238_v53  ;;  %v9325_v51 = vcombine.low %v946_v25, %v950_v11  ;;  %v9190_v53 = vcombine.high %v810_v31, %v814_v44  ;;  %v527_v24 = vld [vmem:[#allocation8 + $0x130] sm:$0xff] }
 0x1ec   :  { %3922 = vmatprep.subr.bf16.mxu1 %v9366_v54  ;;  %v9318_v54 = vcombine.high %v938_v33, %v942_v35  ;;  %v651_v11 = vld [vmem:[#allocation8 + $0x510] sm:$0xff] }
 0x1ee   :  { %3880 = vmatpush2.bf16.msra.mxu0 %v9237_v62  ;;  %v9189_v62 = vcombine.low %v810_v31, %v814_v44  ;;  %v8904_v44 = vcombine.high %v523_v23, %v527_v24 }
 0x1ef   :  { %3923 = vmatpush2.bf16.msra.mxu1 %v9365_v0  ;;  %3881 = vmatprep.subr.bf16.mxu0 %v9230_v1  ;;  %v9317_v0 = vcombine.low %v938_v33, %v942_v35  ;;  %v8928_v1 = vcombine.high %v547_v55, %v551_v56  ;;  %v8903_v55 = vcombine.low %v523_v23, %v527_v24  ;;  %v611_v23 = vld [vmem:[#allocation8 + $0x3d0] sm:$0xff] }
 0x1f0   :  { %3924 = vmatprep.subr.bf16.mxu1 %v9358_v2  ;;  %v10552_v2 = vld [vmem:[#allocation10] sm:$0xff]  ;;  %v615_v24 = vld [vmem:[#allocation8 + $0x3f0] sm:$0xff] }
 0x1f2   :  { %3882 = vmatpush2.bf16.msra.mxu0 %v9229_v4  ;;  %v1006_v4 = vrot.slane %v10552_v2, %v10466_v47 }
 0x1f3   :  { %3925 = vmatpush2.bf16.msra.mxu1 %v9357_v38  ;;  %3883 = vmatprep.subr.bf16.mxu0 %v9222_v40  ;;  %v667_v38 = vld [vmem:[#allocation8 + $0x590] sm:$0xff] }
 0x1f4   :  { %3926 = vmatprep.subr.bf16.mxu1 %v9350_v45  ;;  %v671_v40 = vld [vmem:[#allocation8 + $0x5b0] sm:$0xff]  ;;  %v9055_v45 = vcombine.low %v675_v57, %v679_v60 }
 0x1f5   :  { %v9047_v17 = vcombine.low %v667_v38, %v671_v40 }
 0x1f6   :  { %3884 = vmatpush2.bf16.msra.mxu0 %v9221_v10  ;;  %v9048_v10 = vcombine.high %v667_v38, %v671_v40  ;;  %v499_v38 = vld [vmem:[#allocation8 + $0x50] sm:$0xff] }
 0x1f7   :  { %3927 = vmatpush2.bf16.msra.mxu1 %v9349_v12  ;;  %3885 = vmatprep.subr.bf16.mxu0 %v9214_v13  ;;  %v659_v12 = vld [vmem:[#allocation8 + $0x550] sm:$0xff] }
 0x1f8   :  { %3928 = vmatprep.subr.bf16.mxu1 %v9342_v14  ;;  %v663_v13 = vld [vmem:[#allocation8 + $0x570] sm:$0xff] }
 0x1f9   :  { %v9039_v31 = vcombine.low %v659_v12, %v663_v13  ;;  %v503_v40 = vld [vmem:[#allocation8 + $0x70] sm:$0xff] }
 0x1fa   :  { %3886 = vmatpush2.bf16.msra.mxu0 %v9213_v19  ;;  %v8912_v19 = vcombine.high %v531_v7, %v535_v8 }
 0x1fb   :  { %3929 = vmatpush2.bf16.msra.mxu1 %v9341_v20  ;;  %3887 = vmatprep.subr.bf16.mxu0 %v9206_v21 }
 0x1fc   :  { %3930 = vmatprep.subr.bf16.mxu1 %v9334_v22  ;;  %v9040_v22 = vcombine.high %v659_v12, %v663_v13  ;;  %v491_v12 = vld [vmem:[#allocation8 + $0x10] sm:$0xff] }
 0x1fd   :  { %v495_v13 = vld [vmem:[#allocation8 + $0x30] sm:$0xff] }
 0x1fe   :  { %3888 = vmatpush2.bf16.msra.mxu0 %v9205_v32  ;;  %v655_v32 = vld [vmem:[#allocation8 + $0x530] sm:$0xff] }
 0x1ff   :  { %3931 = vmatpush2.bf16.msra.mxu1 %v9333_v27  ;;  %3889 = vmatprep.subr.bf16.mxu0 %v9198_v28  ;;  %v8911_v28 = vcombine.low %v531_v7, %v535_v8  ;;  %v9032_v35 = vcombine.high %v651_v11, %v655_v32  ;;  %v9031_v56 = vcombine.low %v651_v11, %v655_v32  ;;  %v743_v11 = vld [vmem:[#allocation8 + $0x7f0] sm:$0xff] }
 0x200   :  { %3932 = vmatprep.subr.bf16.mxu1 %v9326_v18  ;;  %v8871_v32 = vcombine.low %v491_v12, %v495_v13 }
 0x202   :  { %3890 = vmatpush2.bf16.msra.mxu0 %v9197_v39  ;;  %v515_v39 = vld [vmem:[#allocation8 + $0xd0] sm:$0xff] }
 0x203   :  { %3933 = vmatpush2.bf16.msra.mxu1 %v9325_v51  ;;  %3891 = vmatprep.subr.bf16.mxu0 %v9190_v53  ;;  %v519_v51 = vld [vmem:[#allocation8 + $0xf0] sm:$0xff] }
 0x204   :  { %3934 = vmatprep.subr.bf16.mxu1 %v9318_v54  ;;  %v643_v53 = vld [vmem:[#allocation8 + $0x4d0] sm:$0xff]  ;;  %v8896_v57 = vcombine.high %v515_v39, %v519_v51  ;;  %v8895_v36 = vcombine.low %v515_v39, %v519_v51  ;;  %v8991_v51 = vcombine.low %v611_v23, %v615_v24 }
 0x205   :  { %v647_v54 = vld [vmem:[#allocation8 + $0x4f0] sm:$0xff] }
 0x206   :  { %3892 = vmatpush2.bf16.msra.mxu0 %v9189_v62  ;;  %v9024_v60 = vcombine.high %v643_v53, %v647_v54  ;;  %v507_v62 = vld [vmem:[#allocation8 + $0x90] sm:$0xff]  ;;  %v9023_v37 = vcombine.low %v643_v53, %v647_v54 }
 0x207   :  { %3935 = vmatpush2.bf16.msra.mxu1 %v9317_v0  ;;  %3947 = vmatprep.subr.bf16.mxu0 %v8928_v1  ;;  %v511_v0 = vld [vmem:[#allocation8 + $0xb0] sm:$0xff] }
 0x208   :  { %3990 = vmatprep.subr.bf16.mxu1 %v9056_v3  ;;  %v635_v1 = vld [vmem:[#allocation8 + $0x490] sm:$0xff]  ;;  %v8887_v7 = vcombine.low %v507_v62, %v511_v0 }
 0x209   :  { %3894 = vmatmul.mubr.bf16.vlgmr.msra.gmra.mxu0 %v10540_v43  ;;  %v3637_v9 = vpop.f32.mrf.mxu0  ;;  %v3680_v15 = vpop.f32.mrf.mxu1  ;;  %v639_v3 = vld [vmem:[#allocation8 + $0x4b0] sm:$0xff] }
 0x20a   :  { %3937 = vmatmul.mubr.bf16.vlgmr.msra.gmra.mxu1 %v10542_v52  ;;  %v3638_v14 = vadd.f32 %v3637_v9, %v1006_v4  ;;  %3948 = vmatpush1.bf16.msra.mxu0 %v8927_v41  ;;  %v8888_v41 = vcombine.high %v507_v62, %v511_v0  ;;  %v9015_v8 = vcombine.low %v635_v1, %v639_v3  ;;  %v735_v39 = vld [vmem:[#allocation8 + $0x7b0] sm:$0xff] }
 0x20b   :  { %3979 = vmatprep.mubr.bf16.mxu0 %v10498_v26  ;;  %3991 = vmatpush1.bf16.msra.mxu1 %v9055_v45  ;;  %v10559_v49 = vpop.f32.mrf.mxu0  ;;  %v10564_v21 = vpop.f32.mrf.mxu1  ;;  %v627_v45 = vld [vmem:[#allocation8 + $0x450] sm:$0xff]  ;;  %v8880_v9 = vcombine.high %v499_v38, %v503_v40 }
 0x20c   :  { %v10561_v20 = vadd.f32 %v3680_v15, %v3638_v14  ;;  %4022 = vmatprep.mubr.bf16.mxu1 %v10502_v30  ;;  %3949 = vmatprep.subr.bf16.mxu0 %v8920_v6  ;;  %v631_v6 = vld [vmem:[#allocation8 + $0x470] sm:$0xff] }
 0x20d   :  { %3992 = vmatprep.subr.bf16.mxu1 %v9048_v10  ;;  %v3641_v25 = vpop.f32.mrf.mxu0  ;;  %v3684_v18 = vpop.f32.mrf.mxu1  ;;  %v9008_v10 = vcombine.high %v627_v45, %v631_v6  ;;  %v619_v14 = vld [vmem:[#allocation8 + $0x410] sm:$0xff] }
 0x20e   :  { %v3642_v27 = vadd.f32 %v3641_v25, %v1006_v4  ;;  %3950 = vmatpush1.bf16.msra.mxu0 %v8919_v16  ;;  %v9016_v4 = vcombine.high %v635_v1, %v639_v3  ;;  %v623_v15 = vld [vmem:[#allocation8 + $0x430] sm:$0xff]  ;;  %v8879_v16 = vcombine.low %v499_v38, %v503_v40 }
 0x20f   :  { %3993 = vmatpush1.bf16.msra.mxu1 %v9047_v17  ;;  %3951 = vmatprep.subr.bf16.mxu0 %v8912_v19  ;;  %v9007_v17 = vcombine.low %v627_v45, %v631_v6  ;;  %v8872_v19 = vcombine.high %v491_v12, %v495_v13  ;;  %v739_v25 = vld [vmem:[#allocation8 + $0x7d0] sm:$0xff] }
 0x210   :  { %v10566_v33 = vadd.f32 %v3684_v18, %v3642_v27  ;;  %3994 = vmatprep.subr.bf16.mxu1 %v9040_v22  ;;  %v9000_v22 = vcombine.high %v619_v14, %v623_v15  ;;  %v8999_v27 = vcombine.low %v619_v14, %v623_v15  ;;  %v9120_v18 = vcombine.high %v739_v25, %v743_v11  ;;  %v727_v62 = vld [vmem:[#allocation8 + $0x770] sm:$0xff] }
 0x211   :  { %v9119_v53 = vcombine.low %v739_v25, %v743_v11  ;;  %v719_v38 = vld [vmem:[#allocation8 + $0x730] sm:$0xff] }
 0x212   :  { %3952 = vmatpush1.bf16.msra.mxu0 %v8911_v28  ;;  %v8992_v28 = vcombine.high %v611_v23, %v615_v24  ;;  %v711_v12 = vld [vmem:[#allocation8 + $0x6f0] sm:$0xff] }
 0x213   :  { %3995 = vmatpush1.bf16.msra.mxu1 %v9039_v31  ;;  %3953 = vmatprep.subr.bf16.mxu0 %v8904_v44  ;;  %v603_v31 = vld [vmem:[#allocation8 + $0x390] sm:$0xff] }
 0x214   :  { %3996 = vmatprep.subr.bf16.mxu1 %v9032_v35  ;;  %v607_v44 = vld [vmem:[#allocation8 + $0x3b0] sm:$0xff] }
 0x215   :  { %v731_v35 = vld [vmem:[#allocation8 + $0x790] sm:$0xff]  ;;  %v8984_v54 = vcombine.high %v603_v31, %v607_v44  ;;  %v8983_v0 = vcombine.low %v603_v31, %v607_v44 }
 0x216   :  { %3954 = vmatpush1.bf16.msra.mxu0 %v8903_v55  ;;  %v9112_v55 = vcombine.high %v731_v35, %v735_v39  ;;  %v9111_v1 = vcombine.low %v731_v35, %v735_v39  ;;  %v703_v23 = vld [vmem:[#allocation8 + $0x6b0] sm:$0xff] }
 0x217   :  { %3997 = vmatpush1.bf16.msra.mxu1 %v9031_v56  ;;  %3955 = vmatprep.subr.bf16.mxu0 %v8896_v57  ;;  %v595_v56 = vld [vmem:[#allocation8 + $0x350] sm:$0xff] }
 0x218   :  { %3998 = vmatprep.subr.bf16.mxu1 %v9024_v60  ;;  %v599_v57 = vld [vmem:[#allocation8 + $0x370] sm:$0xff] }
 0x219   :  { %v723_v60 = vld [vmem:[#allocation8 + $0x750] sm:$0xff]  ;;  %v8976_v3 = vcombine.high %v595_v56, %v599_v57  ;;  %v8975_v40 = vcombine.low %v595_v56, %v599_v57 }
 0x21a   :  { %3956 = vmatpush1.bf16.msra.mxu0 %v8895_v36  ;;  %v9104_v36 = vcombine.high %v723_v60, %v727_v62  ;;  %v9103_v45 = vcombine.low %v723_v60, %v727_v62  ;;  %v695_v31 = vld [vmem:[#allocation8 + $0x670] sm:$0xff] }
 0x21b   :  { %3999 = vmatpush1.bf16.msra.mxu1 %v9023_v37  ;;  %3957 = vmatprep.subr.bf16.mxu0 %v8888_v41  ;;  %v587_v37 = vld [vmem:[#allocation8 + $0x310] sm:$0xff] }
 0x21c   :  { %4000 = vmatprep.subr.bf16.mxu1 %v9016_v4  ;;  %v591_v41 = vld [vmem:[#allocation8 + $0x330] sm:$0xff] }
 0x21d   :  { %v715_v4 = vld [vmem:[#allocation8 + $0x710] sm:$0xff]  ;;  %v8968_v6 = vcombine.high %v587_v37, %v591_v41  ;;  %v8967_v13 = vcombine.low %v587_v37, %v591_v41 }
 0x21e   :  { %3958 = vmatpush1.bf16.msra.mxu0 %v8887_v7  ;;  %v9096_v7 = vcombine.high %v715_v4, %v719_v38  ;;  %v9095_v14 = vcombine.low %v715_v4, %v719_v38  ;;  %v687_v56 = vld [vmem:[#allocation8 + $0x630] sm:$0xff] }
 0x21f   :  { %4001 = vmatpush1.bf16.msra.mxu1 %v9015_v8  ;;  %3959 = vmatprep.subr.bf16.mxu0 %v8880_v9  ;;  %v579_v8 = vld [vmem:[#allocation8 + $0x2d0] sm:$0xff] }
 0x220   :  { %4002 = vmatprep.subr.bf16.mxu1 %v9008_v10  ;;  %v583_v9 = vld [vmem:[#allocation8 + $0x2f0] sm:$0xff] }
 0x221   :  { %v707_v10 = vld [vmem:[#allocation8 + $0x6d0] sm:$0xff]  ;;  %v8960_v15 = vcombine.high %v579_v8, %v583_v9  ;;  %v8959_v24 = vcombine.low %v579_v8, %v583_v9 }
 0x222   :  { %3960 = vmatpush1.bf16.msra.mxu0 %v8879_v16  ;;  %v9088_v16 = vcombine.high %v707_v10, %v711_v12  ;;  %v9087_v25 = vcombine.low %v707_v10, %v711_v12  ;;  %v935_v37 = vld [vmem:[#allocation8 + $0xdf0] sm:$0xff]  ;;  %v10568_v10 = vpop.f32.mrf.mxu0 }
 0x223   :  { %4003 = vmatpush1.bf16.msra.mxu1 %v9007_v17  ;;  %3961 = vmatprep.subr.bf16.mxu0 %v8872_v19  ;;  %v571_v17 = vld [vmem:[#allocation8 + $0x290] sm:$0xff] }
 0x224   :  { %4004 = vmatprep.subr.bf16.mxu1 %v9000_v22  ;;  %v575_v19 = vld [vmem:[#allocation8 + $0x2b0] sm:$0xff] }
 0x225   :  { %v699_v22 = vld [vmem:[#allocation8 + $0x690] sm:$0xff]  ;;  %v8952_v11 = vcombine.high %v571_v17, %v575_v19  ;;  %v8951_v44 = vcombine.low %v571_v17, %v575_v19 }
 0x226   :  { %3962 = vmatpush1.bf16.msra.mxu0 %v8871_v32  ;;  %v9080_v32 = vcombine.high %v699_v22, %v703_v23  ;;  %v9079_v35 = vcombine.low %v699_v22, %v703_v23  ;;  %v923_v8 = vld [vmem:[#allocation8 + $0xd90] sm:$0xff] }
 0x227   :  { %4005 = vmatpush1.bf16.msra.mxu1 %v8999_v27  ;;  %3963 = vmatprep.subr.bf16.mxu0 %v8992_v28  ;;  %v563_v27 = vld [vmem:[#allocation8 + $0x250] sm:$0xff] }
 0x228   :  { %4006 = vmatprep.subr.bf16.mxu1 %v9120_v18  ;;  %v567_v28 = vld [vmem:[#allocation8 + $0x270] sm:$0xff] }
 0x229   :  { %v691_v18 = vld [vmem:[#allocation8 + $0x650] sm:$0xff]  ;;  %v8944_v39 = vcombine.high %v563_v27, %v567_v28  ;;  %v8943_v57 = vcombine.low %v563_v27, %v567_v28 }
 0x22a   :  { %3964 = vmatpush2.bf16.msra.mxu0 %v8991_v51  ;;  %v9072_v51 = vcombine.high %v691_v18, %v695_v31  ;;  %v9071_v60 = vcombine.low %v691_v18, %v695_v31  ;;  %v927_v9 = vld [vmem:[#allocation8 + $0xdb0] sm:$0xff] }
 0x22b   :  { %4007 = vmatpush2.bf16.msra.mxu1 %v9119_v53  ;;  %3965 = vmatprep.subr.bf16.mxu0 %v8984_v54  ;;  %v555_v53 = vld [vmem:[#allocation8 + $0x210] sm:$0xff]  ;;  %v9304_v19 = vcombine.high %v923_v8, %v927_v9  ;;  %v9303_v27 = vcombine.low %v923_v8, %v927_v9 }
 0x22c   :  { %4008 = vmatprep.subr.bf16.mxu1 %v9112_v55  ;;  %v559_v54 = vld [vmem:[#allocation8 + $0x230] sm:$0xff] }
 0x22d   :  { %v683_v55 = vld [vmem:[#allocation8 + $0x610] sm:$0xff]  ;;  %v8936_v62 = vcombine.high %v555_v53, %v559_v54  ;;  %v8935_v41 = vcombine.low %v555_v53, %v559_v54 }
 0x22e   :  { %3966 = vmatpush2.bf16.msra.mxu0 %v8983_v0  ;;  %v9064_v0 = vcombine.high %v683_v55, %v687_v56  ;;  %v9063_v4 = vcombine.low %v683_v55, %v687_v56  ;;  %v915_v22 = vld [vmem:[#allocation8 + $0xd50] sm:$0xff] }
 0x22f   :  { %4009 = vmatpush2.bf16.msra.mxu1 %v9111_v1  ;;  %3967 = vmatprep.subr.bf16.mxu0 %v8976_v3  ;;  %v803_v1 = vld [vmem:[#allocation8 + $0x9d0] sm:$0xff] }
 0x230   :  { %4010 = vmatprep.subr.bf16.mxu1 %v9104_v36  ;;  %v807_v3 = vld [vmem:[#allocation8 + $0x9f0] sm:$0xff] }
 0x231   :  { %v931_v36 = vld [vmem:[#allocation8 + $0xdd0] sm:$0xff]  ;;  %v9184_v38 = vcombine.high %v803_v1, %v807_v3 }
 0x232   :  { %3968 = vmatpush2.bf16.msra.mxu0 %v8975_v40  ;;  %v9312_v40 = vcombine.high %v931_v36, %v935_v37  ;;  %v9311_v12 = vcombine.low %v931_v36, %v935_v37  ;;  %v919_v23 = vld [vmem:[#allocation8 + $0xd70] sm:$0xff] }
 0x233   :  { %4011 = vmatpush2.bf16.msra.mxu1 %v9103_v45  ;;  %3969 = vmatprep.subr.bf16.mxu0 %v8968_v6  ;;  %v795_v45 = vld [vmem:[#allocation8 + $0x990] sm:$0xff] }
 0x234   :  { %4012 = vmatprep.subr.bf16.mxu1 %v9096_v7  ;;  %v799_v6 = vld [vmem:[#allocation8 + $0x9b0] sm:$0xff]  ;;  %v9183_v7 = vcombine.low %v803_v1, %v807_v3 }
 0x235   :  { %v911_v53 = vld [vmem:[#allocation8 + $0xd30] sm:$0xff] }
 0x236   :  { %3970 = vmatpush2.bf16.msra.mxu0 %v8967_v13  ;;  %v10570_v13 = vpop.f32.mrf.mxu1  ;;  %v771_v1 = vld [vmem:[#allocation8 + $0x8d0] sm:$0xff] }
 0x237   :  { %4013 = vmatpush2.bf16.msra.mxu1 %v9095_v14  ;;  %3971 = vmatprep.subr.bf16.mxu0 %v8960_v15  ;;  %v9176_v14 = vcombine.high %v795_v45, %v799_v6  ;;  %v787_v15 = vld [vmem:[#allocation8 + $0x950] sm:$0xff] }
 0x238   :  { %4014 = vmatprep.subr.bf16.mxu1 %v9088_v16  ;;  %v791_v16 = vld [vmem:[#allocation8 + $0x970] sm:$0xff] }
 0x239   :  { %v9168_v28 = vcombine.high %v787_v15, %v791_v16  ;;  %v9167_v55 = vcombine.low %v787_v15, %v791_v16  ;;  %v775_v3 = vld [vmem:[#allocation8 + $0x8f0] sm:$0xff] }
 0x23a   :  { %3972 = vmatpush2.bf16.msra.mxu0 %v8959_v24  ;;  %v899_v36 = vld [vmem:[#allocation8 + $0xcd0] sm:$0xff] }
 0x23b   :  { %4015 = vmatpush2.bf16.msra.mxu1 %v9087_v25  ;;  %3973 = vmatprep.subr.bf16.mxu0 %v8952_v11  ;;  %v9175_v11 = vcombine.low %v795_v45, %v799_v6  ;;  %v903_v37 = vld [vmem:[#allocation8 + $0xcf0] sm:$0xff] }
 0x23c   :  { %4016 = vmatprep.subr.bf16.mxu1 %v9080_v32  ;;  %v9280_v6 = vcombine.high %v899_v36, %v903_v37  ;;  %v767_v8 = vld [vmem:[#allocation8 + $0x8b0] sm:$0xff]  ;;  %v9279_v15 = vcombine.low %v899_v36, %v903_v37 }
 0x23d   :  { %v891_v9 = vld [vmem:[#allocation8 + $0xc90] sm:$0xff] }
 0x23e   :  { %3974 = vmatpush2.bf16.msra.mxu0 %v8951_v44  ;;  %v9296_v44 = vcombine.high %v915_v22, %v919_v23  ;;  %v859_v36 = vld [vmem:[#allocation8 + $0xb90] sm:$0xff] }
 0x23f   :  { %4017 = vmatpush2.bf16.msra.mxu1 %v9079_v35  ;;  %3975 = vmatprep.subr.bf16.mxu0 %v8944_v39  ;;  %v783_v35 = vld [vmem:[#allocation8 + $0x930] sm:$0xff] }
 0x240   :  { %4018 = vmatprep.subr.bf16.mxu1 %v9072_v51  ;;  %v907_v51 = vld [vmem:[#allocation8 + $0xd10] sm:$0xff] }
 0x241   :  { %v863_v37 = vld [vmem:[#allocation8 + $0xbb0] sm:$0xff] }
 0x242   :  { %3976 = vmatpush2.bf16.msra.mxu0 %v8943_v57  ;;  %v9295_v57 = vcombine.low %v915_v22, %v919_v23  ;;  %v759_v22 = vld [vmem:[#allocation8 + $0x870] sm:$0xff] }
 0x243   :  { %4019 = vmatpush2.bf16.msra.mxu1 %v9071_v60  ;;  %3977 = vmatprep.subr.bf16.mxu0 %v8936_v62  ;;  %v883_v23 = vld [vmem:[#allocation8 + $0xc50] sm:$0xff] }
 0x244   :  { %4020 = vmatprep.subr.bf16.mxu1 %v9064_v0  ;;  %v9288_v0 = vcombine.high %v907_v51, %v911_v53 }
 0x246   :  { %3978 = vmatpush2.bf16.msra.mxu0 %v8935_v41 }
 0x247   :  { %4021 = vmatpush2.bf16.msra.mxu1 %v9063_v4  ;;  %4033 = vmatprep.subr.bf16.mxu0 %v9184_v38 }
 0x248   :  { %4076 = vmatprep.subr.bf16.mxu1 %v9312_v40  ;;  %v9152_v40 = vcombine.high %v771_v1, %v775_v3 }
 0x249   :  { %v3723_v17 = vpop.f32.mrf.mxu0  ;;  %3980 = vmatmul.mubr.bf16.vlgmr.msra.gmra.mxu0 %v10500_v29  ;;  %v3766_v25 = vpop.f32.mrf.mxu1 }
 0x24a   :  { %v3724_v24 = vadd.f32 %v3723_v17, %v10561_v20  ;;  %4023 = vmatmul.mubr.bf16.vlgmr.msra.gmra.mxu1 %v10506_v34  ;;  %4034 = vmatpush1.bf16.msra.mxu0 %v9183_v7  ;;  %v779_v20 = vld [vmem:[#allocation8 + $0x910] sm:$0xff] }
 0x24b   :  { %4065 = vmatprep.mubr.bf16.mxu0 %v10520_v5  ;;  %4077 = vmatpush1.bf16.msra.mxu1 %v9311_v12  ;;  %v10576_v32 = vpop.f32.mrf.mxu0  ;;  %v10579_v31 = vpop.f32.mrf.mxu1  ;;  %v9160_v60 = vcombine.high %v779_v20, %v783_v35  ;;  %v9159_v38 = vcombine.low %v779_v20, %v783_v35  ;;  %v763_v7 = vld [vmem:[#allocation8 + $0x890] sm:$0xff] }
 0x24c   :  { %v3767_v18 = vadd.f32 %v3766_v25, %v3724_v24  ;;  %4108 = vmatprep.mubr.bf16.mxu1 %v10522_v42  ;;  %4035 = vmatprep.subr.bf16.mxu0 %v9176_v14  ;;  %v895_v12 = vld [vmem:[#allocation8 + $0xcb0] sm:$0xff]  ;;  %v9151_v14 = vcombine.low %v771_v1, %v775_v3  ;;  %v9144_v16 = vcombine.high %v763_v7, %v767_v8 }
 0x24d   :  { %v3727_v39 = vpop.f32.mrf.mxu0  ;;  %4078 = vmatprep.subr.bf16.mxu1 %v9304_v19  ;;  %v3770_v56 = vpop.f32.mrf.mxu1  ;;  %v9272_v17 = vcombine.high %v891_v9, %v895_v12  ;;  %v755_v19 = vld [vmem:[#allocation8 + $0x850] sm:$0xff]  ;;  %v9143_v25 = vcombine.low %v763_v7, %v767_v8 }
 0x24e   :  { %v3728_v54 = vadd.f32 %v3727_v39, %v10566_v33  ;;  %4036 = vmatpush1.bf16.msra.mxu0 %v9175_v11  ;;  %v4291_v41 = vmax.f32 %v3767_v18, 0.0  ;;  %v9287_v33 = vcombine.low %v907_v51, %v911_v53  ;;  %v887_v24 = vld [vmem:[#allocation8 + $0xc70] sm:$0xff]  ;;  %v9271_v11 = vcombine.low %v891_v9, %v895_v12 }
 0x24f   :  { %4079 = vmatpush1.bf16.msra.mxu1 %v9303_v27  ;;  %4037 = vmatprep.subr.bf16.mxu0 %v9168_v28  ;;  %v9136_v27 = vcombine.high %v755_v19, %v759_v22  ;;  %v9264_v28 = vcombine.high %v883_v23, %v887_v24  ;;  %v747_v18 = vld [vmem:[#allocation8 + $0x810] sm:$0xff]  ;;  %v9135_v39 = vcombine.low %v755_v19, %v759_v22 }
 0x250   :  { %v3771_v62 = vadd.f32 %v3770_v56, %v3728_v54  ;;  %4080 = vmatprep.subr.bf16.mxu1 %v9296_v44  ;;  %v751_v44 = vld [vmem:[#allocation8 + $0x830] sm:$0xff]  ;;  %v9263_v51 = vcombine.low %v883_v23, %v887_v24 }
 0x251   :  { %v875_v20 = vld [vmem:[#allocation8 + $0xc10] sm:$0xff]  ;;  %v9128_v53 = vcombine.high %v747_v18, %v751_v44 }
 0x252   :  { %v4299_v4 = vmax.f32 %v3771_v62, 0.0  ;;  %4038 = vmatpush1.bf16.msra.mxu0 %v9167_v55  ;;  %v879_v35 = vld [vmem:[#allocation8 + $0xc30] sm:$0xff]  ;;  %v9127_v62 = vcombine.low %v747_v18, %v751_v44 }
 0x253   :  { %4081 = vmatpush1.bf16.msra.mxu1 %v9295_v57  ;;  %4039 = vmatprep.subr.bf16.mxu0 %v9160_v60  ;;  %v9256_v54 = vcombine.high %v875_v20, %v879_v35  ;;  %v867_v55 = vld [vmem:[#allocation8 + $0xbd0] sm:$0xff] }
 0x254   :  { %v10582_v45 = vpack.c.bf16 %v4299_v4, %v4291_v41  ;;  %4082 = vmatprep.subr.bf16.mxu1 %v9288_v0  ;;  %v871_v56 = vld [vmem:[#allocation8 + $0xbf0] sm:$0xff]  ;;  %v9255_v0 = vcombine.low %v875_v20, %v879_v35 }
 0x255   :  { %v995_v57 = vld [vmem:[#allocation8 + $0xfd0] sm:$0xff]  ;;  %v9248_v1 = vcombine.high %v867_v55, %v871_v56 }
 0x256   :  { %4040 = vmatpush1.bf16.msra.mxu0 %v9159_v38  ;;  %v999_v60 = vld [vmem:[#allocation8 + $0xff0] sm:$0xff]  ;;  %v9247_v38 = vcombine.low %v867_v55, %v871_v56 }
 0x257   :  { %4083 = vmatpush1.bf16.msra.mxu1 %v9287_v33  ;;  %4041 = vmatprep.subr.bf16.mxu0 %v9152_v40  ;;  %v9376_v3 = vcombine.high %v995_v57, %v999_v60  ;;  %v987_v41 = vld [vmem:[#allocation8 + $0xf90] sm:$0xff]  ;;  %v9375_v33 = vcombine.low %v995_v57, %v999_v60  ;;  %v9240_v40 = vcombine.high %v859_v36, %v863_v37 }
 0x258   :  { %4084 = vmatprep.subr.bf16.mxu1 %v9280_v6  ;;  %v991_v4 = vld [vmem:[#allocation8 + $0xfb0] sm:$0xff] }
 0x259   :  { %v9368_v6 = vcombine.high %v987_v41, %v991_v4  ;;  %v851_v7 = vld [vmem:[#allocation8 + $0xb50] sm:$0xff] }
 0x25a   :  { %4042 = vmatpush1.bf16.msra.mxu0 %v9151_v14  ;;  %v855_v8 = vld [vmem:[#allocation8 + $0xb70] sm:$0xff]  ;;  %v9239_v14 = vcombine.low %v859_v36, %v863_v37 }
 0x25b   :  { %4085 = vmatpush1.bf16.msra.mxu1 %v9279_v15  ;;  %4043 = vmatprep.subr.bf16.mxu0 %v9144_v16  ;;  %v979_v9 = vld [vmem:[#allocation8 + $0xf50] sm:$0xff]  ;;  %v9367_v15 = vcombine.low %v987_v41, %v991_v4  ;;  %v9232_v16 = vcombine.high %v851_v7, %v855_v8 }
 0x25c   :  { %4086 = vmatprep.subr.bf16.mxu1 %v9272_v17  ;;  %v983_v12 = vld [vmem:[#allocation8 + $0xf70] sm:$0xff] }
 0x25d   :  { %v9360_v17 = vcombine.high %v979_v9, %v983_v12  ;;  %v843_v19 = vld [vmem:[#allocation8 + $0xb10] sm:$0xff] }
 0x25e   :  { %4044 = vmatpush1.bf16.msra.mxu0 %v9143_v25  ;;  %v847_v22 = vld [vmem:[#allocation8 + $0xb30] sm:$0xff]  ;;  %v9231_v25 = vcombine.low %v851_v7, %v855_v8 }
 0x25f   :  { %4087 = vmatpush1.bf16.msra.mxu1 %v9271_v11  ;;  %4045 = vmatprep.subr.bf16.mxu0 %v9136_v27  ;;  %v971_v23 = vld [vmem:[#allocation8 + $0xf10] sm:$0xff]  ;;  %v9359_v11 = vcombine.low %v979_v9, %v983_v12  ;;  %v9224_v27 = vcombine.high %v843_v19, %v847_v22 }
 0x260   :  { %4088 = vmatprep.subr.bf16.mxu1 %v9264_v28  ;;  %v975_v24 = vld [vmem:[#allocation8 + $0xf30] sm:$0xff] }
 0x261   :  { %v9352_v28 = vcombine.high %v971_v23, %v975_v24  ;;  %v835_v18 = vld [vmem:[#allocation8 + $0xad0] sm:$0xff] }
 0x262   :  { %4046 = vmatpush1.bf16.msra.mxu0 %v9135_v39  ;;  %v839_v44 = vld [vmem:[#allocation8 + $0xaf0] sm:$0xff]  ;;  %v9223_v39 = vcombine.low %v843_v19, %v847_v22  ;;  %v548_v19 = vld [vmem:[#allocation8 + $0x1d8] sm:$0xff] }
 0x263   :  { %4089 = vmatpush1.bf16.msra.mxu1 %v9263_v51  ;;  %4047 = vmatprep.subr.bf16.mxu0 %v9128_v53  ;;  %v963_v20 = vld [vmem:[#allocation8 + $0xed0] sm:$0xff]  ;;  %v9351_v51 = vcombine.low %v971_v23, %v975_v24  ;;  %v9216_v53 = vcombine.high %v835_v18, %v839_v44  ;;  %v552_v22 = vld [vmem:[#allocation8 + $0x1f8] sm:$0xff] }
 0x264   :  { %4090 = vmatprep.subr.bf16.mxu1 %v9256_v54  ;;  %v967_v35 = vld [vmem:[#allocation8 + $0xef0] sm:$0xff]  ;;  %v676_v23 = vld [vmem:[#allocation8 + $0x5d8] sm:$0xff] }
 0x265   :  { %v9344_v54 = vcombine.high %v963_v20, %v967_v35  ;;  %v827_v55 = vld [vmem:[#allocation8 + $0xa90] sm:$0xff]  ;;  %v680_v24 = vld [vmem:[#allocation8 + $0x5f8] sm:$0xff] }
 0x266   :  { %4048 = vmatpush1.bf16.msra.mxu0 %v9127_v62  ;;  %v831_v56 = vld [vmem:[#allocation8 + $0xab0] sm:$0xff]  ;;  %v9215_v62 = vcombine.low %v835_v18, %v839_v44  ;;  %v540_v18 = vld [vmem:[#allocation8 + $0x198] sm:$0xff] }
 0x267   :  { %4091 = vmatpush1.bf16.msra.mxu1 %v9255_v0  ;;  %4049 = vmatprep.subr.bf16.mxu0 %v9248_v1  ;;  %v955_v57 = vld [vmem:[#allocation8 + $0xe90] sm:$0xff]  ;;  %v9343_v0 = vcombine.low %v963_v20, %v967_v35  ;;  %v9208_v1 = vcombine.high %v827_v55, %v831_v56  ;;  %v544_v44 = vld [vmem:[#allocation8 + $0x1b8] sm:$0xff]  ;;  %v1014_v20 = vrot.slane %v10552_v2, %v10474_v50 }
 0x268   :  { %4092 = vmatprep.subr.bf16.mxu1 %v9376_v3  ;;  %v959_v60 = vld [vmem:[#allocation8 + $0xeb0] sm:$0xff]  ;;  %v8929_v35 = vcombine.low %v548_v19, %v552_v22  ;;  %v664_v2 = vld [vmem:[#allocation8 + $0x578] sm:$0xff] }
 0x269   :  { %v9336_v3 = vcombine.high %v955_v57, %v959_v60  ;;  %v819_v36 = vld [vmem:[#allocation8 + $0xa50] sm:$0xff] }
 0x26a   :  { %4050 = vmatpush2.bf16.msra.mxu0 %v9247_v38  ;;  %v823_v37 = vld [vmem:[#allocation8 + $0xa70] sm:$0xff]  ;;  %v9207_v38 = vcombine.low %v827_v55, %v831_v56  ;;  %v10588_v55 = vpop.f32.mrf.mxu1  ;;  %v8922_v56 = vcombine.high %v540_v18, %v544_v44 }
 0x26b   :  { %4093 = vmatpush2.bf16.msra.mxu1 %v9375_v33  ;;  %4051 = vmatprep.subr.bf16.mxu0 %v9240_v40  ;;  %v947_v41 = vld [vmem:[#allocation8 + $0xe50] sm:$0xff]  ;;  %v9335_v33 = vcombine.low %v955_v57, %v959_v60  ;;  %v9200_v40 = vcombine.high %v819_v36, %v823_v37  ;;  %v532_v57 = vld [vmem:[#allocation8 + $0x158] sm:$0xff] }
 0x26c   :  { %4094 = vmatprep.subr.bf16.mxu1 %v9368_v6  ;;  %v951_v4 = vld [vmem:[#allocation8 + $0xe70] sm:$0xff]  ;;  %v536_v60 = vld [vmem:[#allocation8 + $0x178] sm:$0xff] }
 0x26d   :  { %v9328_v6 = vcombine.high %v947_v41, %v951_v4  ;;  %v811_v7 = vld [vmem:[#allocation8 + $0xa10] sm:$0xff] }
 0x26e   :  { %4052 = vmatpush2.bf16.msra.mxu0 %v9239_v14  ;;  %v815_v8 = vld [vmem:[#allocation8 + $0xa30] sm:$0xff]  ;;  %v9199_v14 = vcombine.low %v819_v36, %v823_v37  ;;  %v8921_v37 = vcombine.low %v540_v18, %v544_v44 }
 0x26f   :  { %4095 = vmatpush2.bf16.msra.mxu1 %v9367_v15  ;;  %4053 = vmatprep.subr.bf16.mxu0 %v9232_v16  ;;  %v939_v9 = vld [vmem:[#allocation8 + $0xe10] sm:$0xff]  ;;  %v9327_v15 = vcombine.low %v947_v41, %v951_v4  ;;  %v9192_v16 = vcombine.high %v811_v7, %v815_v8 }
 0x270   :  { %4096 = vmatprep.subr.bf16.mxu1 %v9360_v17  ;;  %v943_v12 = vld [vmem:[#allocation8 + $0xe30] sm:$0xff] }
 0x271   :  { %v9320_v17 = vcombine.high %v939_v9, %v943_v12 }
 0x272   :  { %4054 = vmatpush2.bf16.msra.mxu0 %v9231_v25  ;;  %v9191_v25 = vcombine.low %v811_v7, %v815_v8  ;;  %v524_v7 = vld [vmem:[#allocation8 + $0x118] sm:$0xff] }
 0x273   :  { %4097 = vmatpush2.bf16.msra.mxu1 %v9359_v11  ;;  %4055 = vmatprep.subr.bf16.mxu0 %v9224_v27  ;;  %v9319_v11 = vcombine.low %v939_v9, %v943_v12  ;;  %v8930_v27 = vcombine.high %v548_v19, %v552_v22  ;;  %v528_v8 = vld [vmem:[#allocation8 + $0x138] sm:$0xff] }
 0x274   :  { %4098 = vmatprep.subr.bf16.mxu1 %v9352_v28  ;;  %v9058_v28 = vcombine.high %v676_v23, %v680_v24  ;;  %v652_v12 = vld [vmem:[#allocation8 + $0x518] sm:$0xff]  ;;  %v8906_v19 = vcombine.high %v524_v7, %v528_v8 }
 0x276   :  { %4056 = vmatpush2.bf16.msra.mxu0 %v9223_v39  ;;  %v668_v39 = vld [vmem:[#allocation8 + $0x598] sm:$0xff] }
 0x277   :  { %4099 = vmatpush2.bf16.msra.mxu1 %v9351_v51  ;;  %4057 = vmatprep.subr.bf16.mxu0 %v9216_v53  ;;  %v672_v51 = vld [vmem:[#allocation8 + $0x5b8] sm:$0xff]  ;;  %v10586_v53 = vpop.f32.mrf.mxu0 }
 0x278   :  { %4100 = vmatprep.subr.bf16.mxu1 %v9344_v54  ;;  %v9057_v54 = vcombine.low %v676_v23, %v680_v24  ;;  %v9049_v4 = vcombine.low %v668_v39, %v672_v51  ;;  %v516_v23 = vld [vmem:[#allocation8 + $0xd8] sm:$0xff] }
 0x279   :  { %v520_v24 = vld [vmem:[#allocation8 + $0xf8] sm:$0xff] }
 0x27a   :  { %4058 = vmatpush2.bf16.msra.mxu0 %v9215_v62  ;;  %v8898_v18 = vcombine.high %v516_v23, %v520_v24 }
 0x27b   :  { %4101 = vmatpush2.bf16.msra.mxu1 %v9343_v0  ;;  %4059 = vmatprep.subr.bf16.mxu0 %v9208_v1  ;;  %v9050_v0 = vcombine.high %v668_v39, %v672_v51  ;;  %v660_v1 = vld [vmem:[#allocation8 + $0x558] sm:$0xff] }
 0x27c   :  { %4102 = vmatprep.subr.bf16.mxu1 %v9336_v3  ;;  %v636_v39 = vld [vmem:[#allocation8 + $0x498] sm:$0xff] }
 0x27d   :  { %v640_v51 = vld [vmem:[#allocation8 + $0x4b8] sm:$0xff] }
 0x27e   :  { %4060 = vmatpush2.bf16.msra.mxu0 %v9207_v38  ;;  %v8914_v38 = vcombine.high %v532_v57, %v536_v60 }
 0x27f   :  { %4103 = vmatpush2.bf16.msra.mxu1 %v9335_v33  ;;  %4061 = vmatprep.subr.bf16.mxu0 %v9200_v40 }
 0x280   :  { %4104 = vmatprep.subr.bf16.mxu1 %v9328_v6  ;;  %v9042_v6 = vcombine.high %v660_v1, %v664_v2 }
 0x282   :  { %4062 = vmatpush2.bf16.msra.mxu0 %v9199_v14  ;;  %v656_v14 = vld [vmem:[#allocation8 + $0x538] sm:$0xff] }
 0x283   :  { %4105 = vmatpush2.bf16.msra.mxu1 %v9327_v15  ;;  %4063 = vmatprep.subr.bf16.mxu0 %v9192_v16  ;;  %v8913_v15 = vcombine.low %v532_v57, %v536_v60  ;;  %v9018_v60 = vcombine.high %v636_v39, %v640_v51 }
 0x284   :  { %4106 = vmatprep.subr.bf16.mxu1 %v9320_v17  ;;  %v9041_v17 = vcombine.low %v660_v1, %v664_v2  ;;  %v628_v1 = vld [vmem:[#allocation8 + $0x458] sm:$0xff] }
 0x285   :  { %v632_v2 = vld [vmem:[#allocation8 + $0x478] sm:$0xff] }
 0x286   :  { %4064 = vmatpush2.bf16.msra.mxu0 %v9191_v25  ;;  %v644_v25 = vld [vmem:[#allocation8 + $0x4d8] sm:$0xff] }
 0x287   :  { %4107 = vmatpush2.bf16.msra.mxu1 %v9319_v11  ;;  %4119 = vmatprep.subr.bf16.mxu0 %v8930_v27  ;;  %v648_v11 = vld [vmem:[#allocation8 + $0x4f8] sm:$0xff]  ;;  %v8905_v27 = vcombine.low %v524_v7, %v528_v8 }
 0x288   :  { %4162 = vmatprep.subr.bf16.mxu1 %v9058_v28  ;;  %v9033_v28 = vcombine.low %v652_v12, %v656_v14  ;;  %v9026_v44 = vcombine.high %v644_v25, %v648_v11  ;;  %v620_v7 = vld [vmem:[#allocation8 + $0x418] sm:$0xff] }
 0x289   :  { %v3809_v62 = vpop.f32.mrf.mxu0  ;;  %4066 = vmatmul.mubr.bf16.vlgmr.msra.gmra.mxu0 %v10540_v43  ;;  %v624_v8 = vld [vmem:[#allocation8 + $0x438] sm:$0xff] }
 0x28a   :  { %v3810_v3 = vadd.f32 %v3809_v62, %v1014_v20  ;;  %v3852_v36 = vpop.f32.mrf.mxu1  ;;  %4109 = vmatmul.mubr.bf16.vlgmr.msra.gmra.mxu1 %v10542_v52  ;;  %4120 = vmatpush1.bf16.msra.mxu0 %v8929_v35  ;;  %v512_v35 = vld [vmem:[#allocation8 + $0xb8] sm:$0xff] }
 0x28b   :  { %4151 = vmatprep.mubr.bf16.mxu0 %v10498_v26  ;;  %4163 = vmatpush1.bf16.msra.mxu1 %v9057_v54  ;;  %v10593_v41 = vpop.f32.mrf.mxu0  ;;  %v8897_v54 = vcombine.low %v516_v23, %v520_v24  ;;  %v500_v62 = vld [vmem:[#allocation8 + $0x58] sm:$0xff]  ;;  %v9001_v23 = vcombine.low %v620_v7, %v624_v8 }
 0x28c   :  { %v10595_v33 = vadd.f32 %v3852_v36, %v3810_v3  ;;  %4194 = vmatprep.mubr.bf16.mxu1 %v10502_v30  ;;  %v10598_v40 = vpop.f32.mrf.mxu1  ;;  %4121 = vmatprep.subr.bf16.mxu0 %v8922_v56  ;;  %v9034_v30 = vcombine.high %v652_v12, %v656_v14  ;;  %v9025_v56 = vcombine.low %v644_v25, %v648_v11  ;;  %v604_v11 = vld [vmem:[#allocation8 + $0x398] sm:$0xff] }
 0x28d   :  { %v3813_v9 = vpop.f32.mrf.mxu0  ;;  %4164 = vmatprep.subr.bf16.mxu1 %v9050_v0  ;;  %v504_v0 = vld [vmem:[#allocation8 + $0x78] sm:$0xff]  ;;  %v9017_v36 = vcombine.low %v636_v39, %v640_v51  ;;  %v9009_v12 = vcombine.low %v628_v1, %v632_v2 }
 0x28e   :  { %v3814_v26 = vadd.f32 %v3813_v9, %v1014_v20  ;;  %4122 = vmatpush1.bf16.msra.mxu0 %v8921_v37  ;;  %v3856_v16 = vpop.f32.mrf.mxu1  ;;  %v508_v20 = vld [vmem:[#allocation8 + $0x98] sm:$0xff]  ;;  %v8882_v37 = vcombine.high %v500_v62, %v504_v0  ;;  %v8881_v9 = vcombine.low %v500_v62, %v504_v0 }
 0x28f   :  { %4165 = vmatpush1.bf16.msra.mxu1 %v9049_v4  ;;  %4123 = vmatprep.subr.bf16.mxu0 %v8914_v38  ;;  %v8890_v57 = vcombine.high %v508_v20, %v512_v35  ;;  %v8889_v3 = vcombine.low %v508_v20, %v512_v35  ;;  %v9010_v4 = vcombine.high %v628_v1, %v632_v2  ;;  %v492_v38 = vld [vmem:[#allocation8 + $0x18] sm:$0xff] }
 0x290   :  { %v10600_v22 = vadd.f32 %v3856_v16, %v3814_v26  ;;  %4166 = vmatprep.subr.bf16.mxu1 %v9042_v6  ;;  %v496_v6 = vld [vmem:[#allocation8 + $0x38] sm:$0xff]  ;;  %v9002_v26 = vcombine.high %v620_v7, %v624_v8 }
 0x291   :  { %v8874_v14 = vcombine.high %v492_v38, %v496_v6  ;;  %v616_v16 = vld [vmem:[#allocation8 + $0x3f8] sm:$0xff] }
 0x292   :  { %4124 = vmatpush1.bf16.msra.mxu0 %v8913_v15  ;;  %v612_v15 = vld [vmem:[#allocation8 + $0x3d8] sm:$0xff] }
 0x293   :  { %4167 = vmatpush1.bf16.msra.mxu1 %v9041_v17  ;;  %4125 = vmatprep.subr.bf16.mxu0 %v8906_v19  ;;  %v740_v17 = vld [vmem:[#allocation8 + $0x7d8] sm:$0xff]  ;;  %v8994_v24 = vcombine.high %v612_v15, %v616_v16 }
 0x294   :  { %4168 = vmatprep.subr.bf16.mxu1 %v9034_v30  ;;  %v744_v19 = vld [vmem:[#allocation8 + $0x7f8] sm:$0xff]  ;;  %v8873_v30 = vcombine.low %v492_v38, %v496_v6 }
 0x295   :  { %v9122_v25 = vcombine.high %v740_v17, %v744_v19  ;;  %v9121_v20 = vcombine.low %v740_v17, %v744_v19  ;;  %v596_v51 = vld [vmem:[#allocation8 + $0x358] sm:$0xff] }
 0x296   :  { %4126 = vmatpush1.bf16.msra.mxu0 %v8905_v27  ;;  %v608_v27 = vld [vmem:[#allocation8 + $0x3b8] sm:$0xff] }
 0x297   :  { %4169 = vmatpush1.bf16.msra.mxu1 %v9033_v28  ;;  %4127 = vmatprep.subr.bf16.mxu0 %v8898_v18  ;;  %v732_v28 = vld [vmem:[#allocation8 + $0x798] sm:$0xff]  ;;  %v8986_v35 = vcombine.high %v604_v11, %v608_v27 }
 0x298   :  { %4170 = vmatprep.subr.bf16.mxu1 %v9026_v44  ;;  %v736_v18 = vld [vmem:[#allocation8 + $0x7b8] sm:$0xff]  ;;  %v8993_v44 = vcombine.low %v612_v15, %v616_v16 }
 0x299   :  { %v9114_v39 = vcombine.high %v732_v28, %v736_v18  ;;  %v9113_v62 = vcombine.low %v732_v28, %v736_v18  ;;  %v588_v2 = vld [vmem:[#allocation8 + $0x318] sm:$0xff] }
 0x29a   :  { %4128 = vmatpush1.bf16.msra.mxu0 %v8897_v54  ;;  %v600_v54 = vld [vmem:[#allocation8 + $0x378] sm:$0xff] }
 0x29b   :  { %4171 = vmatpush1.bf16.msra.mxu1 %v9025_v56  ;;  %4129 = vmatprep.subr.bf16.mxu0 %v8890_v57  ;;  %v724_v56 = vld [vmem:[#allocation8 + $0x758] sm:$0xff]  ;;  %v8978_v0 = vcombine.high %v596_v51, %v600_v54 }
 0x29c   :  { %4172 = vmatprep.subr.bf16.mxu1 %v9018_v60  ;;  %v728_v57 = vld [vmem:[#allocation8 + $0x778] sm:$0xff]  ;;  %v8985_v60 = vcombine.low %v604_v11, %v608_v27 }
 0x29d   :  { %v9106_v1 = vcombine.high %v724_v56, %v728_v57  ;;  %v9105_v38 = vcombine.low %v724_v56, %v728_v57  ;;  %v580_v8 = vld [vmem:[#allocation8 + $0x2d8] sm:$0xff] }
 0x29e   :  { %4130 = vmatpush1.bf16.msra.mxu0 %v8889_v3  ;;  %v592_v3 = vld [vmem:[#allocation8 + $0x338] sm:$0xff] }
 0x29f   :  { %4173 = vmatpush1.bf16.msra.mxu1 %v9017_v36  ;;  %4131 = vmatprep.subr.bf16.mxu0 %v8882_v37  ;;  %v716_v36 = vld [vmem:[#allocation8 + $0x718] sm:$0xff]  ;;  %v8970_v6 = vcombine.high %v588_v2, %v592_v3 }
 0x2a0   :  { %4174 = vmatprep.subr.bf16.mxu1 %v9010_v4  ;;  %v720_v37 = vld [vmem:[#allocation8 + $0x738] sm:$0xff]  ;;  %v8977_v4 = vcombine.low %v596_v51, %v600_v54 }
 0x2a1   :  { %v9098_v7 = vcombine.high %v716_v36, %v720_v37  ;;  %v9097_v15 = vcombine.low %v716_v36, %v720_v37  ;;  %v572_v19 = vld [vmem:[#allocation8 + $0x298] sm:$0xff] }
 0x2a2   :  { %4132 = vmatpush1.bf16.msra.mxu0 %v8881_v9  ;;  %v584_v9 = vld [vmem:[#allocation8 + $0x2f8] sm:$0xff] }
 0x2a3   :  { %4175 = vmatpush1.bf16.msra.mxu1 %v9009_v12  ;;  %4133 = vmatprep.subr.bf16.mxu0 %v8874_v14  ;;  %v708_v12 = vld [vmem:[#allocation8 + $0x6d8] sm:$0xff]  ;;  %v8962_v16 = vcombine.high %v580_v8, %v584_v9 }
 0x2a4   :  { %4176 = vmatprep.subr.bf16.mxu1 %v9002_v26  ;;  %v712_v14 = vld [vmem:[#allocation8 + $0x6f8] sm:$0xff]  ;;  %v8969_v26 = vcombine.low %v588_v2, %v592_v3 }
 0x2a5   :  { %v9090_v17 = vcombine.high %v708_v12, %v712_v14  ;;  %v9089_v11 = vcombine.low %v708_v12, %v712_v14  ;;  %v564_v18 = vld [vmem:[#allocation8 + $0x258] sm:$0xff] }
 0x2a6   :  { %4134 = vmatpush1.bf16.msra.mxu0 %v8873_v30  ;;  %v576_v30 = vld [vmem:[#allocation8 + $0x2b8] sm:$0xff] }
 0x2a7   :  { %4177 = vmatpush1.bf16.msra.mxu1 %v9001_v23  ;;  %4135 = vmatprep.subr.bf16.mxu0 %v8994_v24  ;;  %v700_v23 = vld [vmem:[#allocation8 + $0x698] sm:$0xff]  ;;  %v8954_v27 = vcombine.high %v572_v19, %v576_v30 }
 0x2a8   :  { %4178 = vmatprep.subr.bf16.mxu1 %v9122_v25  ;;  %v704_v24 = vld [vmem:[#allocation8 + $0x6b8] sm:$0xff]  ;;  %v8961_v25 = vcombine.low %v580_v8, %v584_v9 }
 0x2a9   :  { %v9082_v28 = vcombine.high %v700_v23, %v704_v24  ;;  %v9081_v51 = vcombine.low %v700_v23, %v704_v24  ;;  %v556_v57 = vld [vmem:[#allocation8 + $0x218] sm:$0xff]  ;;  %v10604_v23 = vpop.f32.mrf.mxu1 }
 0x2aa   :  { %4136 = vmatpush2.bf16.msra.mxu0 %v8993_v44  ;;  %v568_v44 = vld [vmem:[#allocation8 + $0x278] sm:$0xff] }
 0x2ab   :  { %4179 = vmatpush2.bf16.msra.mxu1 %v9121_v20  ;;  %4137 = vmatprep.subr.bf16.mxu0 %v8986_v35  ;;  %v692_v20 = vld [vmem:[#allocation8 + $0x658] sm:$0xff]  ;;  %v8946_v54 = vcombine.high %v564_v18, %v568_v44 }
 0x2ac   :  { %4180 = vmatprep.subr.bf16.mxu1 %v9114_v39  ;;  %v696_v35 = vld [vmem:[#allocation8 + $0x678] sm:$0xff]  ;;  %v8953_v39 = vcombine.low %v572_v19, %v576_v30  ;;  %v10602_v19 = vpop.f32.mrf.mxu0 }
 0x2ad   :  { %v9074_v56 = vcombine.high %v692_v20, %v696_v35  ;;  %v9073_v2 = vcombine.low %v692_v20, %v696_v35  ;;  %v804_v37 = vld [vmem:[#allocation8 + $0x9d8] sm:$0xff] }
 0x2ae   :  { %4138 = vmatpush2.bf16.msra.mxu0 %v8985_v60  ;;  %v560_v60 = vld [vmem:[#allocation8 + $0x238] sm:$0xff] }
 0x2af   :  { %4181 = vmatpush2.bf16.msra.mxu1 %v9113_v62  ;;  %4139 = vmatprep.subr.bf16.mxu0 %v8978_v0  ;;  %v684_v62 = vld [vmem:[#allocation8 + $0x618] sm:$0xff]  ;;  %v8938_v3 = vcombine.high %v556_v57, %v560_v60 }
 0x2b0   :  { %4182 = vmatprep.subr.bf16.mxu1 %v9106_v1  ;;  %v688_v0 = vld [vmem:[#allocation8 + $0x638] sm:$0xff]  ;;  %v8945_v1 = vcombine.low %v564_v18, %v568_v44 }
 0x2b1   :  { %v9066_v36 = vcombine.high %v684_v62, %v688_v0  ;;  %v9065_v8 = vcombine.low %v684_v62, %v688_v0  ;;  %v796_v14 = vld [vmem:[#allocation8 + $0x998] sm:$0xff] }
 0x2b2   :  { %4140 = vmatpush2.bf16.msra.mxu0 %v8977_v4  ;;  %v808_v4 = vld [vmem:[#allocation8 + $0x9f8] sm:$0xff] }
 0x2b3   :  { %4183 = vmatpush2.bf16.msra.mxu1 %v9105_v38  ;;  %4141 = vmatprep.subr.bf16.mxu0 %v8970_v6  ;;  %v932_v38 = vld [vmem:[#allocation8 + $0xdd8] sm:$0xff]  ;;  %v9186_v9 = vcombine.high %v804_v37, %v808_v4 }
 0x2b4   :  { %4184 = vmatprep.subr.bf16.mxu1 %v9098_v7  ;;  %v936_v6 = vld [vmem:[#allocation8 + $0xdf8] sm:$0xff]  ;;  %v8937_v7 = vcombine.low %v556_v57, %v560_v60 }
 0x2b5   :  { %v9314_v12 = vcombine.high %v932_v38, %v936_v6  ;;  %v9313_v30 = vcombine.low %v932_v38, %v936_v6  ;;  %v916_v18 = vld [vmem:[#allocation8 + $0xd58] sm:$0xff] }
 0x2b6   :  { %4142 = vmatpush2.bf16.msra.mxu0 %v8969_v26  ;;  %v800_v26 = vld [vmem:[#allocation8 + $0x9b8] sm:$0xff] }
 0x2b7   :  { %4185 = vmatpush2.bf16.msra.mxu1 %v9097_v15  ;;  %4143 = vmatprep.subr.bf16.mxu0 %v8962_v16  ;;  %v9185_v15 = vcombine.low %v804_v37, %v808_v4  ;;  %v924_v16 = vld [vmem:[#allocation8 + $0xd98] sm:$0xff]  ;;  %v9178_v24 = vcombine.high %v796_v14, %v800_v26 }
 0x2b8   :  { %4186 = vmatprep.subr.bf16.mxu1 %v9090_v17  ;;  %v928_v17 = vld [vmem:[#allocation8 + $0xdb8] sm:$0xff] }
 0x2b9   :  { %v920_v44 = vld [vmem:[#allocation8 + $0xd78] sm:$0xff] }
 0x2ba   :  { %4144 = vmatpush2.bf16.msra.mxu0 %v8961_v25  ;;  %v788_v25 = vld [vmem:[#allocation8 + $0x958] sm:$0xff]  ;;  %v9298_v60 = vcombine.high %v916_v18, %v920_v44 }
 0x2bb   :  { %4187 = vmatpush2.bf16.msra.mxu1 %v9089_v11  ;;  %4145 = vmatprep.subr.bf16.mxu0 %v8954_v27  ;;  %v792_v11 = vld [vmem:[#allocation8 + $0x978] sm:$0xff] }
 0x2bc   :  { %4188 = vmatprep.subr.bf16.mxu1 %v9082_v28  ;;  %v9306_v28 = vcombine.high %v924_v16, %v928_v17  ;;  %v784_v62 = vld [vmem:[#allocation8 + $0x938] sm:$0xff] }
 0x2bd   :  { %v772_v38 = vld [vmem:[#allocation8 + $0x8d8] sm:$0xff] }
 0x2be   :  { %4146 = vmatpush2.bf16.msra.mxu0 %v8953_v39  ;;  %v9177_v39 = vcombine.low %v796_v14, %v800_v26  ;;  %v776_v6 = vld [vmem:[#allocation8 + $0x8f8] sm:$0xff] }
 0x2bf   :  { %4189 = vmatpush2.bf16.msra.mxu1 %v9081_v51  ;;  %4147 = vmatprep.subr.bf16.mxu0 %v8946_v54  ;;  %v9305_v54 = vcombine.low %v924_v16, %v928_v17  ;;  %v9154_v26 = vcombine.high %v772_v38, %v776_v6  ;;  %v764_v17 = vld [vmem:[#allocation8 + $0x898] sm:$0xff] }
 0x2c0   :  { %4190 = vmatprep.subr.bf16.mxu1 %v9074_v56  ;;  %v9170_v56 = vcombine.high %v788_v25, %v792_v11 }
 0x2c2   :  { %4148 = vmatpush2.bf16.msra.mxu0 %v8945_v1  ;;  %v912_v1 = vld [vmem:[#allocation8 + $0xd38] sm:$0xff] }
 0x2c3   :  { %4191 = vmatpush2.bf16.msra.mxu1 %v9073_v2  ;;  %4149 = vmatprep.subr.bf16.mxu0 %v8938_v3  ;;  %v9169_v2 = vcombine.low %v788_v25, %v792_v11  ;;  %v896_v25 = vld [vmem:[#allocation8 + $0xcb8] sm:$0xff]  ;;  %v9153_v11 = vcombine.low %v772_v38, %v776_v6 }
 0x2c4   :  { %4192 = vmatprep.subr.bf16.mxu1 %v9066_v36  ;;  %v9297_v36 = vcombine.low %v916_v18, %v920_v44  ;;  %v756_v44 = vld [vmem:[#allocation8 + $0x858] sm:$0xff] }
 0x2c6   :  { %4150 = vmatpush2.bf16.msra.mxu0 %v8937_v7  ;;  %v900_v7 = vld [vmem:[#allocation8 + $0xcd8] sm:$0xff] }
 0x2c7   :  { %4193 = vmatpush2.bf16.msra.mxu1 %v9065_v8  ;;  %4205 = vmatprep.subr.bf16.mxu0 %v9186_v9  ;;  %v904_v8 = vld [vmem:[#allocation8 + $0xcf8] sm:$0xff] }
 0x2c8   :  { %4248 = vmatprep.subr.bf16.mxu1 %v9314_v12  ;;  %v9282_v16 = vcombine.high %v900_v7, %v904_v8 }
 0x2c9   :  { %v3895_v27 = vpop.f32.mrf.mxu0  ;;  %4152 = vmatmul.mubr.bf16.vlgmr.msra.gmra.mxu0 %v10500_v29 }
 0x2ca   :  { %v3896_v20 = vadd.f32 %v3895_v27, %v10595_v33  ;;  %v3938_v35 = vpop.f32.mrf.mxu1  ;;  %4195 = vmatmul.mubr.bf16.vlgmr.msra.gmra.mxu1 %v10506_v34  ;;  %4206 = vmatpush1.bf16.msra.mxu0 %v9185_v15  ;;  %v780_v33 = vld [vmem:[#allocation8 + $0x918] sm:$0xff]  ;;  %v9281_v27 = vcombine.low %v900_v7, %v904_v8 }
 0x2cb   :  { %4237 = vmatprep.mubr.bf16.mxu0 %v10520_v5  ;;  %4249 = vmatpush1.bf16.msra.mxu1 %v9313_v30  ;;  %v10610_v51 = vpop.f32.mrf.mxu0  ;;  %v908_v34 = vld [vmem:[#allocation8 + $0xd18] sm:$0xff]  ;;  %v9162_v37 = vcombine.high %v780_v33, %v784_v62  ;;  %v9161_v14 = vcombine.low %v780_v33, %v784_v62 }
 0x2cc   :  { %v3939_v57 = vadd.f32 %v3938_v35, %v3896_v20  ;;  %4280 = vmatprep.mubr.bf16.mxu1 %v10522_v42  ;;  %v10613_v29 = vpop.f32.mrf.mxu1  ;;  %4207 = vmatprep.subr.bf16.mxu0 %v9178_v24  ;;  %v9290_v4 = vcombine.high %v908_v34, %v912_v1  ;;  %v768_v30 = vld [vmem:[#allocation8 + $0x8b8] sm:$0xff] }
 0x2cd   :  { %v3899_v0 = vpop.f32.mrf.mxu0  ;;  %4250 = vmatprep.subr.bf16.mxu1 %v9306_v28  ;;  %v892_v24 = vld [vmem:[#allocation8 + $0xc98] sm:$0xff]  ;;  %v9146_v28 = vcombine.high %v764_v17, %v768_v30 }
 0x2ce   :  { %v3900_v5 = vadd.f32 %v3899_v0, %v10600_v22  ;;  %4208 = vmatpush1.bf16.msra.mxu0 %v9177_v39  ;;  %v3942_v3 = vpop.f32.mrf.mxu1  ;;  %v4293_v9 = vmax.f32 %v3939_v57, 0.0  ;;  %v9289_v22 = vcombine.low %v908_v34, %v912_v1  ;;  %v9274_v18 = vcombine.high %v892_v24, %v896_v25  ;;  %v760_v20 = vld [vmem:[#allocation8 + $0x878] sm:$0xff] }
 0x2cf   :  { %4251 = vmatpush1.bf16.msra.mxu1 %v9305_v54  ;;  %4209 = vmatprep.subr.bf16.mxu0 %v9170_v56  ;;  %v884_v35 = vld [vmem:[#allocation8 + $0xc58] sm:$0xff]  ;;  %v9145_v54 = vcombine.low %v764_v17, %v768_v30  ;;  %v9273_v56 = vcombine.low %v892_v24, %v896_v25  ;;  %v9138_v57 = vcombine.high %v756_v44, %v760_v20 }
 0x2d0   :  { %v3943_v42 = vadd.f32 %v3942_v3, %v3900_v5  ;;  %4252 = vmatprep.subr.bf16.mxu1 %v9298_v60  ;;  %v888_v39 = vld [vmem:[#allocation8 + $0xc78] sm:$0xff]  ;;  %v9137_v1 = vcombine.low %v756_v44, %v760_v20 }
 0x2d1   :  { %v9266_v60 = vcombine.high %v884_v35, %v888_v39  ;;  %v748_v33 = vld [vmem:[#allocation8 + $0x818] sm:$0xff]  ;;  %v9265_v5 = vcombine.low %v884_v35, %v888_v39 }
 0x2d2   :  { %v4301_v12 = vmax.f32 %v3943_v42, 0.0  ;;  %4210 = vmatpush1.bf16.msra.mxu0 %v9169_v2  ;;  %v752_v62 = vld [vmem:[#allocation8 + $0x838] sm:$0xff] }
 0x2d3   :  { %4253 = vmatpush1.bf16.msra.mxu1 %v9297_v36  ;;  %4211 = vmatprep.subr.bf16.mxu0 %v9162_v37  ;;  %v876_v0 = vld [vmem:[#allocation8 + $0xc18] sm:$0xff]  ;;  %v9130_v2 = vcombine.high %v748_v33, %v752_v62  ;;  %v9129_v38 = vcombine.low %v748_v33, %v752_v62 }
 0x2d4   :  { %v10616_v15 = vpack.c.bf16 %v4301_v12, %v4293_v9  ;;  %4254 = vmatprep.subr.bf16.mxu1 %v9290_v4  ;;  %v880_v34 = vld [vmem:[#allocation8 + $0xc38] sm:$0xff] }
 0x2d5   :  { %v9258_v3 = vcombine.high %v876_v0, %v880_v34  ;;  %v868_v36 = vld [vmem:[#allocation8 + $0xbd8] sm:$0xff]  ;;  %v9257_v6 = vcombine.low %v876_v0, %v880_v34 }
 0x2d6   :  { %4212 = vmatpush1.bf16.msra.mxu0 %v9161_v14  ;;  %v872_v37 = vld [vmem:[#allocation8 + $0xbf8] sm:$0xff] }
 0x2d7   :  { %4255 = vmatpush1.bf16.msra.mxu1 %v9289_v22  ;;  %4213 = vmatprep.subr.bf16.mxu0 %v9154_v26  ;;  %v996_v42 = vld [vmem:[#allocation8 + $0xfd8] sm:$0xff]  ;;  %v9250_v7 = vcombine.high %v868_v36, %v872_v37  ;;  %v9249_v26 = vcombine.low %v868_v36, %v872_v37 }
 0x2d8   :  { %4256 = vmatprep.subr.bf16.mxu1 %v9282_v16  ;;  %v1000_v4 = vld [vmem:[#allocation8 + $0xff8] sm:$0xff] }
 0x2d9   :  { %v9378_v8 = vcombine.high %v996_v42, %v1000_v4  ;;  %v860_v9 = vld [vmem:[#allocation8 + $0xb98] sm:$0xff]  ;;  %v9377_v16 = vcombine.low %v996_v42, %v1000_v4 }
 0x2da   :  { %4214 = vmatpush1.bf16.msra.mxu0 %v9153_v11  ;;  %v864_v12 = vld [vmem:[#allocation8 + $0xbb8] sm:$0xff] }
 0x2db   :  { %4257 = vmatpush1.bf16.msra.mxu1 %v9281_v27  ;;  %4215 = vmatprep.subr.bf16.mxu0 %v9146_v28  ;;  %v988_v14 = vld [vmem:[#allocation8 + $0xf98] sm:$0xff]  ;;  %v9242_v17 = vcombine.high %v860_v9, %v864_v12  ;;  %v9241_v28 = vcombine.low %v860_v9, %v864_v12 }
 0x2dc   :  { %4258 = vmatprep.subr.bf16.mxu1 %v9274_v18  ;;  %v992_v22 = vld [vmem:[#allocation8 + $0xfb8] sm:$0xff] }
 0x2dd   :  { %v9370_v30 = vcombine.high %v988_v14, %v992_v22  ;;  %v852_v24 = vld [vmem:[#allocation8 + $0xb58] sm:$0xff]  ;;  %v9369_v18 = vcombine.low %v988_v14, %v992_v22 }
 0x2de   :  { %4216 = vmatpush1.bf16.msra.mxu0 %v9145_v54  ;;  %v856_v25 = vld [vmem:[#allocation8 + $0xb78] sm:$0xff] }
 0x2df   :  { %4259 = vmatpush1.bf16.msra.mxu1 %v9273_v56  ;;  %4217 = vmatprep.subr.bf16.mxu0 %v9138_v57  ;;  %v980_v11 = vld [vmem:[#allocation8 + $0xf58] sm:$0xff]  ;;  %v9234_v44 = vcombine.high %v852_v24, %v856_v25  ;;  %v9233_v57 = vcombine.low %v852_v24, %v856_v25 }
 0x2e0   :  { %4260 = vmatprep.subr.bf16.mxu1 %v9266_v60  ;;  %v984_v27 = vld [vmem:[#allocation8 + $0xf78] sm:$0xff] }
 0x2e1   :  { %v9362_v20 = vcombine.high %v980_v11, %v984_v27  ;;  %v844_v35 = vld [vmem:[#allocation8 + $0xb18] sm:$0xff]  ;;  %v9361_v60 = vcombine.low %v980_v11, %v984_v27 }
 0x2e2   :  { %4218 = vmatpush1.bf16.msra.mxu0 %v9137_v1  ;;  %v848_v39 = vld [vmem:[#allocation8 + $0xb38] sm:$0xff] }
 0x2e3   :  { %4261 = vmatpush1.bf16.msra.mxu1 %v9265_v5  ;;  %4219 = vmatprep.subr.bf16.mxu0 %v9130_v2  ;;  %v972_v54 = vld [vmem:[#allocation8 + $0xf18] sm:$0xff]  ;;  %v9226_v33 = vcombine.high %v844_v35, %v848_v39  ;;  %v9225_v2 = vcombine.low %v844_v35, %v848_v39 }
 0x2e4   :  { %4262 = vmatprep.subr.bf16.mxu1 %v9258_v3  ;;  %v976_v56 = vld [vmem:[#allocation8 + $0xf38] sm:$0xff] }
 0x2e5   :  { %v9354_v62 = vcombine.high %v972_v54, %v976_v56  ;;  %v836_v0 = vld [vmem:[#allocation8 + $0xad8] sm:$0xff]  ;;  %v9353_v3 = vcombine.low %v972_v54, %v976_v56 }
 0x2e6   :  { %4220 = vmatpush1.bf16.msra.mxu0 %v9129_v38  ;;  %v840_v34 = vld [vmem:[#allocation8 + $0xaf8] sm:$0xff]  ;;  %v10618_v38 = vld [vmem:[#allocation10] sm:$0xff] }
 0x2e7   :  { %4263 = vmatpush1.bf16.msra.mxu1 %v9257_v6  ;;  %4221 = vmatprep.subr.bf16.mxu0 %v9250_v7  ;;  %v964_v1 = vld [vmem:[#allocation8 + $0xed8] sm:$0xff]  ;;  %v9218_v36 = vcombine.high %v836_v0, %v840_v34  ;;  %v1010_v6 = vrot.slane %v10618_v38, %v10463_v46  ;;  %v1018_v9 = vrot.slane %v10618_v38, %v10469_v48 }
 0x2e8   :  { %4264 = vmatprep.subr.bf16.mxu1 %v9378_v8  ;;  %v968_v5 = vld [vmem:[#allocation8 + $0xef8] sm:$0xff]  ;;  %v9217_v12 = vcombine.low %v836_v0, %v840_v34 }
 0x2e9   :  { %v9346_v37 = vcombine.high %v964_v1, %v968_v5  ;;  %v828_v42 = vld [vmem:[#allocation8 + $0xa98] sm:$0xff]  ;;  %v3644_v14 = vadd.f32 %v10568_v10, %v1010_v6  ;;  %v9345_v22 = vcombine.low %v964_v1, %v968_v5  ;;  %v3640_v25 = vadd.f32 %v10559_v49, %v1010_v6 }
 0x2ea   :  { %4222 = vmatpush2.bf16.msra.mxu0 %v9249_v26  ;;  %v832_v4 = vld [vmem:[#allocation8 + $0xab8] sm:$0xff] }
 0x2eb   :  { %4265 = vmatpush2.bf16.msra.mxu1 %v9377_v16  ;;  %4223 = vmatprep.subr.bf16.mxu0 %v9242_v17  ;;  %v956_v7 = vld [vmem:[#allocation8 + $0xe98] sm:$0xff]  ;;  %v9210_v26 = vcombine.high %v828_v42, %v832_v4  ;;  %v3816_v16 = vadd.f32 %v10602_v19, %v1018_v9  ;;  %v3687_v10 = vadd.f32 %v10570_v13, %v3644_v14 }
 0x2ec   :  { %4266 = vmatprep.subr.bf16.mxu1 %v9370_v30  ;;  %v960_v8 = vld [vmem:[#allocation8 + $0xeb8] sm:$0xff]  ;;  %v3683_v49 = vadd.f32 %v10564_v21, %v3640_v25  ;;  %v4371_v21 = vld [vmem:[#allocation11 + $0x1c0] sm:$0xff] }
 0x2ed   :  { %v9338_v17 = vcombine.high %v956_v7, %v960_v8  ;;  %v820_v30 = vld [vmem:[#allocation8 + $0xa58] sm:$0xff]  ;;  %v3859_v19 = vadd.f32 %v10604_v23, %v3816_v16  ;;  %v4359_v25 = vld [vmem:[#allocation11 + $0x160] sm:$0xff] }
 0x2ee   :  { %4224 = vmatpush2.bf16.msra.mxu0 %v9241_v28  ;;  %v824_v24 = vld [vmem:[#allocation8 + $0xa78] sm:$0xff]  ;;  %v3812_v28 = vadd.f32 %v10593_v41, %v1018_v9  ;;  %v3726_v0 = vadd.f32 %v10576_v32, %v3683_v49  ;;  %v4363_v9 = vld [vmem:[#allocation11 + $0x180] sm:$0xff] }
 0x2ef   :  { %4267 = vmatpush2.bf16.msra.mxu1 %v9369_v18  ;;  %4225 = vmatprep.subr.bf16.mxu0 %v9234_v44  ;;  %v948_v11 = vld [vmem:[#allocation8 + $0xe58] sm:$0xff]  ;;  %v9209_v18 = vcombine.low %v828_v42, %v832_v4  ;;  %v3901_v44 = vpop.f32.mrf.mxu0  ;;  %v9202_v35 = vcombine.high %v820_v30, %v824_v24 }
 0x2f0   :  { %4268 = vmatprep.subr.bf16.mxu1 %v9362_v20  ;;  %v952_v27 = vld [vmem:[#allocation8 + $0xe78] sm:$0xff]  ;;  %v9337_v20 = vcombine.low %v956_v7, %v960_v8  ;;  %v3902_v13 = vadd.f32 %v3901_v44, %v3859_v19  ;;  %v3769_v32 = vadd.f32 %v10579_v31, %v3726_v0  ;;  %v4347_v19 = vld [vmem:[#allocation11 + $0x100] sm:$0xff] }
 0x2f1   :  { %v9330_v39 = vcombine.high %v948_v11, %v952_v27  ;;  %v812_v54 = vld [vmem:[#allocation8 + $0xa18] sm:$0xff]  ;;  %v9329_v23 = vcombine.low %v948_v11, %v952_v27  ;;  %v4483_v27 = vld [vmem:[#allocation11 + $0x540] sm:$0xff] }
 0x2f2   :  { %4226 = vmatpush2.bf16.msra.mxu0 %v9233_v57  ;;  %v816_v56 = vld [vmem:[#allocation8 + $0xa38] sm:$0xff]  ;;  %v3730_v57 = vadd.f32 %v10586_v53, %v3687_v10  ;;  %v4292_v16 = vmax.f32 %v3769_v32, 0.0  ;;  %v4451_v32 = vld [vmem:[#allocation11 + $0x440] sm:$0xff] }
 0x2f3   :  { %4269 = vmatpush2.bf16.msra.mxu1 %v9361_v60  ;;  %4227 = vmatprep.subr.bf16.mxu0 %v9226_v33  ;;  %v940_v41 = vld [vmem:[#allocation8 + $0xe18] sm:$0xff]  ;;  %v3855_v33 = vadd.f32 %v10598_v40, %v3812_v28  ;;  %v9194_v34 = vcombine.high %v812_v54, %v816_v56  ;;  %v4503_v40 = vld [vmem:[#allocation11 + $0x5e0] sm:$0xff]  ;;  %v9193_v42 = vcombine.low %v812_v54, %v816_v56 }
 0x2f4   :  { %4270 = vmatprep.subr.bf16.mxu1 %v9354_v62  ;;  %v944_v60 = vld [vmem:[#allocation8 + $0xe38] sm:$0xff]  ;;  %v9201_v62 = vcombine.low %v820_v30, %v824_v24  ;;  %v3773_v53 = vadd.f32 %v10588_v55, %v3730_v57  ;;  %v4355_v24 = vld [vmem:[#allocation11 + $0x140] sm:$0xff] }
 0x2f5   :  { %v3898_v1 = vadd.f32 %v10610_v51, %v3855_v33  ;;  %v9322_v5 = vcombine.high %v940_v41, %v944_v60  ;;  %v9321_v4 = vcombine.low %v940_v41, %v944_v60  ;;  %v4487_v28 = vld [vmem:[#allocation11 + $0x560] sm:$0xff]  ;;  %v9419_v56 = vcombine.low %v4355_v24, %v4359_v25 }
 0x2f6   :  { %4228 = vmatpush2.bf16.msra.mxu0 %v9225_v2  ;;  %v4375_v2 = vld [vmem:[#allocation11 + $0x1e0] sm:$0xff]  ;;  %v4300_v8 = vmax.f32 %v3773_v53, 0.0 }
 0x2f7   :  { %4271 = vmatpush2.bf16.msra.mxu1 %v9353_v3  ;;  %4229 = vmatprep.subr.bf16.mxu0 %v9218_v36  ;;  %v3944_v3 = vpop.f32.mrf.mxu1  ;;  %v4499_v36 = vld [vmem:[#allocation11 + $0x5c0] sm:$0xff]  ;;  %v9436_v6 = vcombine.high %v4371_v21, %v4375_v2  ;;  %v3941_v51 = vadd.f32 %v10613_v29, %v3898_v1  ;;  %v9435_v14 = vcombine.low %v4371_v21, %v4375_v2 }
 0x2f8   :  { %4272 = vmatprep.subr.bf16.mxu1 %v9346_v37  ;;  %v3945_v37 = vadd.f32 %v3944_v3, %v3902_v13  ;;  %v9564_v7 = vcombine.high %v4499_v36, %v4503_v40  ;;  %v9563_v31 = vcombine.low %v4499_v36, %v4503_v40  ;;  %v10638_v29 = vpack.c.bf16 %v4300_v8, %v4292_v16  ;;  %v4479_v54 = vld [vmem:[#allocation11 + $0x520] sm:$0xff] }
 0x2f9   :  { %v4339_v41 = vld [vmem:[#allocation11 + $0xc0] sm:$0xff] }
 0x2fa   :  { %4230 = vmatpush2.bf16.msra.mxu0 %v9217_v12  ;;  %v4367_v12 = vld [vmem:[#allocation11 + $0x1a0] sm:$0xff]  ;;  %v4302_v55 = vmax.f32 %v3945_v37, 0.0 }
 0x2fb   :  { %4273 = vmatpush2.bf16.msra.mxu1 %v9345_v22  ;;  %4231 = vmatprep.subr.bf16.mxu0 %v9210_v26  ;;  %v4491_v22 = vld [vmem:[#allocation11 + $0x580] sm:$0xff]  ;;  %v9428_v30 = vcombine.high %v4363_v9, %v4367_v12  ;;  %v9427_v10 = vcombine.low %v4363_v9, %v4367_v12 }
 0x2fc   :  { %4274 = vmatprep.subr.bf16.mxu1 %v9338_v17  ;;  %v4495_v26 = vld [vmem:[#allocation11 + $0x5a0] sm:$0xff]  ;;  %v4294_v17 = vmax.f32 %v3941_v51, 0.0 }
 0x2fd   :  { %v9556_v11 = vcombine.high %v4491_v22, %v4495_v26  ;;  %v9555_v44 = vcombine.low %v4491_v22, %v4495_v26  ;;  %v4343_v60 = vld [vmem:[#allocation11 + $0xe0] sm:$0xff] }
 0x2fe   :  { %4232 = vmatpush2.bf16.msra.mxu0 %v9209_v18  ;;  %v10641_v18 = vpack.c.bf16 %v4302_v55, %v4294_v17  ;;  %v4467_v33 = vld [vmem:[#allocation11 + $0x4c0] sm:$0xff]  ;;  %v9403_v53 = vcombine.low %v4339_v41, %v4343_v60 }
 0x2ff   :  { %4275 = vmatpush2.bf16.msra.mxu1 %v9337_v20  ;;  %4233 = vmatprep.subr.bf16.mxu0 %v9202_v35  ;;  %v9420_v20 = vcombine.high %v4355_v24, %v4359_v25  ;;  %v9548_v35 = vcombine.high %v4483_v27, %v4487_v28  ;;  %v4471_v13 = vld [vmem:[#allocation11 + $0x4e0] sm:$0xff] }
 0x300   :  { %4276 = vmatprep.subr.bf16.mxu1 %v9330_v39  ;;  %v4475_v39 = vld [vmem:[#allocation11 + $0x500] sm:$0xff]  ;;  %v9531_v3 = vcombine.low %v4467_v33, %v4471_v13 }
 0x301   :  { %v9540_v57 = vcombine.high %v4475_v39, %v4479_v54  ;;  %v9539_v0 = vcombine.low %v4475_v39, %v4479_v54  ;;  %v4331_v1 = vld [vmem:[#allocation11 + $0x80] sm:$0xff] }
 0x302   :  { %4234 = vmatpush2.bf16.msra.mxu0 %v9201_v62  ;;  %v4459_v21 = vld [vmem:[#allocation11 + $0x480] sm:$0xff] }
 0x303   :  { %4277 = vmatpush2.bf16.msra.mxu1 %v9329_v23  ;;  %4235 = vmatprep.subr.bf16.mxu0 %v9194_v34  ;;  %v9404_v23 = vcombine.high %v4339_v41, %v4343_v60  ;;  %v9532_v34 = vcombine.high %v4467_v33, %v4471_v13  ;;  %v4463_v2 = vld [vmem:[#allocation11 + $0x4a0] sm:$0xff] }
 0x304   :  { %4278 = vmatprep.subr.bf16.mxu1 %v9322_v5  ;;  %v4335_v5 = vld [vmem:[#allocation11 + $0xa0] sm:$0xff]  ;;  %v9524_v40 = vcombine.high %v4459_v21, %v4463_v2  ;;  %v9523_v51 = vcombine.low %v4459_v21, %v4463_v2 }
 0x305   :  { %v9396_v36 = vcombine.high %v4331_v1, %v4335_v5  ;;  %v4323_v37 = vld [vmem:[#allocation11 + $0x40] sm:$0xff] }
 0x306   :  { %4236 = vmatpush2.bf16.msra.mxu0 %v9193_v42  ;;  %v4327_v42 = vld [vmem:[#allocation11 + $0x60] sm:$0xff] }
 0x307   :  { %4279 = vmatpush2.bf16.msra.mxu1 %v9321_v4  ;;  %7429 = vmatprep.subr.bf16.mxu0 %v9436_v6  ;;  %v4455_v4 = vld [vmem:[#allocation11 + $0x460] sm:$0xff]  ;;  %v9395_v6 = vcombine.low %v4331_v1, %v4335_v5  ;;  %v9387_v22 = vcombine.low %v4323_v37, %v4327_v42 }
 0x308   :  { %7472 = vmatprep.subr.bf16.mxu1 %v9564_v7  ;;  %v9388_v7 = vcombine.high %v4323_v37, %v4327_v42  ;;  %v9516_v8 = vcombine.high %v4451_v32, %v4455_v4  ;;  %v4315_v9 = vld [vmem:[#allocation11] sm:$0xff]  ;;  %v9515_v26 = vcombine.low %v4451_v32, %v4455_v4 }
 0x309   :  { %4238 = vmatmul.mubr.bf16.vlgmr.msra.gmra.mxu0 %v10540_v43  ;;  %v4351_v43 = vld [vmem:[#allocation11 + $0x120] sm:$0xff] }
 0x30a   :  { %4281 = vmatmul.mubr.bf16.vlgmr.msra.gmra.mxu1 %v10542_v52  ;;  %7430 = vmatpush1.bf16.msra.mxu0 %v9435_v14  ;;  %v9547_v52 = vcombine.low %v4483_v27, %v4487_v28  ;;  %v9412_v49 = vcombine.high %v4347_v19, %v4351_v43  ;;  %v9411_v62 = vcombine.low %v4347_v19, %v4351_v43  ;;  %v4319_v12 = vld [vmem:[#allocation11 + $0x20] sm:$0xff] }
 0x30b   :  { %7461 = vmatprep.mubr.bf16.mxu0 %v10638_v29  ;;  %7473 = vmatpush1.bf16.msra.mxu1 %v9563_v31  ;;  %v4443_v55 = vld [vmem:[#allocation11 + $0x400] sm:$0xff]  ;;  %v9380_v16 = vcombine.high %v4315_v9, %v4319_v12 }
 0x30c   :  { %7504 = vmatprep.mubr.bf16.mxu1 %v10641_v18  ;;  %7431 = vmatprep.subr.bf16.mxu0 %v9428_v30  ;;  %v4447_v14 = vld [vmem:[#allocation11 + $0x420] sm:$0xff] }
 0x30d   :  { %7474 = vmatprep.subr.bf16.mxu1 %v9556_v11  ;;  %v9508_v31 = vcombine.high %v4443_v55, %v4447_v14  ;;  %v4435_v17 = vld [vmem:[#allocation11 + $0x3c0] sm:$0xff]  ;;  %v9379_v11 = vcombine.low %v4315_v9, %v4319_v12  ;;  %v9507_v27 = vcombine.low %v4443_v55, %v4447_v14 }
 0x30e   :  { %7432 = vmatpush1.bf16.msra.mxu0 %v9427_v10  ;;  %v4439_v30 = vld [vmem:[#allocation11 + $0x3e0] sm:$0xff] }
 0x30f   :  { %7475 = vmatpush1.bf16.msra.mxu1 %v9555_v44  ;;  %7433 = vmatprep.subr.bf16.mxu0 %v9420_v20  ;;  %v4563_v24 = vld [vmem:[#allocation11 + $0x7c0] sm:$0xff]  ;;  %v9500_v28 = vcombine.high %v4435_v17, %v4439_v30  ;;  %v9499_v43 = vcombine.low %v4435_v17, %v4439_v30 }
 0x310   :  { %7476 = vmatprep.subr.bf16.mxu1 %v9548_v35  ;;  %v4567_v25 = vld [vmem:[#allocation11 + $0x7e0] sm:$0xff] }
 0x311   :  { %v9628_v10 = vcombine.high %v4563_v24, %v4567_v25  ;;  %v4427_v44 = vld [vmem:[#allocation11 + $0x380] sm:$0xff]  ;;  %v9627_v39 = vcombine.low %v4563_v24, %v4567_v25  ;;  %v10646_v24 = vpop.f32.mrf.mxu0 }
 0x312   :  { %7434 = vmatpush1.bf16.msra.mxu0 %v9419_v56  ;;  %v4431_v20 = vld [vmem:[#allocation11 + $0x3a0] sm:$0xff] }
 0x313   :  { %7477 = vmatpush1.bf16.msra.mxu1 %v9547_v52  ;;  %7435 = vmatprep.subr.bf16.mxu0 %v9412_v49  ;;  %v4555_v35 = vld [vmem:[#allocation11 + $0x780] sm:$0xff]  ;;  %v9492_v54 = vcombine.high %v4427_v44, %v4431_v20  ;;  %v9491_v60 = vcombine.low %v4427_v44, %v4431_v20 }
 0x314   :  { %7478 = vmatprep.subr.bf16.mxu1 %v9540_v57  ;;  %v4559_v19 = vld [vmem:[#allocation11 + $0x7a0] sm:$0xff] }
 0x315   :  { %v9620_v56 = vcombine.high %v4555_v35, %v4559_v19  ;;  %v4419_v52 = vld [vmem:[#allocation11 + $0x340] sm:$0xff]  ;;  %v9619_v33 = vcombine.low %v4555_v35, %v4559_v19 }
 0x316   :  { %7436 = vmatpush1.bf16.msra.mxu0 %v9411_v62  ;;  %v4423_v49 = vld [vmem:[#allocation11 + $0x360] sm:$0xff] }
 0x317   :  { %7479 = vmatpush1.bf16.msra.mxu1 %v9539_v0  ;;  %7437 = vmatprep.subr.bf16.mxu0 %v9404_v23  ;;  %v4547_v57 = vld [vmem:[#allocation11 + $0x740] sm:$0xff]  ;;  %v9484_v13 = vcombine.high %v4419_v52, %v4423_v49  ;;  %v9483_v5 = vcombine.low %v4419_v52, %v4423_v49 }
 0x318   :  { %7480 = vmatprep.subr.bf16.mxu1 %v9532_v34  ;;  %v4551_v41 = vld [vmem:[#allocation11 + $0x760] sm:$0xff] }
 0x319   :  { %v9612_v62 = vcombine.high %v4547_v57, %v4551_v41  ;;  %v4411_v0 = vld [vmem:[#allocation11 + $0x300] sm:$0xff]  ;;  %v9611_v21 = vcombine.low %v4547_v57, %v4551_v41 }
 0x31a   :  { %7438 = vmatpush1.bf16.msra.mxu0 %v9403_v53  ;;  %v4415_v23 = vld [vmem:[#allocation11 + $0x320] sm:$0xff] }
 0x31b   :  { %7481 = vmatpush1.bf16.msra.mxu1 %v9531_v3  ;;  %7439 = vmatprep.subr.bf16.mxu0 %v9396_v36  ;;  %v4539_v34 = vld [vmem:[#allocation11 + $0x700] sm:$0xff]  ;;  %v9476_v2 = vcombine.high %v4411_v0, %v4415_v23  ;;  %v9475_v42 = vcombine.low %v4411_v0, %v4415_v23 }
 0x31c   :  { %7482 = vmatprep.subr.bf16.mxu1 %v9524_v40  ;;  %v4543_v1 = vld [vmem:[#allocation11 + $0x720] sm:$0xff] }
 0x31d   :  { %v9604_v53 = vcombine.high %v4539_v34, %v4543_v1  ;;  %v4403_v3 = vld [vmem:[#allocation11 + $0x2c0] sm:$0xff]  ;;  %v9603_v32 = vcombine.low %v4539_v34, %v4543_v1 }
 0x31e   :  { %7440 = vmatpush1.bf16.msra.mxu0 %v9395_v6  ;;  %v4407_v36 = vld [vmem:[#allocation11 + $0x2e0] sm:$0xff] }
 0x31f   :  { %7483 = vmatpush1.bf16.msra.mxu1 %v9523_v51  ;;  %7441 = vmatprep.subr.bf16.mxu0 %v9388_v7  ;;  %v4531_v40 = vld [vmem:[#allocation11 + $0x6c0] sm:$0xff]  ;;  %v9468_v4 = vcombine.high %v4403_v3, %v4407_v36  ;;  %v9467_v12 = vcombine.low %v4403_v3, %v4407_v36 }
 0x320   :  { %7484 = vmatprep.subr.bf16.mxu1 %v9516_v8  ;;  %v4535_v37 = vld [vmem:[#allocation11 + $0x6e0] sm:$0xff] }
 0x321   :  { %v9596_v6 = vcombine.high %v4531_v40, %v4535_v37  ;;  %v4395_v51 = vld [vmem:[#allocation11 + $0x280] sm:$0xff]  ;;  %v9595_v55 = vcombine.low %v4531_v40, %v4535_v37 }
 0x322   :  { %7442 = vmatpush1.bf16.msra.mxu0 %v9387_v22  ;;  %v4399_v7 = vld [vmem:[#allocation11 + $0x2a0] sm:$0xff] }
 0x323   :  { %7485 = vmatpush1.bf16.msra.mxu1 %v9515_v26  ;;  %7443 = vmatprep.subr.bf16.mxu0 %v9380_v16  ;;  %v4523_v8 = vld [vmem:[#allocation11 + $0x680] sm:$0xff]  ;;  %v9460_v14 = vcombine.high %v4395_v51, %v4399_v7  ;;  %v9459_v30 = vcombine.low %v4395_v51, %v4399_v7 }
 0x324   :  { %7486 = vmatprep.subr.bf16.mxu1 %v9508_v31  ;;  %v4527_v9 = vld [vmem:[#allocation11 + $0x6a0] sm:$0xff] }
 0x325   :  { %v9588_v22 = vcombine.high %v4523_v8, %v4527_v9  ;;  %v4387_v26 = vld [vmem:[#allocation11 + $0x240] sm:$0xff]  ;;  %v9587_v25 = vcombine.low %v4523_v8, %v4527_v9 }
 0x326   :  { %7444 = vmatpush1.bf16.msra.mxu0 %v9379_v11  ;;  %v4391_v16 = vld [vmem:[#allocation11 + $0x260] sm:$0xff] }
 0x327   :  { %7487 = vmatpush1.bf16.msra.mxu1 %v9507_v27  ;;  %7445 = vmatprep.subr.bf16.mxu0 %v9500_v28  ;;  %v4515_v31 = vld [vmem:[#allocation11 + $0x640] sm:$0xff]  ;;  %v9452_v11 = vcombine.high %v4387_v26, %v4391_v16  ;;  %v10648_v27 = vpop.f32.mrf.mxu1  ;;  %v9451_v19 = vcombine.low %v4387_v26, %v4391_v16 }
 0x328   :  { %7488 = vmatprep.subr.bf16.mxu1 %v9628_v10  ;;  %v4519_v17 = vld [vmem:[#allocation11 + $0x660] sm:$0xff] }
 0x329   :  { %v9580_v28 = vcombine.high %v4515_v31, %v4519_v17  ;;  %v4379_v10 = vld [vmem:[#allocation11 + $0x200] sm:$0xff] }
 0x32a   :  { %7446 = vmatpush2.bf16.msra.mxu0 %v9499_v43  ;;  %v4383_v44 = vld [vmem:[#allocation11 + $0x220] sm:$0xff]  ;;  %v3983_v43 = vpop.f32.mrf.mxu0 }
 0x32b   :  { %7489 = vmatpush2.bf16.msra.mxu1 %v9627_v39  ;;  %7447 = vmatprep.subr.bf16.mxu0 %v9492_v54  ;;  %v4507_v20 = vld [vmem:[#allocation11 + $0x600] sm:$0xff]  ;;  %v9579_v39 = vcombine.low %v4515_v31, %v4519_v17  ;;  %v9444_v54 = vcombine.high %v4379_v10, %v4383_v44 }
 0x32c   :  { %7490 = vmatprep.subr.bf16.mxu1 %v9620_v56  ;;  %v4511_v35 = vld [vmem:[#allocation11 + $0x620] sm:$0xff]  ;;  %v4026_v56 = vpop.f32.mrf.mxu1 }
 0x32d   :  { %v9572_v52 = vcombine.high %v4507_v20, %v4511_v35  ;;  %v4627_v49 = vld [vmem:[#allocation11 + $0x9c0] sm:$0xff]  ;;  %v9571_v0 = vcombine.low %v4507_v20, %v4511_v35 }
 0x32e   :  { %7448 = vmatpush2.bf16.msra.mxu0 %v9491_v60  ;;  %v4631_v57 = vld [vmem:[#allocation11 + $0x9e0] sm:$0xff]  ;;  %v10654_v34 = vpop.f32.mrf.mxu1 }
 0x32f   :  { %7491 = vmatpush2.bf16.msra.mxu1 %v9619_v33  ;;  %7449 = vmatprep.subr.bf16.mxu0 %v9484_v13  ;;  %v4755_v41 = vld [vmem:[#allocation11 + $0xdc0] sm:$0xff]  ;;  %v1026_v33 = vrot.slane %v10618_v38, %v10485_v59  ;;  %v9443_v13 = vcombine.low %v4379_v10, %v4383_v44  ;;  %v9692_v23 = vcombine.high %v4627_v49, %v4631_v57 }
 0x330   :  { %7492 = vmatprep.subr.bf16.mxu1 %v9612_v62  ;;  %v4759_v60 = vld [vmem:[#allocation11 + $0xde0] sm:$0xff]  ;;  %v10652_v62 = vpop.f32.mrf.mxu0  ;;  %v9691_v36 = vcombine.low %v4627_v49, %v4631_v57 }
 0x331   :  { %v4619_v1 = vld [vmem:[#allocation11 + $0x980] sm:$0xff]  ;;  %v3984_v3 = vadd.f32 %v3983_v43, %v1026_v33 }
 0x332   :  { %7450 = vmatpush2.bf16.msra.mxu0 %v9483_v5  ;;  %v4623_v5 = vld [vmem:[#allocation11 + $0x9a0] sm:$0xff]  ;;  %v3987_v40 = vpop.f32.mrf.mxu0 }
 0x333   :  { %7493 = vmatpush2.bf16.msra.mxu1 %v9611_v21  ;;  %7451 = vmatprep.subr.bf16.mxu0 %v9476_v2  ;;  %v9820_v21 = vcombine.high %v4755_v41, %v4759_v60  ;;  %v4747_v2 = vld [vmem:[#allocation11 + $0xd80] sm:$0xff]  ;;  %v9684_v37 = vcombine.high %v4619_v1, %v4623_v5 }
 0x334   :  { %7494 = vmatprep.subr.bf16.mxu1 %v9604_v53  ;;  %v4751_v53 = vld [vmem:[#allocation11 + $0xda0] sm:$0xff] }
 0x335   :  { %v9812_v51 = vcombine.high %v4747_v2, %v4751_v53  ;;  %v4739_v8 = vld [vmem:[#allocation11 + $0xd40] sm:$0xff]  ;;  %v9811_v31 = vcombine.low %v4747_v2, %v4751_v53 }
 0x336   :  { %7452 = vmatpush2.bf16.msra.mxu0 %v9475_v42  ;;  %v9819_v42 = vcombine.low %v4755_v41, %v4759_v60  ;;  %v4743_v9 = vld [vmem:[#allocation11 + $0xd60] sm:$0xff] }
 0x337   :  { %7495 = vmatpush2.bf16.msra.mxu1 %v9603_v32  ;;  %7453 = vmatprep.subr.bf16.mxu0 %v9468_v4  ;;  %v4030_v32 = vpop.f32.mrf.mxu1  ;;  %v4611_v4 = vld [vmem:[#allocation11 + $0x940] sm:$0xff] }
 0x338   :  { %7496 = vmatprep.subr.bf16.mxu1 %v9596_v6  ;;  %v4615_v6 = vld [vmem:[#allocation11 + $0x960] sm:$0xff] }
 0x339   :  { %v9676_v16 = vcombine.high %v4611_v4, %v4615_v6  ;;  %v4731_v44 = vld [vmem:[#allocation11 + $0xd00] sm:$0xff]  ;;  %v9675_v43 = vcombine.low %v4611_v4, %v4615_v6 }
 0x33a   :  { %7454 = vmatpush2.bf16.msra.mxu0 %v9467_v12  ;;  %v4027_v12 = vadd.f32 %v4026_v56, %v3984_v3  ;;  %v4735_v20 = vld [vmem:[#allocation11 + $0xd20] sm:$0xff]  ;;  %v9803_v56 = vcombine.low %v4739_v8, %v4743_v9 }
 0x33b   :  { %7497 = vmatpush2.bf16.msra.mxu1 %v9595_v55  ;;  %7455 = vmatprep.subr.bf16.mxu0 %v9460_v14  ;;  %v3988_v55 = vadd.f32 %v3987_v40, %v1026_v33  ;;  %v4595_v57 = vld [vmem:[#allocation11 + $0x8c0] sm:$0xff]  ;;  %v9796_v60 = vcombine.high %v4731_v44, %v4735_v20 }
 0x33c   :  { %7498 = vmatprep.subr.bf16.mxu1 %v9588_v22  ;;  %v9683_v22 = vcombine.low %v4619_v1, %v4623_v5  ;;  %v4599_v41 = vld [vmem:[#allocation11 + $0x8e0] sm:$0xff] }
 0x33d   :  { %v4031_v35 = vadd.f32 %v4030_v32, %v3988_v55  ;;  %v9660_v5 = vcombine.high %v4595_v57, %v4599_v41  ;;  %v4587_v3 = vld [vmem:[#allocation11 + $0x880] sm:$0xff]  ;;  %v9659_v4 = vcombine.low %v4595_v57, %v4599_v41 }
 0x33e   :  { %7456 = vmatpush2.bf16.msra.mxu0 %v9459_v30  ;;  %v4583_v55 = vld [vmem:[#allocation11 + $0x860] sm:$0xff] }
 0x33f   :  { %7499 = vmatpush2.bf16.msra.mxu1 %v9587_v25  ;;  %7457 = vmatprep.subr.bf16.mxu0 %v9452_v11  ;;  %v4603_v25 = vld [vmem:[#allocation11 + $0x900] sm:$0xff] }
 0x340   :  { %7500 = vmatprep.subr.bf16.mxu1 %v9580_v28  ;;  %v4607_v11 = vld [vmem:[#allocation11 + $0x920] sm:$0xff]  ;;  %v9804_v28 = vcombine.high %v4739_v8, %v4743_v9  ;;  %v10668_v8 = vld [vmem:[#allocation11 + $0x5c8] sm:$0xff] }
 0x341   :  { %v9667_v1 = vcombine.low %v4603_v25, %v4607_v11  ;;  %v10670_v9 = vld [vmem:[#allocation11 + $0x5e8] sm:$0xff]  ;;  %v4819_v57 = vld [vmem:[#allocation11 + $0xfc0] sm:$0xff] }
 0x342   :  { %7458 = vmatpush2.bf16.msra.mxu0 %v9451_v19  ;;  %v4823_v41 = vld [vmem:[#allocation11 + $0xfe0] sm:$0xff] }
 0x343   :  { %7501 = vmatpush2.bf16.msra.mxu1 %v9579_v39  ;;  %7459 = vmatprep.subr.bf16.mxu0 %v9444_v54  ;;  %v9668_v54 = vcombine.high %v4603_v25, %v4607_v11  ;;  %v4571_v11 = vld [vmem:[#allocation11 + $0x800] sm:$0xff] }
 0x344   :  { %7502 = vmatprep.subr.bf16.mxu1 %v9572_v52 }
 0x346   :  { %7460 = vmatpush2.bf16.msra.mxu0 %v9443_v13  ;;  %v4723_v13 = vld [vmem:[#allocation11 + $0xcc0] sm:$0xff] }
 0x347   :  { %7503 = vmatpush2.bf16.msra.mxu1 %v9571_v0  ;;  %7515 = vmatprep.subr.bf16.mxu0 %v9692_v23  ;;  %v4727_v0 = vld [vmem:[#allocation11 + $0xce0] sm:$0xff] }
 0x348   :  { %7558 = vmatprep.subr.bf16.mxu1 %v9820_v21  ;;  %v9795_v21 = vcombine.low %v4731_v44, %v4735_v20  ;;  %v9788_v40 = vcombine.high %v4723_v13, %v4727_v0  ;;  %v4699_v20 = vld [vmem:[#allocation11 + $0xc00] sm:$0xff] }
 0x349   :  { %v10656_v7 = vpop.f32.mrf.mxu0  ;;  %7462 = vmatmul.mubr.bf16.vlgmr.msra.gmra.mxu0 %v10582_v45 }
 0x34a   :  { %v10659_v14 = vpop.f32.mrf.mxu1  ;;  %7505 = vmatmul.mubr.bf16.vlgmr.msra.gmra.mxu1 %v10616_v15  ;;  %7516 = vmatpush1.bf16.msra.mxu0 %v9691_v36  ;;  %v4591_v36 = vld [vmem:[#allocation11 + $0x8a0] sm:$0xff] }
 0x34b   :  { %v4069_v26 = vpop.f32.mrf.mxu0  ;;  %7517 = vmatprep.subr.bf16.mxu0 %v9684_v37  ;;  %7559 = vmatpush1.bf16.msra.mxu1 %v9819_v42  ;;  %v4715_v37 = vld [vmem:[#allocation11 + $0xc80] sm:$0xff]  ;;  %v9652_v6 = vcombine.high %v4587_v3, %v4591_v36 }
 0x34c   :  { %v4070_v17 = vadd.f32 %v4069_v26, %v4027_v12  ;;  %v4112_v30 = vpop.f32.mrf.mxu1  ;;  %7560 = vmatprep.subr.bf16.mxu1 %v9812_v51  ;;  %v4719_v42 = vld [vmem:[#allocation11 + $0xca0] sm:$0xff]  ;;  %v9787_v51 = vcombine.low %v4723_v13, %v4727_v0  ;;  %v9565_v26 = vcombine.low %v10668_v8, %v10670_v9 }
 0x34d   :  { %v10662_v10 = vpop.f32.mrf.mxu0  ;;  %v4579_v12 = vld [vmem:[#allocation11 + $0x840] sm:$0xff]  ;;  %v9779_v25 = vcombine.low %v4715_v37, %v4719_v42 }
 0x34e   :  { %v10664_v19 = vpop.f32.mrf.mxu1  ;;  %7518 = vmatpush1.bf16.msra.mxu0 %v9683_v22  ;;  %v4113_v52 = vadd.f32 %v4112_v30, %v4070_v17  ;;  %v9780_v22 = vcombine.high %v4715_v37, %v4719_v42  ;;  %v9651_v17 = vcombine.low %v4587_v3, %v4591_v36  ;;  %v9644_v30 = vcombine.high %v4579_v12, %v4583_v55  ;;  %v4683_v0 = vld [vmem:[#allocation11 + $0xb80] sm:$0xff] }
 0x34f   :  { %v4073_v39 = vpop.f32.mrf.mxu0  ;;  %7519 = vmatprep.subr.bf16.mxu0 %v9676_v16  ;;  %7561 = vmatpush1.bf16.msra.mxu1 %v9811_v31  ;;  %v4707_v16 = vld [vmem:[#allocation11 + $0xc40] sm:$0xff]  ;;  %v9883_v3 = vcombine.low %v4819_v57, %v4823_v41 }
 0x350   :  { %v4074_v49 = vadd.f32 %v4073_v39, %v4031_v35  ;;  %7562 = vmatprep.subr.bf16.mxu1 %v9804_v28  ;;  %v4116_v33 = vpop.f32.mrf.mxu1  ;;  %v4296_v2 = vmax.f32 %v4113_v52, 0.0  ;;  %v4711_v31 = vld [vmem:[#allocation11 + $0xc60] sm:$0xff] }
 0x351   :  { %v4575_v28 = vld [vmem:[#allocation11 + $0x820] sm:$0xff]  ;;  %v9772_v44 = vcombine.high %v4707_v16, %v4711_v31 }
 0x352   :  { %v4117_v23 = vadd.f32 %v4116_v33, %v4074_v49  ;;  %7520 = vmatpush1.bf16.msra.mxu0 %v9675_v43  ;;  %v4703_v35 = vld [vmem:[#allocation11 + $0xc20] sm:$0xff]  ;;  %v9643_v43 = vcombine.low %v4579_v12, %v4583_v55  ;;  %v9636_v39 = vcombine.high %v4571_v11, %v4575_v28 }
 0x353   :  { %7521 = vmatprep.subr.bf16.mxu0 %v9668_v54  ;;  %7563 = vmatpush1.bf16.msra.mxu1 %v9803_v56  ;;  %v9771_v54 = vcombine.low %v4707_v16, %v4711_v31  ;;  %v4691_v56 = vld [vmem:[#allocation11 + $0xbc0] sm:$0xff]  ;;  %v9764_v49 = vcombine.high %v4699_v20, %v4703_v35  ;;  %v9763_v13 = vcombine.low %v4699_v20, %v4703_v35 }
 0x354   :  { %v4304_v53 = vmax.f32 %v4117_v23, 0.0  ;;  %7564 = vmatprep.subr.bf16.mxu1 %v9796_v60  ;;  %v4695_v52 = vld [vmem:[#allocation11 + $0xbe0] sm:$0xff]  ;;  %v9635_v60 = vcombine.low %v4571_v11, %v4575_v28 }
 0x355   :  { %v9756_v33 = vcombine.high %v4691_v56, %v4695_v52  ;;  %v4687_v23 = vld [vmem:[#allocation11 + $0xba0] sm:$0xff] }
 0x356   :  { %v10666_v32 = vpack.c.bf16 %v4304_v53, %v4296_v2  ;;  %7522 = vmatpush1.bf16.msra.mxu0 %v9667_v1  ;;  %v9884_v1 = vcombine.high %v4819_v57, %v4823_v41  ;;  %v9755_v2 = vcombine.low %v4691_v56, %v4695_v52  ;;  %v9748_v53 = vcombine.high %v4683_v0, %v4687_v23  ;;  %v4675_v36 = vld [vmem:[#allocation11 + $0xb40] sm:$0xff] }
 0x357   :  { %7523 = vmatprep.subr.bf16.mxu0 %v9660_v5  ;;  %7565 = vmatpush1.bf16.msra.mxu1 %v9795_v21  ;;  %v4811_v5 = vld [vmem:[#allocation11 + $0xf80] sm:$0xff] }
 0x358   :  { %7547 = vmatprep.mubr.bf16.mxu0 %v10666_v32  ;;  %7566 = vmatprep.subr.bf16.mxu1 %v9788_v40  ;;  %v4815_v21 = vld [vmem:[#allocation11 + $0xfa0] sm:$0xff] }
 0x359   :  { %v4679_v40 = vld [vmem:[#allocation11 + $0xb60] sm:$0xff]  ;;  %v9876_v37 = vcombine.high %v4811_v5, %v4815_v21  ;;  %v9875_v12 = vcombine.low %v4811_v5, %v4815_v21 }
 0x35a   :  { %7524 = vmatpush1.bf16.msra.mxu0 %v9659_v4  ;;  %v4803_v42 = vld [vmem:[#allocation11 + $0xf40] sm:$0xff] }
 0x35b   :  { %7525 = vmatprep.subr.bf16.mxu0 %v9652_v6  ;;  %7567 = vmatpush1.bf16.msra.mxu1 %v9787_v51  ;;  %v4807_v4 = vld [vmem:[#allocation11 + $0xf60] sm:$0xff]  ;;  %v9747_v6 = vcombine.low %v4683_v0, %v4687_v23  ;;  %v9740_v51 = vcombine.high %v4675_v36, %v4679_v40 }
 0x35c   :  { %7568 = vmatprep.subr.bf16.mxu1 %v9780_v22  ;;  %v4667_v55 = vld [vmem:[#allocation11 + $0xb00] sm:$0xff]  ;;  %v9868_v16 = vcombine.high %v4803_v42, %v4807_v4  ;;  %v9867_v11 = vcombine.low %v4803_v42, %v4807_v4 }
 0x35d   :  { %v4671_v22 = vld [vmem:[#allocation11 + $0xb20] sm:$0xff] }
 0x35e   :  { %7526 = vmatpush1.bf16.msra.mxu0 %v9651_v17  ;;  %v4795_v31 = vld [vmem:[#allocation11 + $0xf00] sm:$0xff] }
 0x35f   :  { %7527 = vmatprep.subr.bf16.mxu0 %v9644_v30  ;;  %7569 = vmatpush1.bf16.msra.mxu1 %v9779_v25  ;;  %v4799_v17 = vld [vmem:[#allocation11 + $0xf20] sm:$0xff]  ;;  %v9739_v30 = vcombine.low %v4675_v36, %v4679_v40  ;;  %v9732_v25 = vcombine.high %v4667_v55, %v4671_v22 }
 0x360   :  { %7570 = vmatprep.subr.bf16.mxu1 %v9772_v44  ;;  %v4659_v28 = vld [vmem:[#allocation11 + $0xac0] sm:$0xff]  ;;  %v9860_v20 = vcombine.high %v4795_v31, %v4799_v17  ;;  %v9859_v52 = vcombine.low %v4795_v31, %v4799_v17  ;;  %v4376_v17 = vld [vmem:[#allocation11 + $0x1e8] sm:$0xff] }
 0x361   :  { %v4663_v44 = vld [vmem:[#allocation11 + $0xae0] sm:$0xff] }
 0x362   :  { %7528 = vmatpush1.bf16.msra.mxu0 %v9643_v43  ;;  %v4787_v35 = vld [vmem:[#allocation11 + $0xec0] sm:$0xff]  ;;  %v9724_v56 = vcombine.high %v4659_v28, %v4663_v44  ;;  %v9723_v0 = vcombine.low %v4659_v28, %v4663_v44 }
 0x363   :  { %7529 = vmatprep.subr.bf16.mxu0 %v9636_v39  ;;  %7571 = vmatpush1.bf16.msra.mxu1 %v9771_v54  ;;  %v4791_v43 = vld [vmem:[#allocation11 + $0xee0] sm:$0xff]  ;;  %v9731_v39 = vcombine.low %v4667_v55, %v4671_v22  ;;  %v1022_v54 = vrot.slane %v10618_v38, %v10527_v58 }
 0x364   :  { %7572 = vmatprep.subr.bf16.mxu1 %v9764_v49  ;;  %v4651_v49 = vld [vmem:[#allocation11 + $0xa80] sm:$0xff]  ;;  %v9852_v41 = vcombine.high %v4787_v35, %v4791_v43  ;;  %v9851_v21 = vcombine.low %v4787_v35, %v4791_v43  ;;  %v4368_v35 = vld [vmem:[#allocation11 + $0x1a8] sm:$0xff] }
 0x365   :  { %v4655_v57 = vld [vmem:[#allocation11 + $0xaa0] sm:$0xff]  ;;  %v3982_v23 = vadd.f32 %v10646_v24, %v1022_v54 }
 0x366   :  { %7530 = vmatpush1.bf16.msra.mxu0 %v9635_v60  ;;  %v3986_v60 = vadd.f32 %v10652_v62, %v1022_v54  ;;  %v4643_v5 = vld [vmem:[#allocation11 + $0xa40] sm:$0xff]  ;;  %v9715_v62 = vcombine.low %v4651_v49, %v4655_v57 }
 0x367   :  { %7531 = vmatprep.subr.bf16.mxu0 %v9756_v33  ;;  %7573 = vmatpush1.bf16.msra.mxu1 %v9763_v13  ;;  %v4779_v33 = vld [vmem:[#allocation11 + $0xe80] sm:$0xff] }
 0x368   :  { %7574 = vmatprep.subr.bf16.mxu1 %v9884_v1  ;;  %v4783_v13 = vld [vmem:[#allocation11 + $0xea0] sm:$0xff]  ;;  %v9716_v1 = vcombine.high %v4651_v49, %v4655_v57 }
 0x369   :  { %v4647_v38 = vld [vmem:[#allocation11 + $0xa60] sm:$0xff]  ;;  %v9843_v24 = vcombine.low %v4779_v33, %v4783_v13 }
 0x36a   :  { %7532 = vmatpush2.bf16.msra.mxu0 %v9755_v2  ;;  %v9844_v2 = vcombine.high %v4779_v33, %v4783_v13  ;;  %v4775_v36 = vld [vmem:[#allocation11 + $0xe60] sm:$0xff]  ;;  %v9708_v40 = vcombine.high %v4643_v5, %v4647_v38  ;;  %v9707_v22 = vcombine.low %v4643_v5, %v4647_v38  ;;  %v4332_v38 = vld [vmem:[#allocation11 + $0x88] sm:$0xff] }
 0x36b   :  { %7533 = vmatprep.subr.bf16.mxu0 %v9748_v53  ;;  %7575 = vmatpush2.bf16.msra.mxu1 %v9883_v3  ;;  %v4029_v53 = vadd.f32 %v10654_v34, %v3986_v60  ;;  %v4771_v3 = vld [vmem:[#allocation11 + $0xe40] sm:$0xff]  ;;  %v4352_v60 = vld [vmem:[#allocation11 + $0x128] sm:$0xff] }
 0x36c   :  { %7576 = vmatprep.subr.bf16.mxu1 %v9876_v37  ;;  %v4025_v37 = vadd.f32 %v10648_v27, %v3982_v23  ;;  %v4635_v4 = vld [vmem:[#allocation11 + $0xa00] sm:$0xff]  ;;  %v9835_v27 = vcombine.low %v4771_v3, %v4775_v36  ;;  %v4344_v23 = vld [vmem:[#allocation11 + $0xe8] sm:$0xff] }
 0x36d   :  { %v4072_v42 = vadd.f32 %v10662_v10, %v4029_v53  ;;  %v4763_v55 = vld [vmem:[#allocation11 + $0xe00] sm:$0xff]  ;;  %v4372_v10 = vld [vmem:[#allocation11 + $0x1c8] sm:$0xff] }
 0x36e   :  { %7534 = vmatpush2.bf16.msra.mxu0 %v9747_v6  ;;  %v4639_v6 = vld [vmem:[#allocation11 + $0xa20] sm:$0xff] }
 0x36f   :  { %7535 = vmatprep.subr.bf16.mxu0 %v9740_v51  ;;  %7577 = vmatpush2.bf16.msra.mxu1 %v9875_v12  ;;  %v9836_v51 = vcombine.high %v4771_v3, %v4775_v36  ;;  %v4068_v12 = vadd.f32 %v10656_v7, %v4025_v37  ;;  %v4767_v34 = vld [vmem:[#allocation11 + $0xe20] sm:$0xff]  ;;  %v9700_v31 = vcombine.high %v4635_v4, %v4639_v6  ;;  %v4324_v3 = vld [vmem:[#allocation11 + $0x48] sm:$0xff] }
 0x370   :  { %7578 = vmatprep.subr.bf16.mxu1 %v9868_v16  ;;  %v4115_v16 = vadd.f32 %v10664_v19, %v4072_v42  ;;  %v9438_v7 = vcombine.high %v4372_v10, %v4376_v17  ;;  %v9827_v44 = vcombine.low %v4763_v55, %v4767_v34  ;;  %v9566_v19 = vcombine.high %v10668_v8, %v10670_v9  ;;  %v4328_v36 = vld [vmem:[#allocation11 + $0x68] sm:$0xff] }
 0x371   :  { %v4316_v37 = vld [vmem:[#allocation11 + $0x8] sm:$0xff] }
 0x372   :  { %7536 = vmatpush2.bf16.msra.mxu0 %v9739_v30  ;;  %v9828_v30 = vcombine.high %v4763_v55, %v4767_v34  ;;  %v4303_v28 = vmax.f32 %v4115_v16, 0.0  ;;  %v4320_v42 = vld [vmem:[#allocation11 + $0x28] sm:$0xff] }
 0x373   :  { %7537 = vmatprep.subr.bf16.mxu0 %v9732_v25  ;;  %7579 = vmatpush2.bf16.msra.mxu1 %v9867_v11  ;;  %v4111_v25 = vadd.f32 %v10659_v14, %v4068_v12  ;;  %v9699_v11 = vcombine.low %v4635_v4, %v4639_v6  ;;  %v9382_v4 = vcombine.high %v4316_v37, %v4320_v42  ;;  %v4436_v6 = vld [vmem:[#allocation11 + $0x3c8] sm:$0xff] }
 0x374   :  { %7580 = vmatprep.subr.bf16.mxu1 %v9860_v20  ;;  %v4364_v20 = vld [vmem:[#allocation11 + $0x188] sm:$0xff]  ;;  %v9381_v12 = vcombine.low %v4316_v37, %v4320_v42 }
 0x375   :  { %v4295_v43 = vmax.f32 %v4111_v25, 0.0  ;;  %v9430_v14 = vcombine.high %v4364_v20, %v4368_v35  ;;  %v9429_v49 = vcombine.low %v4364_v20, %v4368_v35  ;;  %v4428_v34 = vld [vmem:[#allocation11 + $0x388] sm:$0xff] }
 0x376   :  { %7538 = vmatpush2.bf16.msra.mxu0 %v9731_v39  ;;  %v9437_v39 = vcombine.low %v4372_v10, %v4376_v17  ;;  %v4424_v10 = vld [vmem:[#allocation11 + $0x368] sm:$0xff] }
 0x377   :  { %7539 = vmatprep.subr.bf16.mxu0 %v9724_v56  ;;  %7581 = vmatpush2.bf16.msra.mxu1 %v9859_v52  ;;  %v10687_v54 = vpack.c.bf16 %v4303_v28, %v4295_v43  ;;  %v4356_v56 = vld [vmem:[#allocation11 + $0x148] sm:$0xff] }
 0x378   :  { %7582 = vmatprep.subr.bf16.mxu1 %v9852_v41  ;;  %v4360_v52 = vld [vmem:[#allocation11 + $0x168] sm:$0xff] }
 0x379   :  { %v9422_v57 = vcombine.high %v4356_v56, %v4360_v52  ;;  %v4348_v41 = vld [vmem:[#allocation11 + $0x108] sm:$0xff]  ;;  %v9421_v33 = vcombine.low %v4356_v56, %v4360_v52 }
 0x37a   :  { %7540 = vmatpush2.bf16.msra.mxu0 %v9723_v0  ;;  %v9414_v13 = vcombine.high %v4348_v41, %v4352_v60  ;;  %v4340_v0 = vld [vmem:[#allocation11 + $0xc8] sm:$0xff] }
 0x37b   :  { %7541 = vmatprep.subr.bf16.mxu0 %v9716_v1  ;;  %7583 = vmatpush2.bf16.msra.mxu1 %v9851_v21  ;;  %v9413_v1 = vcombine.low %v4348_v41, %v4352_v60  ;;  %v9406_v5 = vcombine.high %v4340_v0, %v4344_v23  ;;  %v4336_v21 = vld [vmem:[#allocation11 + $0xa8] sm:$0xff] }
 0x37c   :  { %7584 = vmatprep.subr.bf16.mxu1 %v9844_v2  ;;  %v9405_v2 = vcombine.low %v4340_v0, %v4344_v23  ;;  %v9398_v53 = vcombine.high %v4332_v38, %v4336_v21  ;;  %v4412_v25 = vld [vmem:[#allocation11 + $0x308] sm:$0xff] }
 0x37d   :  { %v4408_v20 = vld [vmem:[#allocation11 + $0x2e8] sm:$0xff] }
 0x37e   :  { %7542 = vmatpush2.bf16.msra.mxu0 %v9715_v62  ;;  %v9397_v62 = vcombine.low %v4332_v38, %v4336_v21  ;;  %v4396_v43 = vld [vmem:[#allocation11 + $0x288] sm:$0xff] }
 0x37f   :  { %7543 = vmatprep.subr.bf16.mxu0 %v9708_v40  ;;  %7585 = vmatpush2.bf16.msra.mxu1 %v9843_v24  ;;  %v9390_v40 = vcombine.high %v4324_v3, %v4328_v36  ;;  %v9389_v24 = vcombine.low %v4324_v3, %v4328_v36  ;;  %v4388_v52 = vld [vmem:[#allocation11 + $0x248] sm:$0xff] }
 0x380   :  { %7586 = vmatprep.subr.bf16.mxu1 %v9836_v51  ;;  %v4440_v51 = vld [vmem:[#allocation11 + $0x3e8] sm:$0xff] }
 0x381   :  { %v9502_v55 = vcombine.high %v4436_v6, %v4440_v51  ;;  %v9501_v16 = vcombine.low %v4436_v6, %v4440_v51  ;;  %v4384_v0 = vld [vmem:[#allocation11 + $0x228] sm:$0xff] }
 0x382   :  { %7544 = vmatpush2.bf16.msra.mxu0 %v9707_v22  ;;  %v4432_v22 = vld [vmem:[#allocation11 + $0x3a8] sm:$0xff] }
 0x383   :  { %7545 = vmatprep.subr.bf16.mxu0 %v9700_v31  ;;  %7587 = vmatpush2.bf16.msra.mxu1 %v9835_v27  ;;  %v9494_v31 = vcombine.high %v4428_v34, %v4432_v22  ;;  %v4420_v27 = vld [vmem:[#allocation11 + $0x348] sm:$0xff]  ;;  %v9493_v17 = vcombine.low %v4428_v34, %v4432_v22 }
 0x384   :  { %7588 = vmatprep.subr.bf16.mxu1 %v9828_v30  ;;  %v9486_v30 = vcombine.high %v4420_v27, %v4424_v10  ;;  %v9485_v28 = vcombine.low %v4420_v27, %v4424_v10  ;;  %v4628_v21 = vld [vmem:[#allocation11 + $0x9c8] sm:$0xff] }
 0x385   :  { %v4616_v27 = vld [vmem:[#allocation11 + $0x968] sm:$0xff] }
 0x386   :  { %7546 = vmatpush2.bf16.msra.mxu0 %v9699_v11  ;;  %v4416_v11 = vld [vmem:[#allocation11 + $0x328] sm:$0xff] }
 0x387   :  { %7601 = vmatprep.subr.bf16.mxu0 %v9438_v7  ;;  %7589 = vmatpush2.bf16.msra.mxu1 %v9827_v44  ;;  %v9478_v7 = vcombine.high %v4412_v25, %v4416_v11  ;;  %v4404_v44 = vld [vmem:[#allocation11 + $0x2c8] sm:$0xff]  ;;  %v9477_v35 = vcombine.low %v4412_v25, %v4416_v11 }
 0x388   :  { %7644 = vmatprep.subr.bf16.mxu1 %v9566_v19  ;;  %v9470_v19 = vcombine.high %v4404_v44, %v4408_v20 }
 0x389   :  { %7548 = vmatmul.mubr.bf16.vlgmr.msra.gmra.mxu0 %v10687_v54  ;;  %v4153_v41 = vpop.f32.mrf.mxu0 }
 0x38a   :  { %7602 = vmatpush1.bf16.msra.mxu0 %v9437_v39  ;;  %7633 = vmatprep.mubr.bf16.mxu0 %v10638_v29  ;;  %v4400_v39 = vld [vmem:[#allocation11 + $0x2a8] sm:$0xff] }
 0x38b   :  { %7603 = vmatprep.subr.bf16.mxu0 %v9430_v14  ;;  %v9469_v14 = vcombine.low %v4404_v44, %v4408_v20  ;;  %v9462_v56 = vcombine.high %v4396_v43, %v4400_v39 }
 0x38e   :  { %7604 = vmatpush1.bf16.msra.mxu0 %v9429_v49  ;;  %v4392_v49 = vld [vmem:[#allocation11 + $0x268] sm:$0xff] }
 0x38f   :  { %7605 = vmatprep.subr.bf16.mxu0 %v9422_v57  ;;  %v9461_v57 = vcombine.low %v4396_v43, %v4400_v39  ;;  %v9454_v60 = vcombine.high %v4388_v52, %v4392_v49  ;;  %v9453_v23 = vcombine.low %v4388_v52, %v4392_v49  ;;  %v4604_v43 = vld [vmem:[#allocation11 + $0x908] sm:$0xff] }
 0x390   :  { %v4608_v39 = vld [vmem:[#allocation11 + $0x928] sm:$0xff] }
 0x392   :  { %7606 = vmatpush1.bf16.msra.mxu0 %v9421_v33  ;;  %v4196_v33 = vpop.f32.mrf.mxu1 }
 0x393   :  { %7607 = vmatprep.subr.bf16.mxu0 %v9414_v13  ;;  %v4380_v13 = vld [vmem:[#allocation11 + $0x208] sm:$0xff] }
 0x394   :  { %v4198_v38 = vpop.f32.mrf.mxu1  ;;  %v9445_v36 = vcombine.low %v4380_v13, %v4384_v0 }
 0x396   :  { %7608 = vmatpush1.bf16.msra.mxu0 %v9413_v1  ;;  %v4155_v1 = vpop.f32.mrf.mxu0  ;;  %v4200_v42 = vpop.f32.mrf.mxu1 }
 0x397   :  { %7609 = vmatprep.subr.bf16.mxu0 %v9406_v5  ;;  %v9446_v5 = vcombine.high %v4380_v13, %v4384_v0  ;;  %v9670_v13 = vcombine.high %v4604_v43, %v4608_v39 }
 0x39a   :  { %7610 = vmatpush1.bf16.msra.mxu0 %v9405_v2  ;;  %v4632_v2 = vld [vmem:[#allocation11 + $0x9e8] sm:$0xff] }
 0x39b   :  { %7611 = vmatprep.subr.bf16.mxu0 %v9398_v53  ;;  %v10126_v53 = vld [vmem:[#allocation10] sm:$0xff]  ;;  %v9694_v37 = vcombine.high %v4628_v21, %v4632_v2  ;;  %v9693_v51 = vcombine.low %v4628_v21, %v4632_v2 }
 0x39c   :  { %v1034_v3 = vrot.slane %v10126_v53, %v10488_v61 }
 0x39e   :  { %7612 = vmatpush1.bf16.msra.mxu0 %v9397_v62  ;;  %v1030_v62 = vrot.slane %v10126_v53, %v10530_v63  ;;  %v4156_v6 = vadd.f32 %v4155_v1, %v1034_v3  ;;  %v4596_v1 = vld [vmem:[#allocation11 + $0x8c8] sm:$0xff]  ;;  %v9669_v53 = vcombine.low %v4604_v43, %v4608_v39 }
 0x39f   :  { %7613 = vmatprep.subr.bf16.mxu0 %v9390_v40  ;;  %v4157_v40 = vpop.f32.mrf.mxu0  ;;  %v4472_v43 = vld [vmem:[#allocation11 + $0x4e8] sm:$0xff] }
 0x3a0   :  { %v4158_v22 = vadd.f32 %v4157_v40, %v1030_v62  ;;  %v4692_v39 = vld [vmem:[#allocation11 + $0xbc8] sm:$0xff] }
 0x3a2   :  { %7614 = vmatpush1.bf16.msra.mxu0 %v9389_v24  ;;  %v4620_v24 = vld [vmem:[#allocation11 + $0x988] sm:$0xff]  ;;  %v4201_v20 = vadd.f32 %v4200_v42, %v4158_v22 }
 0x3a3   :  { %7615 = vmatprep.subr.bf16.mxu0 %v9382_v4  ;;  %v4624_v4 = vld [vmem:[#allocation11 + $0x9a8] sm:$0xff] }
 0x3a4   :  { %v9686_v34 = vcombine.high %v4620_v24, %v4624_v4  ;;  %v9685_v11 = vcombine.low %v4620_v24, %v4624_v4  ;;  %v4496_v42 = vld [vmem:[#allocation11 + $0x5a8] sm:$0xff] }
 0x3a5   :  { %v4588_v4 = vld [vmem:[#allocation11 + $0x888] sm:$0xff] }
 0x3a6   :  { %7616 = vmatpush1.bf16.msra.mxu0 %v9381_v12  ;;  %v4154_v12 = vadd.f32 %v4153_v41, %v1030_v62 }
 0x3a7   :  { %7617 = vmatprep.subr.bf16.mxu0 %v9502_v55  ;;  %v4159_v55 = vpop.f32.mrf.mxu0 }
 0x3aa   :  { %7618 = vmatpush2.bf16.msra.mxu0 %v9501_v16  ;;  %v4202_v16 = vpop.f32.mrf.mxu1 }
 0x3ab   :  { %7619 = vmatprep.subr.bf16.mxu0 %v9494_v31  ;;  %v4612_v31 = vld [vmem:[#allocation11 + $0x948] sm:$0xff] }
 0x3ac   :  { %v9678_v44 = vcombine.high %v4612_v31, %v4616_v27  ;;  %v9677_v41 = vcombine.low %v4612_v31, %v4616_v27  ;;  %v4488_v31 = vld [vmem:[#allocation11 + $0x568] sm:$0xff] }
 0x3ad   :  { %v4580_v27 = vld [vmem:[#allocation11 + $0x848] sm:$0xff] }
 0x3ae   :  { %7620 = vmatpush2.bf16.msra.mxu0 %v9493_v17  ;;  %v4199_v17 = vadd.f32 %v4198_v38, %v4156_v6  ;;  %v4592_v6 = vld [vmem:[#allocation11 + $0x8a8] sm:$0xff] }
 0x3af   :  { %7621 = vmatprep.subr.bf16.mxu0 %v9486_v30  ;;  %v4160_v30 = vadd.f32 %v4159_v55, %v1034_v3  ;;  %v9654_v22 = vcombine.high %v4588_v4, %v4592_v6 }
 0x3b1   :  { %v4203_v52 = vadd.f32 %v4202_v16, %v4160_v30  ;;  %v4484_v16 = vld [vmem:[#allocation11 + $0x548] sm:$0xff]  ;;  %v9653_v30 = vcombine.low %v4588_v4, %v4592_v6 }
 0x3b2   :  { %7622 = vmatpush2.bf16.msra.mxu0 %v9485_v28  ;;  %v4197_v28 = vadd.f32 %v4196_v33, %v4154_v12  ;;  %v4672_v4 = vld [vmem:[#allocation11 + $0xb28] sm:$0xff] }
 0x3b3   :  { %7623 = vmatprep.subr.bf16.mxu0 %v9478_v7 }
 0x3b6   :  { %7624 = vmatpush2.bf16.msra.mxu0 %v9477_v35 }
 0x3b7   :  { %7625 = vmatprep.subr.bf16.mxu0 %v9470_v19 }
 0x3ba   :  { %7626 = vmatpush2.bf16.msra.mxu0 %v9469_v14 }
 0x3bb   :  { %7627 = vmatprep.subr.bf16.mxu0 %v9462_v56 }
 0x3be   :  { %7628 = vmatpush2.bf16.msra.mxu0 %v9461_v57 }
 0x3bf   :  { %7629 = vmatprep.subr.bf16.mxu0 %v9454_v60 }
 0x3c2   :  { %7630 = vmatpush2.bf16.msra.mxu0 %v9453_v23 }
 0x3c3   :  { %7631 = vmatprep.subr.bf16.mxu0 %v9446_v5  ;;  %v4600_v5 = vld [vmem:[#allocation11 + $0x8e8] sm:$0xff] }
 0x3c4   :  { %v9661_v55 = vcombine.low %v4596_v1, %v4600_v5 }
 0x3c6   :  { %7632 = vmatpush2.bf16.msra.mxu0 %v9445_v36  ;;  %v9662_v36 = vcombine.high %v4596_v1, %v4600_v5 }
 0x3c7   :  { %7687 = vmatprep.subr.bf16.mxu0 %v9694_v37  ;;  %v4492_v37 = vld [vmem:[#allocation11 + $0x588] sm:$0xff] }
 0x3c9   :  { %v4239_v10 = vpop.f32.mrf.mxu0  ;;  %7634 = vmatmul.mubr.bf16.vlgmr.msra.gmra.mxu0 %v10582_v45 }
 0x3ca   :  { %v4282_v25 = vpop.f32.mrf.mxu1  ;;  %7688 = vmatpush1.bf16.msra.mxu0 %v9693_v51  ;;  %7719 = vmatprep.mubr.bf16.mxu0 %v10666_v32  ;;  %v4240_v14 = vadd.f32 %v4239_v10, %v4197_v28  ;;  %v4584_v10 = vld [vmem:[#allocation11 + $0x868] sm:$0xff] }
 0x3cb   :  { %v4241_v7 = vpop.f32.mrf.mxu0  ;;  %7689 = vmatprep.subr.bf16.mxu0 %v9686_v34  ;;  %v9558_v34 = vcombine.high %v4492_v37, %v4496_v42  ;;  %v4476_v28 = vld [vmem:[#allocation11 + $0x508] sm:$0xff] }
 0x3cc   :  { %v4242_v35 = vadd.f32 %v4241_v7, %v4199_v17  ;;  %v4284_v19 = vpop.f32.mrf.mxu1  ;;  %v4283_v38 = vadd.f32 %v4282_v25, %v4240_v14  ;;  %v9557_v17 = vcombine.low %v4492_v37, %v4496_v42  ;;  %v9550_v25 = vcombine.high %v4484_v16, %v4488_v31  ;;  %v4480_v7 = vld [vmem:[#allocation11 + $0x528] sm:$0xff] }
 0x3cd   :  { %v4243_v56 = vpop.f32.mrf.mxu0  ;;  %v9542_v8 = vcombine.high %v4476_v28, %v4480_v7  ;;  %v4696_v14 = vld [vmem:[#allocation11 + $0xbe8] sm:$0xff] }
 0x3ce   :  { %v4244_v49 = vadd.f32 %v4243_v56, %v4201_v20  ;;  %v4286_v57 = vpop.f32.mrf.mxu1  ;;  %7690 = vmatpush1.bf16.msra.mxu0 %v9685_v11  ;;  %v4285_v0 = vadd.f32 %v4284_v19, %v4242_v35  ;;  %v4297_v24 = vmax.f32 %v4283_v38, 0.0  ;;  %v9646_v11 = vcombine.high %v4580_v27, %v4584_v10  ;;  %v4576_v20 = vld [vmem:[#allocation11 + $0x828] sm:$0xff] }
 0x3cf   :  { %v4245_v60 = vpop.f32.mrf.mxu0  ;;  %7691 = vmatprep.subr.bf16.mxu0 %v9678_v44  ;;  %v4572_v44 = vld [vmem:[#allocation11 + $0x808] sm:$0xff]  ;;  %v9549_v35 = vcombine.low %v4484_v16, %v4488_v31  ;;  %v9645_v19 = vcombine.low %v4580_v27, %v4584_v10  ;;  %v9541_v56 = vcombine.low %v4476_v28, %v4480_v7 }
 0x3d0   :  { %v4287_v33 = vadd.f32 %v4286_v57, %v4244_v49  ;;  %v4246_v23 = vadd.f32 %v4245_v60, %v4203_v52  ;;  %v4288_v21 = vpop.f32.mrf.mxu1  ;;  %v4298_v62 = vmax.f32 %v4285_v0, 0.0  ;;  %v9638_v9 = vcombine.high %v4572_v44, %v4576_v20  ;;  %v4464_v60 = vld [vmem:[#allocation11 + $0x4a8] sm:$0xff] }
 0x3d1   :  { %v9637_v52 = vcombine.low %v4572_v44, %v4576_v20  ;;  %v9758_v57 = vcombine.high %v4692_v39, %v4696_v14  ;;  %v4688_v0 = vld [vmem:[#allocation11 + $0xba8] sm:$0xff] }
 0x3d2   :  { %v4289_v2 = vadd.f32 %v4288_v21, %v4246_v23  ;;  %7692 = vmatpush1.bf16.msra.mxu0 %v9677_v41  ;;  %v4305_v3 = vmax.f32 %v4287_v33, 0.0  ;;  %v4460_v41 = vld [vmem:[#allocation11 + $0x488] sm:$0xff]  ;;  %v9757_v23 = vcombine.low %v4692_v39, %v4696_v14 }
 0x3d3   :  { %7693 = vmatprep.subr.bf16.mxu0 %v9670_v13  ;;  %v4684_v13 = vld [vmem:[#allocation11 + $0xb88] sm:$0xff]  ;;  %v9526_v1 = vcombine.high %v4460_v41, %v4464_v60 }
 0x3d4   :  { %v4306_v40 = vmax.f32 %v4289_v2, 0.0  ;;  %v10697_v12 = vpack.c.bf16 %v4305_v3, %v4297_v24  ;;  %v9750_v5 = vcombine.high %v4684_v13, %v4688_v0  ;;  %v4452_v38 = vld [vmem:[#allocation11 + $0x448] sm:$0xff]  ;;  %v9525_v3 = vcombine.low %v4460_v41, %v4464_v60 }
 0x3d5   :  { %v4456_v21 = vld [vmem:[#allocation11 + $0x468] sm:$0xff] }
 0x3d6   :  { %v10695_v51 = vpack.c.bf16 %v4306_v40, %v4298_v62  ;;  %7694 = vmatpush1.bf16.msra.mxu0 %v9669_v53  ;;  %v4676_v2 = vld [vmem:[#allocation11 + $0xb48] sm:$0xff]  ;;  %v9518_v62 = vcombine.high %v4452_v38, %v4456_v21  ;;  %v9517_v6 = vcombine.low %v4452_v38, %v4456_v21 }
 0x3d7   :  { %7695 = vmatprep.subr.bf16.mxu0 %v9662_v36  ;;  %v4680_v53 = vld [vmem:[#allocation11 + $0xb68] sm:$0xff]  ;;  %v9749_v36 = vcombine.low %v4684_v13, %v4688_v0 }
 0x3d8   :  { %7590 = vmatprep.mubr.bf16.mxu1 %v10695_v51  ;;  %v9742_v40 = vcombine.high %v4676_v2, %v4680_v53  ;;  %v4444_v37 = vld [vmem:[#allocation11 + $0x408] sm:$0xff] }
 0x3d9   :  { %7591 = vmatmul.mubr.bf16.vlgmr.msra.gmra.mxu1 %v10697_v12  ;;  %v4448_v42 = vld [vmem:[#allocation11 + $0x428] sm:$0xff] }
 0x3da   :  { %7645 = vmatpush1.bf16.msra.mxu1 %v9565_v26  ;;  %7676 = vmatprep.mubr.bf16.mxu1 %v10641_v18  ;;  %v4468_v26 = vld [vmem:[#allocation11 + $0x4c8] sm:$0xff] }
 0x3db   :  { %7696 = vmatpush1.bf16.msra.mxu0 %v9661_v55  ;;  %7646 = vmatprep.subr.bf16.mxu1 %v9558_v34  ;;  %v9534_v49 = vcombine.high %v4468_v26, %v4472_v43  ;;  %v9533_v33 = vcombine.low %v4468_v26, %v4472_v43  ;;  %v4668_v24 = vld [vmem:[#allocation11 + $0xb08] sm:$0xff]  ;;  %v9741_v55 = vcombine.low %v4676_v2, %v4680_v53  ;;  %v4373_v2 = vld [vmem:[#allocation11 + $0x1d0] sm:$0xff] }
 0x3dc   :  { %7697 = vmatprep.subr.bf16.mxu0 %v9654_v22  ;;  %v9510_v34 = vcombine.high %v4444_v37, %v4448_v42  ;;  %v9734_v22 = vcombine.high %v4668_v24, %v4672_v4  ;;  %v4564_v16 = vld [vmem:[#allocation11 + $0x7c8] sm:$0xff]  ;;  %v4377_v53 = vld [vmem:[#allocation11 + $0x1f0] sm:$0xff] }
 0x3dd   :  { %v4568_v31 = vld [vmem:[#allocation11 + $0x7e8] sm:$0xff] }
 0x3de   :  { %7647 = vmatpush1.bf16.msra.mxu1 %v9557_v17  ;;  %v4660_v27 = vld [vmem:[#allocation11 + $0xac8] sm:$0xff]  ;;  %v9509_v17 = vcombine.low %v4444_v37, %v4448_v42 }
 0x3df   :  { %7698 = vmatpush1.bf16.msra.mxu0 %v9653_v30  ;;  %7648 = vmatprep.subr.bf16.mxu1 %v9550_v25  ;;  %v4664_v10 = vld [vmem:[#allocation11 + $0xae8] sm:$0xff]  ;;  %v9733_v30 = vcombine.low %v4668_v24, %v4672_v4  ;;  %v9630_v25 = vcombine.high %v4564_v16, %v4568_v31  ;;  %v4365_v24 = vld [vmem:[#allocation11 + $0x190] sm:$0xff] }
 0x3e0   :  { %7699 = vmatprep.subr.bf16.mxu0 %v9646_v11  ;;  %v9726_v11 = vcombine.high %v4660_v27, %v4664_v10  ;;  %v4556_v28 = vld [vmem:[#allocation11 + $0x788] sm:$0xff]  ;;  %v4369_v4 = vld [vmem:[#allocation11 + $0x1b0] sm:$0xff] }
 0x3e1   :  { %v4560_v7 = vld [vmem:[#allocation11 + $0x7a8] sm:$0xff] }
 0x3e2   :  { %7649 = vmatpush1.bf16.msra.mxu1 %v9549_v35  ;;  %v4652_v44 = vld [vmem:[#allocation11 + $0xa88] sm:$0xff]  ;;  %v9629_v35 = vcombine.low %v4564_v16, %v4568_v31 }
 0x3e3   :  { %7700 = vmatpush1.bf16.msra.mxu0 %v9645_v19  ;;  %7650 = vmatprep.subr.bf16.mxu1 %v9542_v8  ;;  %v4656_v20 = vld [vmem:[#allocation11 + $0xaa8] sm:$0xff]  ;;  %v9725_v19 = vcombine.low %v4660_v27, %v4664_v10  ;;  %v9622_v8 = vcombine.high %v4556_v28, %v4560_v7  ;;  %v4357_v27 = vld [vmem:[#allocation11 + $0x150] sm:$0xff] }
 0x3e4   :  { %7701 = vmatprep.subr.bf16.mxu0 %v9638_v9  ;;  %v9718_v9 = vcombine.high %v4652_v44, %v4656_v20  ;;  %v4548_v26 = vld [vmem:[#allocation11 + $0x748] sm:$0xff]  ;;  %v4361_v10 = vld [vmem:[#allocation11 + $0x170] sm:$0xff] }
 0x3e5   :  { %v4552_v43 = vld [vmem:[#allocation11 + $0x768] sm:$0xff] }
 0x3e6   :  { %7651 = vmatpush1.bf16.msra.mxu1 %v9541_v56  ;;  %v4644_v39 = vld [vmem:[#allocation11 + $0xa48] sm:$0xff]  ;;  %v9621_v56 = vcombine.low %v4556_v28, %v4560_v7 }
 0x3e7   :  { %7702 = vmatpush1.bf16.msra.mxu0 %v9637_v52  ;;  %7652 = vmatprep.subr.bf16.mxu1 %v9534_v49  ;;  %v4648_v14 = vld [vmem:[#allocation11 + $0xa68] sm:$0xff]  ;;  %v9717_v52 = vcombine.low %v4652_v44, %v4656_v20  ;;  %v9614_v49 = vcombine.high %v4548_v26, %v4552_v43  ;;  %v4349_v44 = vld [vmem:[#allocation11 + $0x110] sm:$0xff] }
 0x3e8   :  { %7703 = vmatprep.subr.bf16.mxu0 %v9758_v57  ;;  %v9710_v57 = vcombine.high %v4644_v39, %v4648_v14  ;;  %v4540_v41 = vld [vmem:[#allocation11 + $0x708] sm:$0xff]  ;;  %v4353_v20 = vld [vmem:[#allocation11 + $0x130] sm:$0xff] }
 0x3e9   :  { %v4544_v60 = vld [vmem:[#allocation11 + $0x728] sm:$0xff] }
 0x3ea   :  { %7653 = vmatpush1.bf16.msra.mxu1 %v9533_v33  ;;  %v4636_v13 = vld [vmem:[#allocation11 + $0xa08] sm:$0xff]  ;;  %v9613_v33 = vcombine.low %v4548_v26, %v4552_v43 }
 0x3eb   :  { %7704 = vmatpush2.bf16.msra.mxu0 %v9757_v23  ;;  %7654 = vmatprep.subr.bf16.mxu1 %v9526_v1  ;;  %v4640_v0 = vld [vmem:[#allocation11 + $0xa28] sm:$0xff]  ;;  %v9709_v23 = vcombine.low %v4644_v39, %v4648_v14  ;;  %v9606_v1 = vcombine.high %v4540_v41, %v4544_v60  ;;  %v4341_v39 = vld [vmem:[#allocation11 + $0xd0] sm:$0xff] }
 0x3ec   :  { %7705 = vmatprep.subr.bf16.mxu0 %v9750_v5  ;;  %v9702_v5 = vcombine.high %v4636_v13, %v4640_v0  ;;  %v4532_v38 = vld [vmem:[#allocation11 + $0x6c8] sm:$0xff]  ;;  %v4345_v14 = vld [vmem:[#allocation11 + $0xf0] sm:$0xff] }
 0x3ed   :  { %v4536_v21 = vld [vmem:[#allocation11 + $0x6e8] sm:$0xff] }
 0x3ee   :  { %7655 = vmatpush1.bf16.msra.mxu1 %v9525_v3  ;;  %v9605_v3 = vcombine.low %v4540_v41, %v4544_v60  ;;  %v4524_v37 = vld [vmem:[#allocation11 + $0x688] sm:$0xff] }
 0x3ef   :  { %7706 = vmatpush2.bf16.msra.mxu0 %v9749_v36  ;;  %7656 = vmatprep.subr.bf16.mxu1 %v9518_v62  ;;  %v9701_v36 = vcombine.low %v4636_v13, %v4640_v0  ;;  %v9598_v62 = vcombine.high %v4532_v38, %v4536_v21  ;;  %v4528_v42 = vld [vmem:[#allocation11 + $0x6a8] sm:$0xff]  ;;  %v4333_v13 = vld [vmem:[#allocation11 + $0x90] sm:$0xff] }
 0x3f0   :  { %7707 = vmatprep.subr.bf16.mxu0 %v9742_v40  ;;  %v9440_v40 = vcombine.high %v4373_v2, %v4377_v53  ;;  %v4516_v16 = vld [vmem:[#allocation11 + $0x648] sm:$0xff]  ;;  %v4337_v0 = vld [vmem:[#allocation11 + $0xb0] sm:$0xff] }
 0x3f1   :  { %v4520_v31 = vld [vmem:[#allocation11 + $0x668] sm:$0xff] }
 0x3f2   :  { %7657 = vmatpush1.bf16.msra.mxu1 %v9517_v6  ;;  %v9597_v6 = vcombine.low %v4532_v38, %v4536_v21  ;;  %v4508_v28 = vld [vmem:[#allocation11 + $0x608] sm:$0xff] }
 0x3f3   :  { %7708 = vmatpush2.bf16.msra.mxu0 %v9741_v55  ;;  %7658 = vmatprep.subr.bf16.mxu1 %v9510_v34  ;;  %v9439_v55 = vcombine.low %v4373_v2, %v4377_v53  ;;  %v9590_v34 = vcombine.high %v4524_v37, %v4528_v42  ;;  %v4512_v7 = vld [vmem:[#allocation11 + $0x628] sm:$0xff]  ;;  %v4325_v2 = vld [vmem:[#allocation11 + $0x50] sm:$0xff] }
 0x3f4   :  { %7709 = vmatprep.subr.bf16.mxu0 %v9734_v22  ;;  %v9432_v22 = vcombine.high %v4365_v24, %v4369_v4  ;;  %v4756_v26 = vld [vmem:[#allocation11 + $0xdc8] sm:$0xff]  ;;  %v4329_v53 = vld [vmem:[#allocation11 + $0x70] sm:$0xff] }
 0x3f5   :  { %v4760_v43 = vld [vmem:[#allocation11 + $0xde8] sm:$0xff] }
 0x3f6   :  { %7659 = vmatpush1.bf16.msra.mxu1 %v9509_v17  ;;  %v9589_v17 = vcombine.low %v4524_v37, %v4528_v42  ;;  %v4748_v41 = vld [vmem:[#allocation11 + $0xd88] sm:$0xff] }
 0x3f7   :  { %7710 = vmatpush2.bf16.msra.mxu0 %v9733_v30  ;;  %7660 = vmatprep.subr.bf16.mxu1 %v9630_v25  ;;  %v9431_v30 = vcombine.low %v4365_v24, %v4369_v4  ;;  %v9582_v25 = vcombine.high %v4516_v16, %v4520_v31  ;;  %v4752_v60 = vld [vmem:[#allocation11 + $0xda8] sm:$0xff]  ;;  %v4317_v24 = vld [vmem:[#allocation11 + $0x10] sm:$0xff] }
 0x3f8   :  { %7711 = vmatprep.subr.bf16.mxu0 %v9726_v11  ;;  %v9424_v11 = vcombine.high %v4357_v27, %v4361_v10  ;;  %v4740_v38 = vld [vmem:[#allocation11 + $0xd48] sm:$0xff]  ;;  %v4321_v4 = vld [vmem:[#allocation11 + $0x30] sm:$0xff] }
 0x3f9   :  { %v4744_v21 = vld [vmem:[#allocation11 + $0xd68] sm:$0xff] }
 0x3fa   :  { %7661 = vmatpush2.bf16.msra.mxu1 %v9629_v35  ;;  %v9581_v35 = vcombine.low %v4516_v16, %v4520_v31  ;;  %v4732_v37 = vld [vmem:[#allocation11 + $0xd08] sm:$0xff] }
 0x3fb   :  { %7712 = vmatpush2.bf16.msra.mxu0 %v9725_v19  ;;  %7662 = vmatprep.subr.bf16.mxu1 %v9622_v8  ;;  %v9423_v19 = vcombine.low %v4357_v27, %v4361_v10  ;;  %v9574_v8 = vcombine.high %v4508_v28, %v4512_v7  ;;  %v4736_v42 = vld [vmem:[#allocation11 + $0xd28] sm:$0xff]  ;;  %v4437_v27 = vld [vmem:[#allocation11 + $0x3d0] sm:$0xff] }
 0x3fc   :  { %7713 = vmatprep.subr.bf16.mxu0 %v9718_v9  ;;  %v9416_v9 = vcombine.high %v4349_v44, %v4353_v20  ;;  %v4724_v16 = vld [vmem:[#allocation11 + $0xcc8] sm:$0xff]  ;;  %v4441_v10 = vld [vmem:[#allocation11 + $0x3f0] sm:$0xff] }
 0x3fd   :  { %v4728_v31 = vld [vmem:[#allocation11 + $0xce8] sm:$0xff] }
 0x3fe   :  { %7663 = vmatpush2.bf16.msra.mxu1 %v9621_v56  ;;  %v9573_v56 = vcombine.low %v4508_v28, %v4512_v7  ;;  %v4716_v28 = vld [vmem:[#allocation11 + $0xc88] sm:$0xff] }
 0x3ff   :  { %7714 = vmatpush2.bf16.msra.mxu0 %v9717_v52  ;;  %7664 = vmatprep.subr.bf16.mxu1 %v9614_v49  ;;  %v9415_v52 = vcombine.low %v4349_v44, %v4353_v20  ;;  %v9822_v49 = vcombine.high %v4756_v26, %v4760_v43  ;;  %v4720_v7 = vld [vmem:[#allocation11 + $0xca8] sm:$0xff]  ;;  %v4429_v44 = vld [vmem:[#allocation11 + $0x390] sm:$0xff] }
 0x400   :  { %7715 = vmatprep.subr.bf16.mxu0 %v9710_v57  ;;  %v9408_v57 = vcombine.high %v4341_v39, %v4345_v14  ;;  %v4433_v20 = vld [vmem:[#allocation11 + $0x3b0] sm:$0xff] }
 0x402   :  { %7665 = vmatpush2.bf16.msra.mxu1 %v9613_v33  ;;  %v9821_v33 = vcombine.low %v4756_v26, %v4760_v43  ;;  %v4708_v26 = vld [vmem:[#allocation11 + $0xc48] sm:$0xff] }
 0x403   :  { %7716 = vmatpush2.bf16.msra.mxu0 %v9709_v23  ;;  %7666 = vmatprep.subr.bf16.mxu1 %v9606_v1  ;;  %v9407_v23 = vcombine.low %v4341_v39, %v4345_v14  ;;  %v9814_v1 = vcombine.high %v4748_v41, %v4752_v60  ;;  %v4712_v43 = vld [vmem:[#allocation11 + $0xc68] sm:$0xff]  ;;  %v4421_v39 = vld [vmem:[#allocation11 + $0x350] sm:$0xff] }
 0x404   :  { %7717 = vmatprep.subr.bf16.mxu0 %v9702_v5  ;;  %v9400_v5 = vcombine.high %v4333_v13, %v4337_v0  ;;  %v4425_v14 = vld [vmem:[#allocation11 + $0x370] sm:$0xff] }
 0x406   :  { %7667 = vmatpush2.bf16.msra.mxu1 %v9605_v3  ;;  %v9813_v3 = vcombine.low %v4748_v41, %v4752_v60  ;;  %v4700_v41 = vld [vmem:[#allocation11 + $0xc08] sm:$0xff] }
 0x407   :  { %7718 = vmatpush2.bf16.msra.mxu0 %v9701_v36  ;;  %7668 = vmatprep.subr.bf16.mxu1 %v9598_v62  ;;  %v9399_v36 = vcombine.low %v4333_v13, %v4337_v0  ;;  %v9806_v62 = vcombine.high %v4740_v38, %v4744_v21  ;;  %v4704_v60 = vld [vmem:[#allocation11 + $0xc28] sm:$0xff]  ;;  %v4413_v13 = vld [vmem:[#allocation11 + $0x310] sm:$0xff] }
 0x408   :  { %7773 = vmatprep.subr.bf16.mxu0 %v9440_v40  ;;  %v9392_v40 = vcombine.high %v4325_v2, %v4329_v53  ;;  %v4417_v0 = vld [vmem:[#allocation11 + $0x330] sm:$0xff] }
 0x40a   :  { %7669 = vmatpush2.bf16.msra.mxu1 %v9597_v6  ;;  %7720 = vmatmul.mubr.bf16.vlgmr.msra.gmra.mxu0 %v10687_v54  ;;  %v9805_v6 = vcombine.low %v4740_v38, %v4744_v21  ;;  %v4820_v38 = vld [vmem:[#allocation11 + $0xfc8] sm:$0xff] }
 0x40b   :  { %7774 = vmatpush1.bf16.msra.mxu0 %v9439_v55  ;;  %7805 = vmatprep.mubr.bf16.mxu0 %v10638_v29  ;;  %v9391_v55 = vcombine.low %v4325_v2, %v4329_v53  ;;  %v4824_v21 = vld [vmem:[#allocation11 + $0xfe8] sm:$0xff]  ;;  %v4405_v2 = vld [vmem:[#allocation11 + $0x2d0] sm:$0xff] }
 0x40c   :  { %7670 = vmatprep.subr.bf16.mxu1 %v9590_v34  ;;  %7775 = vmatprep.subr.bf16.mxu0 %v9432_v22  ;;  %v9798_v34 = vcombine.high %v4732_v37, %v4736_v42  ;;  %v9384_v22 = vcombine.high %v4317_v24, %v4321_v4  ;;  %v4409_v53 = vld [vmem:[#allocation11 + $0x2f0] sm:$0xff] }
 0x40e   :  { %7671 = vmatpush2.bf16.msra.mxu1 %v9589_v17  ;;  %v9797_v17 = vcombine.low %v4732_v37, %v4736_v42  ;;  %v4812_v37 = vld [vmem:[#allocation11 + $0xf88] sm:$0xff] }
 0x40f   :  { %7776 = vmatpush1.bf16.msra.mxu0 %v9431_v30  ;;  %7672 = vmatprep.subr.bf16.mxu1 %v9582_v25  ;;  %v9383_v30 = vcombine.low %v4317_v24, %v4321_v4  ;;  %v9790_v25 = vcombine.high %v4724_v16, %v4728_v31  ;;  %v4816_v42 = vld [vmem:[#allocation11 + $0xfa8] sm:$0xff]  ;;  %v4397_v24 = vld [vmem:[#allocation11 + $0x290] sm:$0xff] }
 0x410   :  { %7777 = vmatprep.subr.bf16.mxu0 %v9424_v11  ;;  %v9504_v11 = vcombine.high %v4437_v27, %v4441_v10  ;;  %v4401_v4 = vld [vmem:[#allocation11 + $0x2b0] sm:$0xff] }
 0x412   :  { %7673 = vmatpush2.bf16.msra.mxu1 %v9581_v35  ;;  %v9789_v35 = vcombine.low %v4724_v16, %v4728_v31  ;;  %v4804_v16 = vld [vmem:[#allocation11 + $0xf48] sm:$0xff] }
 0x413   :  { %7778 = vmatpush1.bf16.msra.mxu0 %v9423_v19  ;;  %7674 = vmatprep.subr.bf16.mxu1 %v9574_v8  ;;  %v9503_v19 = vcombine.low %v4437_v27, %v4441_v10  ;;  %v9782_v8 = vcombine.high %v4716_v28, %v4720_v7  ;;  %v4808_v31 = vld [vmem:[#allocation11 + $0xf68] sm:$0xff]  ;;  %v4389_v27 = vld [vmem:[#allocation11 + $0x250] sm:$0xff] }
 0x414   :  { %7779 = vmatprep.subr.bf16.mxu0 %v9416_v9  ;;  %v9496_v9 = vcombine.high %v4429_v44, %v4433_v20  ;;  %v4393_v10 = vld [vmem:[#allocation11 + $0x270] sm:$0xff] }
 0x416   :  { %7675 = vmatpush2.bf16.msra.mxu1 %v9573_v56  ;;  %v9781_v56 = vcombine.low %v4716_v28, %v4720_v7  ;;  %v4796_v28 = vld [vmem:[#allocation11 + $0xf08] sm:$0xff] }
 0x417   :  { %7780 = vmatpush1.bf16.msra.mxu0 %v9415_v52  ;;  %7730 = vmatprep.subr.bf16.mxu1 %v9822_v49  ;;  %v9495_v52 = vcombine.low %v4429_v44, %v4433_v20  ;;  %v9774_v49 = vcombine.high %v4708_v26, %v4712_v43  ;;  %v4800_v7 = vld [vmem:[#allocation11 + $0xf28] sm:$0xff]  ;;  %v4381_v44 = vld [vmem:[#allocation11 + $0x210] sm:$0xff] }
 0x418   :  { %7781 = vmatprep.subr.bf16.mxu0 %v9408_v57  ;;  %v9488_v57 = vcombine.high %v4421_v39, %v4425_v14  ;;  %v4385_v20 = vld [vmem:[#allocation11 + $0x230] sm:$0xff] }
 0x419   :  { %7677 = vmatmul.mubr.bf16.vlgmr.msra.gmra.mxu1 %v10616_v15 }
 0x41a   :  { %7731 = vmatpush1.bf16.msra.mxu1 %v9821_v33  ;;  %7762 = vmatprep.mubr.bf16.mxu1 %v10695_v51  ;;  %v9773_v33 = vcombine.low %v4708_v26, %v4712_v43  ;;  %v4788_v26 = vld [vmem:[#allocation11 + $0xec8] sm:$0xff] }
 0x41b   :  { %7782 = vmatpush1.bf16.msra.mxu0 %v9407_v23  ;;  %7732 = vmatprep.subr.bf16.mxu1 %v9814_v1  ;;  %v9487_v23 = vcombine.low %v4421_v39, %v4425_v14  ;;  %v9766_v1 = vcombine.high %v4700_v41, %v4704_v60  ;;  %v4792_v43 = vld [vmem:[#allocation11 + $0xee8] sm:$0xff]  ;;  %v4629_v39 = vld [vmem:[#allocation11 + $0x9d0] sm:$0xff] }
 0x41c   :  { %7783 = vmatprep.subr.bf16.mxu0 %v9400_v5  ;;  %v9480_v5 = vcombine.high %v4413_v13, %v4417_v0  ;;  %v4633_v14 = vld [vmem:[#allocation11 + $0x9f0] sm:$0xff] }
 0x41e   :  { %7733 = vmatpush1.bf16.msra.mxu1 %v9813_v3  ;;  %v9765_v3 = vcombine.low %v4700_v41, %v4704_v60  ;;  %v4780_v41 = vld [vmem:[#allocation11 + $0xe88] sm:$0xff] }
 0x41f   :  { %7784 = vmatpush1.bf16.msra.mxu0 %v9399_v36  ;;  %7734 = vmatprep.subr.bf16.mxu1 %v9806_v62  ;;  %v9479_v36 = vcombine.low %v4413_v13, %v4417_v0  ;;  %v9886_v62 = vcombine.high %v4820_v38, %v4824_v21  ;;  %v4784_v60 = vld [vmem:[#allocation11 + $0xea8] sm:$0xff]  ;;  %v4621_v13 = vld [vmem:[#allocation11 + $0x990] sm:$0xff] }
 0x420   :  { %7785 = vmatprep.subr.bf16.mxu0 %v9392_v40  ;;  %v9472_v40 = vcombine.high %v4405_v2, %v4409_v53  ;;  %v4625_v0 = vld [vmem:[#allocation11 + $0x9b0] sm:$0xff] }
 0x422   :  { %7735 = vmatpush1.bf16.msra.mxu1 %v9805_v6  ;;  %v9885_v6 = vcombine.low %v4820_v38, %v4824_v21  ;;  %v4772_v38 = vld [vmem:[#allocation11 + $0xe48] sm:$0xff] }
 0x423   :  { %7786 = vmatpush1.bf16.msra.mxu0 %v9391_v55  ;;  %7736 = vmatprep.subr.bf16.mxu1 %v9798_v34  ;;  %v9471_v55 = vcombine.low %v4405_v2, %v4409_v53  ;;  %v9878_v34 = vcombine.high %v4812_v37, %v4816_v42  ;;  %v4776_v21 = vld [vmem:[#allocation11 + $0xe68] sm:$0xff]  ;;  %v4613_v2 = vld [vmem:[#allocation11 + $0x950] sm:$0xff] }
 0x424   :  { %7787 = vmatprep.subr.bf16.mxu0 %v9384_v22  ;;  %v9464_v22 = vcombine.high %v4397_v24, %v4401_v4  ;;  %v4617_v53 = vld [vmem:[#allocation11 + $0x970] sm:$0xff] }
 0x426   :  { %7737 = vmatpush1.bf16.msra.mxu1 %v9797_v17  ;;  %v9877_v17 = vcombine.low %v4812_v37, %v4816_v42  ;;  %v4764_v37 = vld [vmem:[#allocation11 + $0xe08] sm:$0xff] }
 0x427   :  { %7788 = vmatpush1.bf16.msra.mxu0 %v9383_v30  ;;  %7738 = vmatprep.subr.bf16.mxu1 %v9790_v25  ;;  %v9463_v30 = vcombine.low %v4397_v24, %v4401_v4  ;;  %v9870_v25 = vcombine.high %v4804_v16, %v4808_v31  ;;  %v4768_v42 = vld [vmem:[#allocation11 + $0xe28] sm:$0xff]  ;;  %v4605_v24 = vld [vmem:[#allocation11 + $0x910] sm:$0xff] }
 0x428   :  { %7789 = vmatprep.subr.bf16.mxu0 %v9504_v11  ;;  %v9456_v11 = vcombine.high %v4389_v27, %v4393_v10  ;;  %v4609_v4 = vld [vmem:[#allocation11 + $0x930] sm:$0xff] }
 0x42a   :  { %7739 = vmatpush1.bf16.msra.mxu1 %v9789_v35  ;;  %v9869_v35 = vcombine.low %v4804_v16, %v4808_v31  ;;  %v4501_v16 = vld [vmem:[#allocation11 + $0x5d0] sm:$0xff] }
 0x42b   :  { %7790 = vmatpush2.bf16.msra.mxu0 %v9503_v19  ;;  %7740 = vmatprep.subr.bf16.mxu1 %v9782_v8  ;;  %v9455_v19 = vcombine.low %v4389_v27, %v4393_v10  ;;  %v9862_v8 = vcombine.high %v4796_v28, %v4800_v7  ;;  %v4505_v31 = vld [vmem:[#allocation11 + $0x5f0] sm:$0xff] }
 0x42c   :  { %7791 = vmatprep.subr.bf16.mxu0 %v9496_v9  ;;  %v9448_v9 = vcombine.high %v4381_v44, %v4385_v20  ;;  %v4597_v27 = vld [vmem:[#allocation11 + $0x8d0] sm:$0xff] }
 0x42d   :  { %v4601_v10 = vld [vmem:[#allocation11 + $0x8f0] sm:$0xff] }
 0x42e   :  { %7741 = vmatpush1.bf16.msra.mxu1 %v9781_v56  ;;  %v9861_v56 = vcombine.low %v4796_v28, %v4800_v7  ;;  %v4493_v28 = vld [vmem:[#allocation11 + $0x590] sm:$0xff] }
 0x42f   :  { %7792 = vmatpush2.bf16.msra.mxu0 %v9495_v52  ;;  %7742 = vmatprep.subr.bf16.mxu1 %v9774_v49  ;;  %v9447_v52 = vcombine.low %v4381_v44, %v4385_v20  ;;  %v9854_v49 = vcombine.high %v4788_v26, %v4792_v43  ;;  %v4497_v7 = vld [vmem:[#allocation11 + $0x5b0] sm:$0xff] }
 0x430   :  { %7793 = vmatprep.subr.bf16.mxu0 %v9488_v57  ;;  %v9696_v57 = vcombine.high %v4629_v39, %v4633_v14  ;;  %v4589_v44 = vld [vmem:[#allocation11 + $0x890] sm:$0xff] }
 0x431   :  { %v4593_v20 = vld [vmem:[#allocation11 + $0x8b0] sm:$0xff] }
 0x432   :  { %7743 = vmatpush1.bf16.msra.mxu1 %v9773_v33  ;;  %v9853_v33 = vcombine.low %v4788_v26, %v4792_v43  ;;  %v4485_v26 = vld [vmem:[#allocation11 + $0x550] sm:$0xff] }
 0x433   :  { %7794 = vmatpush2.bf16.msra.mxu0 %v9487_v23  ;;  %7744 = vmatprep.subr.bf16.mxu1 %v9766_v1  ;;  %v9695_v23 = vcombine.low %v4629_v39, %v4633_v14  ;;  %v9846_v1 = vcombine.high %v4780_v41, %v4784_v60  ;;  %v4489_v43 = vld [vmem:[#allocation11 + $0x570] sm:$0xff] }
 0x434   :  { %7795 = vmatprep.subr.bf16.mxu0 %v9480_v5  ;;  %v9688_v5 = vcombine.high %v4621_v13, %v4625_v0  ;;  %v4581_v39 = vld [vmem:[#allocation11 + $0x850] sm:$0xff] }
 0x435   :  { %v4585_v14 = vld [vmem:[#allocation11 + $0x870] sm:$0xff] }
 0x436   :  { %7745 = vmatpush1.bf16.msra.mxu1 %v9765_v3  ;;  %v9845_v3 = vcombine.low %v4780_v41, %v4784_v60  ;;  %v4477_v41 = vld [vmem:[#allocation11 + $0x510] sm:$0xff] }
 0x437   :  { %7796 = vmatpush2.bf16.msra.mxu0 %v9479_v36  ;;  %7746 = vmatprep.subr.bf16.mxu1 %v9886_v62  ;;  %v9687_v36 = vcombine.low %v4621_v13, %v4625_v0  ;;  %v9838_v62 = vcombine.high %v4772_v38, %v4776_v21  ;;  %v4481_v60 = vld [vmem:[#allocation11 + $0x530] sm:$0xff] }
 0x438   :  { %7797 = vmatprep.subr.bf16.mxu0 %v9472_v40  ;;  %v9680_v40 = vcombine.high %v4613_v2, %v4617_v53  ;;  %v4573_v13 = vld [vmem:[#allocation11 + $0x810] sm:$0xff] }
 0x439   :  { %v4577_v0 = vld [vmem:[#allocation11 + $0x830] sm:$0xff] }
 0x43a   :  { %7747 = vmatpush2.bf16.msra.mxu1 %v9885_v6  ;;  %v9837_v6 = vcombine.low %v4772_v38, %v4776_v21  ;;  %v4469_v38 = vld [vmem:[#allocation11 + $0x4d0] sm:$0xff] }
 0x43b   :  { %7798 = vmatpush2.bf16.msra.mxu0 %v9471_v55  ;;  %7748 = vmatprep.subr.bf16.mxu1 %v9878_v34  ;;  %v9679_v55 = vcombine.low %v4613_v2, %v4617_v53  ;;  %v9830_v34 = vcombine.high %v4764_v37, %v4768_v42  ;;  %v4473_v21 = vld [vmem:[#allocation11 + $0x4f0] sm:$0xff] }
 0x43c   :  { %7799 = vmatprep.subr.bf16.mxu0 %v9464_v22  ;;  %v9672_v22 = vcombine.high %v4605_v24, %v4609_v4  ;;  %v4693_v2 = vld [vmem:[#allocation11 + $0xbd0] sm:$0xff] }
 0x43d   :  { %v4697_v53 = vld [vmem:[#allocation11 + $0xbf0] sm:$0xff] }
 0x43e   :  { %7749 = vmatpush2.bf16.msra.mxu1 %v9877_v17  ;;  %v9829_v17 = vcombine.low %v4764_v37, %v4768_v42  ;;  %v4461_v37 = vld [vmem:[#allocation11 + $0x490] sm:$0xff] }
 0x43f   :  { %7800 = vmatpush2.bf16.msra.mxu0 %v9463_v30  ;;  %7750 = vmatprep.subr.bf16.mxu1 %v9870_v25  ;;  %v9671_v30 = vcombine.low %v4605_v24, %v4609_v4  ;;  %v9568_v25 = vcombine.high %v4501_v16, %v4505_v31  ;;  %v4465_v42 = vld [vmem:[#allocation11 + $0x4b0] sm:$0xff] }
 0x440   :  { %7801 = vmatprep.subr.bf16.mxu0 %v9456_v11  ;;  %v9664_v11 = vcombine.high %v4597_v27, %v4601_v10  ;;  %v4685_v24 = vld [vmem:[#allocation11 + $0xb90] sm:$0xff] }
 0x441   :  { %v4689_v4 = vld [vmem:[#allocation11 + $0xbb0] sm:$0xff] }
 0x442   :  { %7751 = vmatpush2.bf16.msra.mxu1 %v9869_v35  ;;  %v9567_v35 = vcombine.low %v4501_v16, %v4505_v31  ;;  %v4453_v16 = vld [vmem:[#allocation11 + $0x450] sm:$0xff] }
 0x443   :  { %7802 = vmatpush2.bf16.msra.mxu0 %v9455_v19  ;;  %7752 = vmatprep.subr.bf16.mxu1 %v9862_v8  ;;  %v9663_v19 = vcombine.low %v4597_v27, %v4601_v10  ;;  %v9560_v8 = vcombine.high %v4493_v28, %v4497_v7  ;;  %v4457_v31 = vld [vmem:[#allocation11 + $0x470] sm:$0xff] }
 0x444   :  { %7803 = vmatprep.subr.bf16.mxu0 %v9448_v9  ;;  %v9656_v9 = vcombine.high %v4589_v44, %v4593_v20  ;;  %v4677_v27 = vld [vmem:[#allocation11 + $0xb50] sm:$0xff] }
 0x445   :  { %v4681_v10 = vld [vmem:[#allocation11 + $0xb70] sm:$0xff] }
 0x446   :  { %7753 = vmatpush2.bf16.msra.mxu1 %v9861_v56  ;;  %v9559_v56 = vcombine.low %v4493_v28, %v4497_v7  ;;  %v4445_v28 = vld [vmem:[#allocation11 + $0x410] sm:$0xff] }
 0x447   :  { %7804 = vmatpush2.bf16.msra.mxu0 %v9447_v52  ;;  %7754 = vmatprep.subr.bf16.mxu1 %v9854_v49  ;;  %v9655_v52 = vcombine.low %v4589_v44, %v4593_v20  ;;  %v9552_v49 = vcombine.high %v4485_v26, %v4489_v43  ;;  %v4449_v7 = vld [vmem:[#allocation11 + $0x430] sm:$0xff] }
 0x448   :  { %7859 = vmatprep.subr.bf16.mxu0 %v9696_v57  ;;  %v9648_v57 = vcombine.high %v4581_v39, %v4585_v14  ;;  %v4669_v44 = vld [vmem:[#allocation11 + $0xb10] sm:$0xff] }
 0x449   :  { %v4673_v20 = vld [vmem:[#allocation11 + $0xb30] sm:$0xff] }
 0x44a   :  { %7755 = vmatpush2.bf16.msra.mxu1 %v9853_v33  ;;  %7806 = vmatmul.mubr.bf16.vlgmr.msra.gmra.mxu0 %v10582_v45  ;;  %v9551_v33 = vcombine.low %v4485_v26, %v4489_v43  ;;  %v4565_v26 = vld [vmem:[#allocation11 + $0x7d0] sm:$0xff] }
 0x44b   :  { %7860 = vmatpush1.bf16.msra.mxu0 %v9695_v23  ;;  %7891 = vmatprep.mubr.bf16.mxu0 %v10666_v32  ;;  %v9647_v23 = vcombine.low %v4581_v39, %v4585_v14  ;;  %v4569_v43 = vld [vmem:[#allocation11 + $0x7f0] sm:$0xff] }
 0x44c   :  { %7756 = vmatprep.subr.bf16.mxu1 %v9846_v1  ;;  %7861 = vmatprep.subr.bf16.mxu0 %v9688_v5  ;;  %v9544_v1 = vcombine.high %v4477_v41, %v4481_v60  ;;  %v9640_v5 = vcombine.high %v4573_v13, %v4577_v0  ;;  %v4661_v39 = vld [vmem:[#allocation11 + $0xad0] sm:$0xff] }
 0x44d   :  { %v4665_v14 = vld [vmem:[#allocation11 + $0xaf0] sm:$0xff] }
 0x44e   :  { %7757 = vmatpush2.bf16.msra.mxu1 %v9845_v3  ;;  %v9543_v3 = vcombine.low %v4477_v41, %v4481_v60  ;;  %v4557_v41 = vld [vmem:[#allocation11 + $0x790] sm:$0xff] }
 0x44f   :  { %7862 = vmatpush1.bf16.msra.mxu0 %v9687_v36  ;;  %7758 = vmatprep.subr.bf16.mxu1 %v9838_v62  ;;  %v9639_v36 = vcombine.low %v4573_v13, %v4577_v0  ;;  %v9536_v62 = vcombine.high %v4469_v38, %v4473_v21  ;;  %v4561_v60 = vld [vmem:[#allocation11 + $0x7b0] sm:$0xff] }
 0x450   :  { %7863 = vmatprep.subr.bf16.mxu0 %v9680_v40  ;;  %v9760_v40 = vcombine.high %v4693_v2, %v4697_v53  ;;  %v4653_v13 = vld [vmem:[#allocation11 + $0xa90] sm:$0xff] }
 0x451   :  { %v4657_v0 = vld [vmem:[#allocation11 + $0xab0] sm:$0xff] }
 0x452   :  { %7759 = vmatpush2.bf16.msra.mxu1 %v9837_v6  ;;  %v9535_v6 = vcombine.low %v4469_v38, %v4473_v21  ;;  %v4549_v38 = vld [vmem:[#allocation11 + $0x750] sm:$0xff] }
 0x453   :  { %7864 = vmatpush1.bf16.msra.mxu0 %v9679_v55  ;;  %7760 = vmatprep.subr.bf16.mxu1 %v9830_v34  ;;  %v9759_v55 = vcombine.low %v4693_v2, %v4697_v53  ;;  %v9528_v34 = vcombine.high %v4461_v37, %v4465_v42  ;;  %v4553_v21 = vld [vmem:[#allocation11 + $0x770] sm:$0xff] }
 0x454   :  { %7865 = vmatprep.subr.bf16.mxu0 %v9672_v22  ;;  %v9752_v22 = vcombine.high %v4685_v24, %v4689_v4  ;;  %v4645_v2 = vld [vmem:[#allocation11 + $0xa50] sm:$0xff] }
 0x455   :  { %v4649_v53 = vld [vmem:[#allocation11 + $0xa70] sm:$0xff] }
 0x456   :  { %7761 = vmatpush2.bf16.msra.mxu1 %v9829_v17  ;;  %v9527_v17 = vcombine.low %v4461_v37, %v4465_v42  ;;  %v4541_v37 = vld [vmem:[#allocation11 + $0x710] sm:$0xff] }
 0x457   :  { %7866 = vmatpush1.bf16.msra.mxu0 %v9671_v30  ;;  %7816 = vmatprep.subr.bf16.mxu1 %v9568_v25  ;;  %v9751_v30 = vcombine.low %v4685_v24, %v4689_v4  ;;  %v9520_v25 = vcombine.high %v4453_v16, %v4457_v31  ;;  %v4545_v42 = vld [vmem:[#allocation11 + $0x730] sm:$0xff] }
 0x458   :  { %7867 = vmatprep.subr.bf16.mxu0 %v9664_v11  ;;  %v9744_v11 = vcombine.high %v4677_v27, %v4681_v10  ;;  %v4637_v24 = vld [vmem:[#allocation11 + $0xa10] sm:$0xff] }
 0x459   :  { %7763 = vmatmul.mubr.bf16.vlgmr.msra.gmra.mxu1 %v10697_v12  ;;  %v4641_v4 = vld [vmem:[#allocation11 + $0xa30] sm:$0xff] }
 0x45a   :  { %7817 = vmatpush1.bf16.msra.mxu1 %v9567_v35  ;;  %7848 = vmatprep.mubr.bf16.mxu1 %v10641_v18  ;;  %v9519_v35 = vcombine.low %v4453_v16, %v4457_v31  ;;  %v4533_v16 = vld [vmem:[#allocation11 + $0x6d0] sm:$0xff] }
 0x45b   :  { %7868 = vmatpush1.bf16.msra.mxu0 %v9663_v19  ;;  %7818 = vmatprep.subr.bf16.mxu1 %v9560_v8  ;;  %v9743_v19 = vcombine.low %v4677_v27, %v4681_v10  ;;  %v9512_v8 = vcombine.high %v4445_v28, %v4449_v7  ;;  %v4537_v31 = vld [vmem:[#allocation11 + $0x6f0] sm:$0xff]  ;;  %v4374_v27 = vld [vmem:[#allocation11 + $0x1d8] sm:$0xff] }
 0x45c   :  { %7869 = vmatprep.subr.bf16.mxu0 %v9656_v9  ;;  %v9736_v9 = vcombine.high %v4669_v44, %v4673_v20  ;;  %v4378_v10 = vld [vmem:[#allocation11 + $0x1f8] sm:$0xff] }
 0x45e   :  { %7819 = vmatpush1.bf16.msra.mxu1 %v9559_v56  ;;  %v9511_v56 = vcombine.low %v4445_v28, %v4449_v7  ;;  %v4525_v28 = vld [vmem:[#allocation11 + $0x690] sm:$0xff] }
 0x45f   :  { %7870 = vmatpush1.bf16.msra.mxu0 %v9655_v52  ;;  %7820 = vmatprep.subr.bf16.mxu1 %v9552_v49  ;;  %v9735_v52 = vcombine.low %v4669_v44, %v4673_v20  ;;  %v9632_v49 = vcombine.high %v4565_v26, %v4569_v43  ;;  %v4529_v7 = vld [vmem:[#allocation11 + $0x6b0] sm:$0xff]  ;;  %v4366_v44 = vld [vmem:[#allocation11 + $0x198] sm:$0xff] }
 0x460   :  { %7871 = vmatprep.subr.bf16.mxu0 %v9648_v57  ;;  %v9728_v57 = vcombine.high %v4661_v39, %v4665_v14  ;;  %v4370_v20 = vld [vmem:[#allocation11 + $0x1b8] sm:$0xff] }
 0x462   :  { %7821 = vmatpush1.bf16.msra.mxu1 %v9551_v33  ;;  %v9631_v33 = vcombine.low %v4565_v26, %v4569_v43  ;;  %v4517_v26 = vld [vmem:[#allocation11 + $0x650] sm:$0xff] }
 0x463   :  { %7872 = vmatpush1.bf16.msra.mxu0 %v9647_v23  ;;  %7822 = vmatprep.subr.bf16.mxu1 %v9544_v1  ;;  %v9727_v23 = vcombine.low %v4661_v39, %v4665_v14  ;;  %v9624_v1 = vcombine.high %v4557_v41, %v4561_v60  ;;  %v4521_v43 = vld [vmem:[#allocation11 + $0x670] sm:$0xff]  ;;  %v4358_v39 = vld [vmem:[#allocation11 + $0x158] sm:$0xff] }
 0x464   :  { %7873 = vmatprep.subr.bf16.mxu0 %v9640_v5  ;;  %v9720_v5 = vcombine.high %v4653_v13, %v4657_v0  ;;  %v4362_v14 = vld [vmem:[#allocation11 + $0x178] sm:$0xff] }
 0x466   :  { %7823 = vmatpush1.bf16.msra.mxu1 %v9543_v3  ;;  %v9623_v3 = vcombine.low %v4557_v41, %v4561_v60  ;;  %v4509_v41 = vld [vmem:[#allocation11 + $0x610] sm:$0xff] }
 0x467   :  { %7874 = vmatpush1.bf16.msra.mxu0 %v9639_v36  ;;  %7824 = vmatprep.subr.bf16.mxu1 %v9536_v62  ;;  %v9719_v36 = vcombine.low %v4653_v13, %v4657_v0  ;;  %v9616_v62 = vcombine.high %v4549_v38, %v4553_v21  ;;  %v4513_v60 = vld [vmem:[#allocation11 + $0x630] sm:$0xff]  ;;  %v4350_v13 = vld [vmem:[#allocation11 + $0x118] sm:$0xff] }
 0x468   :  { %7875 = vmatprep.subr.bf16.mxu0 %v9760_v40  ;;  %v9712_v40 = vcombine.high %v4645_v2, %v4649_v53  ;;  %v4354_v0 = vld [vmem:[#allocation11 + $0x138] sm:$0xff] }
 0x46a   :  { %7825 = vmatpush1.bf16.msra.mxu1 %v9535_v6  ;;  %v9615_v6 = vcombine.low %v4549_v38, %v4553_v21  ;;  %v4757_v38 = vld [vmem:[#allocation11 + $0xdd0] sm:$0xff] }
 0x46b   :  { %7876 = vmatpush2.bf16.msra.mxu0 %v9759_v55  ;;  %7826 = vmatprep.subr.bf16.mxu1 %v9528_v34  ;;  %v9711_v55 = vcombine.low %v4645_v2, %v4649_v53  ;;  %v9608_v34 = vcombine.high %v4541_v37, %v4545_v42  ;;  %v4761_v21 = vld [vmem:[#allocation11 + $0xdf0] sm:$0xff]  ;;  %v4346_v2 = vld [vmem:[#allocation11 + $0xf8] sm:$0xff]  ;;  %v9575_v53 = vcombine.low %v4509_v41, %v4513_v60 }
 0x46c   :  { %7877 = vmatprep.subr.bf16.mxu0 %v9752_v22  ;;  %v9704_v22 = vcombine.high %v4637_v24, %v4641_v4 }
 0x46e   :  { %7827 = vmatpush1.bf16.msra.mxu1 %v9527_v17  ;;  %v9607_v17 = vcombine.low %v4541_v37, %v4545_v42  ;;  %v4753_v37 = vld [vmem:[#allocation11 + $0xdb0] sm:$0xff]  ;;  %v4334_v42 = vld [vmem:[#allocation11 + $0x98] sm:$0xff] }
 0x46f   :  { %7878 = vmatpush2.bf16.msra.mxu0 %v9751_v30  ;;  %7828 = vmatprep.subr.bf16.mxu1 %v9520_v25  ;;  %v9703_v30 = vcombine.low %v4637_v24, %v4641_v4  ;;  %v9600_v25 = vcombine.high %v4533_v16, %v4537_v31  ;;  %v4338_v24 = vld [vmem:[#allocation11 + $0xb8] sm:$0xff]  ;;  %v9823_v4 = vcombine.low %v4757_v38, %v4761_v21 }
 0x470   :  { %7879 = vmatprep.subr.bf16.mxu0 %v9744_v11  ;;  %v9442_v11 = vcombine.high %v4374_v27, %v4378_v10 }
 0x472   :  { %7829 = vmatpush1.bf16.msra.mxu1 %v9519_v35  ;;  %v9599_v35 = vcombine.low %v4533_v16, %v4537_v31  ;;  %v4745_v16 = vld [vmem:[#allocation11 + $0xd70] sm:$0xff]  ;;  %v4326_v31 = vld [vmem:[#allocation11 + $0x58] sm:$0xff] }
 0x473   :  { %7880 = vmatpush2.bf16.msra.mxu0 %v9743_v19  ;;  %7830 = vmatprep.subr.bf16.mxu1 %v9512_v8  ;;  %v9441_v19 = vcombine.low %v4374_v27, %v4378_v10  ;;  %v9592_v8 = vcombine.high %v4525_v28, %v4529_v7  ;;  %v4330_v27 = vld [vmem:[#allocation11 + $0x78] sm:$0xff] }
 0x474   :  { %7881 = vmatprep.subr.bf16.mxu0 %v9736_v9  ;;  %v9434_v9 = vcombine.high %v4366_v44, %v4370_v20 }
 0x476   :  { %7831 = vmatpush1.bf16.msra.mxu1 %v9511_v56  ;;  %v9591_v56 = vcombine.low %v4525_v28, %v4529_v7  ;;  %v4737_v28 = vld [vmem:[#allocation11 + $0xd30] sm:$0xff]  ;;  %v4318_v7 = vld [vmem:[#allocation11 + $0x18] sm:$0xff] }
 0x477   :  { %7882 = vmatpush2.bf16.msra.mxu0 %v9735_v52  ;;  %7832 = vmatprep.subr.bf16.mxu1 %v9632_v49  ;;  %v9433_v52 = vcombine.low %v4366_v44, %v4370_v20  ;;  %v9584_v49 = vcombine.high %v4517_v26, %v4521_v43  ;;  %v4322_v44 = vld [vmem:[#allocation11 + $0x38] sm:$0xff] }
 0x478   :  { %7883 = vmatprep.subr.bf16.mxu0 %v9728_v57  ;;  %v9426_v57 = vcombine.high %v4358_v39, %v4362_v14 }
 0x47a   :  { %7833 = vmatpush2.bf16.msra.mxu1 %v9631_v33  ;;  %v9583_v33 = vcombine.low %v4517_v26, %v4521_v43  ;;  %v4729_v26 = vld [vmem:[#allocation11 + $0xcf0] sm:$0xff]  ;;  %v4438_v43 = vld [vmem:[#allocation11 + $0x3d8] sm:$0xff] }
 0x47b   :  { %7884 = vmatpush2.bf16.msra.mxu0 %v9727_v23  ;;  %7834 = vmatprep.subr.bf16.mxu1 %v9624_v1  ;;  %v9425_v23 = vcombine.low %v4358_v39, %v4362_v14  ;;  %v9576_v1 = vcombine.high %v4509_v41, %v4513_v60  ;;  %v4442_v39 = vld [vmem:[#allocation11 + $0x3f8] sm:$0xff]  ;;  %v4721_v41 = vld [vmem:[#allocation11 + $0xcb0] sm:$0xff] }
 0x47c   :  { %7885 = vmatprep.subr.bf16.mxu0 %v9720_v5  ;;  %v9418_v5 = vcombine.high %v4350_v13, %v4354_v0  ;;  %v4430_v60 = vld [vmem:[#allocation11 + $0x398] sm:$0xff] }
 0x47e   :  { %7835 = vmatpush2.bf16.msra.mxu1 %v9623_v3  ;;  %v9417_v3 = vcombine.low %v4350_v13, %v4354_v0  ;;  %v4434_v13 = vld [vmem:[#allocation11 + $0x3b8] sm:$0xff] }
 0x47f   :  { %7886 = vmatpush2.bf16.msra.mxu0 %v9719_v36  ;;  %7836 = vmatprep.subr.bf16.mxu1 %v9616_v62  ;;  %v9824_v36 = vcombine.high %v4757_v38, %v4761_v21  ;;  %v4713_v38 = vld [vmem:[#allocation11 + $0xc70] sm:$0xff]  ;;  %v4422_v21 = vld [vmem:[#allocation11 + $0x358] sm:$0xff] }
 0x480   :  { %7887 = vmatprep.subr.bf16.mxu0 %v9712_v40  ;;  %v4749_v40 = vld [vmem:[#allocation11 + $0xd90] sm:$0xff] }
 0x481   :  { %v9815_v10 = vcombine.low %v4749_v40, %v4753_v37 }
 0x482   :  { %7837 = vmatpush2.bf16.msra.mxu1 %v9615_v6 }
 0x483   :  { %7888 = vmatpush2.bf16.msra.mxu0 %v9711_v55  ;;  %7838 = vmatprep.subr.bf16.mxu1 %v9608_v34  ;;  %v9816_v55 = vcombine.high %v4749_v40, %v4753_v37  ;;  %v9402_v34 = vcombine.high %v4334_v42, %v4338_v24  ;;  %v4705_v40 = vld [vmem:[#allocation11 + $0xc30] sm:$0xff]  ;;  %v4414_v37 = vld [vmem:[#allocation11 + $0x318] sm:$0xff] }
 0x484   :  { %7889 = vmatprep.subr.bf16.mxu0 %v9704_v22  ;;  %v4741_v22 = vld [vmem:[#allocation11 + $0xd50] sm:$0xff] }
 0x485   :  { %v9807_v20 = vcombine.low %v4741_v22, %v4745_v16 }
 0x486   :  { %7839 = vmatpush2.bf16.msra.mxu1 %v9607_v17  ;;  %v9401_v17 = vcombine.low %v4334_v42, %v4338_v24  ;;  %v4418_v42 = vld [vmem:[#allocation11 + $0x338] sm:$0xff] }
 0x487   :  { %7890 = vmatpush2.bf16.msra.mxu0 %v9703_v30  ;;  %7840 = vmatprep.subr.bf16.mxu1 %v9600_v25  ;;  %v9808_v30 = vcombine.high %v4741_v22, %v4745_v16  ;;  %v9394_v25 = vcombine.high %v4326_v31, %v4330_v27  ;;  %v4825_v22 = vld [vmem:[#allocation11 + $0xff0] sm:$0xff]  ;;  %v4406_v16 = vld [vmem:[#allocation11 + $0x2d8] sm:$0xff] }
 0x488   :  { %7945 = vmatprep.subr.bf16.mxu0 %v9442_v11  ;;  %v4733_v11 = vld [vmem:[#allocation11 + $0xd10] sm:$0xff] }
 0x489   :  { %v9799_v14 = vcombine.low %v4733_v11, %v4737_v28 }
 0x48a   :  { %7841 = vmatpush2.bf16.msra.mxu1 %v9599_v35  ;;  %7892 = vmatmul.mubr.bf16.vlgmr.msra.gmra.mxu0 %v10687_v54  ;;  %v9393_v35 = vcombine.low %v4326_v31, %v4330_v27  ;;  %v4410_v31 = vld [vmem:[#allocation11 + $0x2f8] sm:$0xff] }
 0x48b   :  { %7946 = vmatpush1.bf16.msra.mxu0 %v9441_v19  ;;  %7977 = vmatprep.mubr.bf16.mxu0 %v10638_v29  ;;  %v4342_v29 = vld [vmem:[#allocation11 + $0xd8] sm:$0xff]  ;;  %v9800_v19 = vcombine.high %v4733_v11, %v4737_v28  ;;  %v4817_v11 = vld [vmem:[#allocation11 + $0xfb0] sm:$0xff] }
 0x48c   :  { %7842 = vmatprep.subr.bf16.mxu1 %v9592_v8  ;;  %7947 = vmatprep.subr.bf16.mxu0 %v9434_v9  ;;  %v9410_v62 = vcombine.high %v4342_v29, %v4346_v2  ;;  %v9409_v6 = vcombine.low %v4342_v29, %v4346_v2  ;;  %v9386_v8 = vcombine.high %v4318_v7, %v4322_v44  ;;  %v4725_v9 = vld [vmem:[#allocation11 + $0xcd0] sm:$0xff]  ;;  %v4426_v29 = vld [vmem:[#allocation11 + $0x378] sm:$0xff] }
 0x48d   :  { %v9791_v0 = vcombine.low %v4725_v9, %v4729_v26  ;;  %v4398_v28 = vld [vmem:[#allocation11 + $0x298] sm:$0xff] }
 0x48e   :  { %7843 = vmatpush2.bf16.msra.mxu1 %v9591_v56  ;;  %v9385_v56 = vcombine.low %v4318_v7, %v4322_v44  ;;  %v4402_v7 = vld [vmem:[#allocation11 + $0x2b8] sm:$0xff] }
 0x48f   :  { %7948 = vmatpush1.bf16.msra.mxu0 %v9433_v52  ;;  %7844 = vmatprep.subr.bf16.mxu1 %v9584_v49  ;;  %v9792_v52 = vcombine.high %v4725_v9, %v4729_v26  ;;  %v9506_v49 = vcombine.high %v4438_v43, %v4442_v39  ;;  %v4809_v9 = vld [vmem:[#allocation11 + $0xf70] sm:$0xff]  ;;  %v4390_v26 = vld [vmem:[#allocation11 + $0x258] sm:$0xff] }
 0x490   :  { %7949 = vmatprep.subr.bf16.mxu0 %v9426_v57  ;;  %v4717_v57 = vld [vmem:[#allocation11 + $0xc90] sm:$0xff] }
 0x491   :  { %v9783_v2 = vcombine.low %v4717_v57, %v4721_v41 }
 0x492   :  { %7845 = vmatpush2.bf16.msra.mxu1 %v9583_v33  ;;  %v9505_v33 = vcombine.low %v4438_v43, %v4442_v39  ;;  %v4394_v43 = vld [vmem:[#allocation11 + $0x278] sm:$0xff] }
 0x493   :  { %7950 = vmatpush1.bf16.msra.mxu0 %v9425_v23  ;;  %7846 = vmatprep.subr.bf16.mxu1 %v9576_v1  ;;  %v9784_v23 = vcombine.high %v4717_v57, %v4721_v41  ;;  %v9498_v1 = vcombine.high %v4430_v60, %v4434_v13  ;;  %v4801_v57 = vld [vmem:[#allocation11 + $0xf30] sm:$0xff]  ;;  %v4382_v41 = vld [vmem:[#allocation11 + $0x218] sm:$0xff] }
 0x494   :  { %7951 = vmatprep.subr.bf16.mxu0 %v9418_v5  ;;  %v4709_v5 = vld [vmem:[#allocation11 + $0xc50] sm:$0xff] }
 0x495   :  { %v9775_v24 = vcombine.low %v4709_v5, %v4713_v38 }
 0x496   :  { %7847 = vmatpush2.bf16.msra.mxu1 %v9575_v53  ;;  %v9497_v53 = vcombine.low %v4430_v60, %v4434_v13  ;;  %v4386_v60 = vld [vmem:[#allocation11 + $0x238] sm:$0xff] }
 0x497   :  { %7952 = vmatpush1.bf16.msra.mxu0 %v9417_v3  ;;  %7902 = vmatprep.subr.bf16.mxu1 %v9824_v36  ;;  %v9776_v3 = vcombine.high %v4709_v5, %v4713_v38  ;;  %v9490_v36 = vcombine.high %v4422_v21, %v4426_v29  ;;  %v4793_v5 = vld [vmem:[#allocation11 + $0xef0] sm:$0xff]  ;;  %v4630_v38 = vld [vmem:[#allocation11 + $0x9d8] sm:$0xff] }
 0x498   :  { %7953 = vmatprep.subr.bf16.mxu0 %v9410_v62  ;;  %v4701_v62 = vld [vmem:[#allocation11 + $0xc10] sm:$0xff] }
 0x499   :  { %7849 = vmatmul.mubr.bf16.vlgmr.msra.gmra.mxu1 %v10616_v15  ;;  %v9767_v27 = vcombine.low %v4701_v62, %v4705_v40 }
 0x49a   :  { %7903 = vmatpush1.bf16.msra.mxu1 %v9823_v4  ;;  %7934 = vmatprep.mubr.bf16.mxu1 %v10695_v51  ;;  %v9489_v4 = vcombine.low %v4422_v21, %v4426_v29  ;;  %v4634_v21 = vld [vmem:[#allocation11 + $0x9f8] sm:$0xff] }
 0x49b   :  { %7954 = vmatpush1.bf16.msra.mxu0 %v9409_v6  ;;  %7904 = vmatprep.subr.bf16.mxu1 %v9816_v55  ;;  %v9768_v6 = vcombine.high %v4701_v62, %v4705_v40  ;;  %v9482_v55 = vcombine.high %v4414_v37, %v4418_v42  ;;  %v4785_v62 = vld [vmem:[#allocation11 + $0xeb0] sm:$0xff]  ;;  %v4622_v40 = vld [vmem:[#allocation11 + $0x998] sm:$0xff] }
 0x49c   :  { %7955 = vmatprep.subr.bf16.mxu0 %v9402_v34  ;;  %v4821_v34 = vld [vmem:[#allocation11 + $0xfd0] sm:$0xff] }
 0x49d   :  { %v9887_v44 = vcombine.low %v4821_v34, %v4825_v22 }
 0x49e   :  { %7905 = vmatpush1.bf16.msra.mxu1 %v9815_v10  ;;  %v9481_v10 = vcombine.low %v4414_v37, %v4418_v42  ;;  %v4626_v37 = vld [vmem:[#allocation11 + $0x9b8] sm:$0xff] }
 0x49f   :  { %7956 = vmatpush1.bf16.msra.mxu0 %v9401_v17  ;;  %7906 = vmatprep.subr.bf16.mxu1 %v9808_v30  ;;  %v9888_v17 = vcombine.high %v4821_v34, %v4825_v22  ;;  %v9474_v30 = vcombine.high %v4406_v16, %v4410_v31  ;;  %v4777_v34 = vld [vmem:[#allocation11 + $0xe70] sm:$0xff]  ;;  %v4614_v22 = vld [vmem:[#allocation11 + $0x958] sm:$0xff] }
 0x4a0   :  { %7957 = vmatprep.subr.bf16.mxu0 %v9394_v25  ;;  %v4813_v25 = vld [vmem:[#allocation11 + $0xf90] sm:$0xff] }
 0x4a1   :  { %v9879_v39 = vcombine.low %v4813_v25, %v4817_v11 }
 0x4a2   :  { %7907 = vmatpush1.bf16.msra.mxu1 %v9807_v20  ;;  %v9473_v20 = vcombine.low %v4406_v16, %v4410_v31  ;;  %v4618_v16 = vld [vmem:[#allocation11 + $0x978] sm:$0xff] }
 0x4a3   :  { %7958 = vmatpush1.bf16.msra.mxu0 %v9393_v35  ;;  %7908 = vmatprep.subr.bf16.mxu1 %v9800_v19  ;;  %v9880_v35 = vcombine.high %v4813_v25, %v4817_v11  ;;  %v9466_v19 = vcombine.high %v4398_v28, %v4402_v7  ;;  %v4769_v25 = vld [vmem:[#allocation11 + $0xe30] sm:$0xff]  ;;  %v4606_v11 = vld [vmem:[#allocation11 + $0x918] sm:$0xff] }
 0x4a4   :  { %7959 = vmatprep.subr.bf16.mxu0 %v9386_v8  ;;  %v4805_v8 = vld [vmem:[#allocation11 + $0xf50] sm:$0xff] }
 0x4a5   :  { %v9871_v13 = vcombine.low %v4805_v8, %v4809_v9 }
 0x4a6   :  { %7909 = vmatpush1.bf16.msra.mxu1 %v9799_v14  ;;  %v9465_v14 = vcombine.low %v4398_v28, %v4402_v7  ;;  %v4610_v28 = vld [vmem:[#allocation11 + $0x938] sm:$0xff] }
 0x4a7   :  { %7960 = vmatpush1.bf16.msra.mxu0 %v9385_v56  ;;  %7910 = vmatprep.subr.bf16.mxu1 %v9792_v52  ;;  %v9872_v56 = vcombine.high %v4805_v8, %v4809_v9  ;;  %v9458_v52 = vcombine.high %v4390_v26, %v4394_v43  ;;  %v4602_v8 = vld [vmem:[#allocation11 + $0x8f8] sm:$0xff] }
 0x4a8   :  { %7961 = vmatprep.subr.bf16.mxu0 %v9506_v49  ;;  %v4797_v49 = vld [vmem:[#allocation11 + $0xf10] sm:$0xff] }
 0x4a9   :  { %v9863_v29 = vcombine.low %v4797_v49, %v4801_v57 }
 0x4aa   :  { %7911 = vmatpush1.bf16.msra.mxu1 %v9791_v0  ;;  %v9457_v0 = vcombine.low %v4390_v26, %v4394_v43  ;;  %v9673_v26 = vcombine.low %v4606_v11, %v4610_v28 }
 0x4ab   :  { %7962 = vmatpush2.bf16.msra.mxu0 %v9505_v33  ;;  %7912 = vmatprep.subr.bf16.mxu1 %v9784_v23  ;;  %v9864_v33 = vcombine.high %v4797_v49, %v4801_v57  ;;  %v9450_v23 = vcombine.high %v4382_v41, %v4386_v60  ;;  %v4594_v49 = vld [vmem:[#allocation11 + $0x8b8] sm:$0xff] }
 0x4ac   :  { %7963 = vmatprep.subr.bf16.mxu0 %v9498_v1  ;;  %v4789_v1 = vld [vmem:[#allocation11 + $0xed0] sm:$0xff] }
 0x4ad   :  { %v9855_v42 = vcombine.low %v4789_v1, %v4793_v5 }
 0x4ae   :  { %7913 = vmatpush1.bf16.msra.mxu1 %v9783_v2  ;;  %v9449_v2 = vcombine.low %v4382_v41, %v4386_v60 }
 0x4af   :  { %7964 = vmatpush2.bf16.msra.mxu0 %v9497_v53  ;;  %7914 = vmatprep.subr.bf16.mxu1 %v9776_v3  ;;  %v9856_v53 = vcombine.high %v4789_v1, %v4793_v5  ;;  %v9698_v3 = vcombine.high %v4630_v38, %v4634_v21  ;;  %v4586_v1 = vld [vmem:[#allocation11 + $0x878] sm:$0xff] }
 0x4b0   :  { %7965 = vmatprep.subr.bf16.mxu0 %v9490_v36  ;;  %v4781_v36 = vld [vmem:[#allocation11 + $0xe90] sm:$0xff] }
 0x4b1   :  { %v9847_v31 = vcombine.low %v4781_v36, %v4785_v62 }
 0x4b2   :  { %7915 = vmatpush1.bf16.msra.mxu1 %v9775_v24  ;;  %v9697_v24 = vcombine.low %v4630_v38, %v4634_v21 }
 0x4b3   :  { %7966 = vmatpush2.bf16.msra.mxu0 %v9489_v4  ;;  %7916 = vmatprep.subr.bf16.mxu1 %v9768_v6  ;;  %v9848_v4 = vcombine.high %v4781_v36, %v4785_v62  ;;  %v9690_v6 = vcombine.high %v4622_v40, %v4626_v37  ;;  %v4578_v36 = vld [vmem:[#allocation11 + $0x838] sm:$0xff] }
 0x4b4   :  { %7967 = vmatprep.subr.bf16.mxu0 %v9482_v55  ;;  %v4773_v55 = vld [vmem:[#allocation11 + $0xe50] sm:$0xff] }
 0x4b5   :  { %v9839_v7 = vcombine.low %v4773_v55, %v4777_v34 }
 0x4b6   :  { %7917 = vmatpush1.bf16.msra.mxu1 %v9767_v27  ;;  %v9689_v27 = vcombine.low %v4622_v40, %v4626_v37 }
 0x4b7   :  { %7968 = vmatpush2.bf16.msra.mxu0 %v9481_v10  ;;  %7918 = vmatprep.subr.bf16.mxu1 %v9888_v17  ;;  %v9840_v10 = vcombine.high %v4773_v55, %v4777_v34  ;;  %v9682_v17 = vcombine.high %v4614_v22, %v4618_v16  ;;  %v10721_v55 = vpop.f32.mrf.mxu0 }
 0x4b8   :  { %7969 = vmatprep.subr.bf16.mxu0 %v9474_v30  ;;  %v4765_v30 = vld [vmem:[#allocation11 + $0xe10] sm:$0xff] }
 0x4b9   :  { %v9831_v9 = vcombine.low %v4765_v30, %v4769_v25 }
 0x4ba   :  { %7919 = vmatpush2.bf16.msra.mxu1 %v9887_v44  ;;  %v9681_v44 = vcombine.low %v4614_v22, %v4618_v16 }
 0x4bb   :  { %7970 = vmatpush2.bf16.msra.mxu0 %v9473_v20  ;;  %7920 = vmatprep.subr.bf16.mxu1 %v9880_v35  ;;  %v9832_v20 = vcombine.high %v4765_v30, %v4769_v25  ;;  %v4502_v35 = vld [vmem:[#allocation11 + $0x5d8] sm:$0xff] }
 0x4bc   :  { %7971 = vmatprep.subr.bf16.mxu0 %v9466_v19  ;;  %v4506_v19 = vld [vmem:[#allocation11 + $0x5f8] sm:$0xff] }
 0x4bd   :  { %v9570_v43 = vcombine.high %v4502_v35, %v4506_v19  ;;  %v9569_v57 = vcombine.low %v4502_v35, %v4506_v19  ;;  %v4686_v30 = vld [vmem:[#allocation11 + $0xb98] sm:$0xff] }
 0x4be   :  { %7921 = vmatpush2.bf16.msra.mxu1 %v9879_v39  ;;  %v4690_v25 = vld [vmem:[#allocation11 + $0xbb8] sm:$0xff] }
 0x4bf   :  { %7972 = vmatpush2.bf16.msra.mxu0 %v9465_v14  ;;  %7922 = vmatprep.subr.bf16.mxu1 %v9872_v56  ;;  %v4494_v14 = vld [vmem:[#allocation11 + $0x598] sm:$0xff] }
 0x4c0   :  { %7973 = vmatprep.subr.bf16.mxu0 %v9458_v52  ;;  %v4498_v56 = vld [vmem:[#allocation11 + $0x5b8] sm:$0xff] }
 0x4c1   :  { %v4590_v52 = vld [vmem:[#allocation11 + $0x898] sm:$0xff]  ;;  %v9562_v60 = vcombine.high %v4494_v14, %v4498_v56  ;;  %v9561_v5 = vcombine.low %v4494_v14, %v4498_v56 }
 0x4c2   :  { %7923 = vmatpush2.bf16.msra.mxu1 %v9871_v13  ;;  %v9658_v13 = vcombine.high %v4590_v52, %v4594_v49  ;;  %v9657_v38 = vcombine.low %v4590_v52, %v4594_v49  ;;  %v4454_v35 = vld [vmem:[#allocation11 + $0x458] sm:$0xff] }
 0x4c3   :  { %7974 = vmatpush2.bf16.msra.mxu0 %v9457_v0  ;;  %7924 = vmatprep.subr.bf16.mxu1 %v9864_v33  ;;  %v4486_v0 = vld [vmem:[#allocation11 + $0x558] sm:$0xff] }
 0x4c4   :  { %7975 = vmatprep.subr.bf16.mxu0 %v9450_v23  ;;  %v4490_v33 = vld [vmem:[#allocation11 + $0x578] sm:$0xff] }
 0x4c5   :  { %v4582_v23 = vld [vmem:[#allocation11 + $0x858] sm:$0xff]  ;;  %v9554_v21 = vcombine.high %v4486_v0, %v4490_v33  ;;  %v9553_v62 = vcombine.low %v4486_v0, %v4490_v33 }
 0x4c6   :  { %7925 = vmatpush2.bf16.msra.mxu1 %v9863_v29  ;;  %v9650_v29 = vcombine.high %v4582_v23, %v4586_v1  ;;  %v9649_v40 = vcombine.low %v4582_v23, %v4586_v1  ;;  %v4458_v19 = vld [vmem:[#allocation11 + $0x478] sm:$0xff] }
 0x4c7   :  { %7976 = vmatpush2.bf16.msra.mxu0 %v9449_v2  ;;  %7926 = vmatprep.subr.bf16.mxu1 %v9856_v53  ;;  %v4478_v2 = vld [vmem:[#allocation11 + $0x518] sm:$0xff] }
 0x4c8   :  { %8031 = vmatprep.subr.bf16.mxu0 %v9698_v3  ;;  %v4482_v53 = vld [vmem:[#allocation11 + $0x538] sm:$0xff] }
 0x4c9   :  { %v4574_v3 = vld [vmem:[#allocation11 + $0x818] sm:$0xff]  ;;  %v9546_v37 = vcombine.high %v4478_v2, %v4482_v53  ;;  %v9545_v34 = vcombine.low %v4478_v2, %v4482_v53 }
 0x4ca   :  { %7927 = vmatpush2.bf16.msra.mxu1 %v9855_v42  ;;  %7978 = vmatmul.mubr.bf16.vlgmr.msra.gmra.mxu0 %v10582_v45  ;;  %v9674_v45 = vcombine.high %v4606_v11, %v4610_v28  ;;  %v9642_v42 = vcombine.high %v4574_v3, %v4578_v36  ;;  %v9641_v22 = vcombine.low %v4574_v3, %v4578_v36  ;;  %v10725_v11 = vpop.f32.mrf.mxu0  ;;  %v4446_v52 = vld [vmem:[#allocation11 + $0x418] sm:$0xff] }
 0x4cb   :  { %8032 = vmatpush1.bf16.msra.mxu0 %v9697_v24  ;;  %8063 = vmatprep.mubr.bf16.mxu0 %v10666_v32  ;;  %v4598_v32 = vld [vmem:[#allocation11 + $0x8d8] sm:$0xff] }
 0x4cc   :  { %7928 = vmatprep.subr.bf16.mxu1 %v9848_v4  ;;  %8033 = vmatprep.subr.bf16.mxu0 %v9690_v6  ;;  %v9666_v39 = vcombine.high %v4598_v32, %v4602_v8  ;;  %v9665_v41 = vcombine.low %v4598_v32, %v4602_v8  ;;  %v4474_v24 = vld [vmem:[#allocation11 + $0x4f8] sm:$0xff] }
 0x4cd   :  { %v4694_v4 = vld [vmem:[#allocation11 + $0xbd8] sm:$0xff] }
 0x4ce   :  { %7929 = vmatpush2.bf16.msra.mxu1 %v9847_v31  ;;  %v4698_v6 = vld [vmem:[#allocation11 + $0xbf8] sm:$0xff]  ;;  %v10723_v31 = vpop.f32.mrf.mxu1 }
 0x4cf   :  { %8034 = vmatpush1.bf16.msra.mxu0 %v9689_v27  ;;  %7930 = vmatprep.subr.bf16.mxu1 %v9840_v10  ;;  %v9762_v27 = vcombine.high %v4694_v4, %v4698_v6  ;;  %v4462_v10 = vld [vmem:[#allocation11 + $0x498] sm:$0xff] }
 0x4d0   :  { %8035 = vmatprep.subr.bf16.mxu0 %v9682_v17  ;;  %v4466_v17 = vld [vmem:[#allocation11 + $0x4b8] sm:$0xff] }
 0x4d1   :  { %v4678_v32 = vld [vmem:[#allocation11 + $0xb58] sm:$0xff] }
 0x4d2   :  { %7931 = vmatpush2.bf16.msra.mxu1 %v9839_v7  ;;  %v9761_v7 = vcombine.low %v4694_v4, %v4698_v6  ;;  %v4682_v8 = vld [vmem:[#allocation11 + $0xb78] sm:$0xff] }
 0x4d3   :  { %8036 = vmatpush1.bf16.msra.mxu0 %v9681_v44  ;;  %7932 = vmatprep.subr.bf16.mxu1 %v9832_v20  ;;  %v9530_v44 = vcombine.high %v4462_v10, %v4466_v17  ;;  %v10727_v20 = vpop.f32.mrf.mxu1  ;;  %v9746_v56 = vcombine.high %v4678_v32, %v4682_v8  ;;  %v4450_v49 = vld [vmem:[#allocation11 + $0x438] sm:$0xff]  ;;  %v9745_v0 = vcombine.low %v4678_v32, %v4682_v8 }
 0x4d4   :  { %8037 = vmatprep.subr.bf16.mxu0 %v9674_v45  ;;  %v9754_v45 = vcombine.high %v4686_v30, %v4690_v25  ;;  %v9514_v33 = vcombine.high %v4446_v52, %v4450_v49  ;;  %v4666_v2 = vld [vmem:[#allocation11 + $0xaf8] sm:$0xff]  ;;  %v9513_v3 = vcombine.low %v4446_v52, %v4450_v49 }
 0x4d5   :  { %v10731_v14 = vpop.f32.mrf.mxu1  ;;  %v4654_v4 = vld [vmem:[#allocation11 + $0xa98] sm:$0xff] }
 0x4d6   :  { %7933 = vmatpush2.bf16.msra.mxu1 %v9831_v9  ;;  %v10729_v9 = vpop.f32.mrf.mxu0  ;;  %v4658_v6 = vld [vmem:[#allocation11 + $0xab8] sm:$0xff] }
 0x4d7   :  { %8038 = vmatpush1.bf16.msra.mxu0 %v9673_v26  ;;  %7988 = vmatprep.subr.bf16.mxu1 %v9570_v43  ;;  %v9529_v26 = vcombine.low %v4462_v10, %v4466_v17  ;;  %v9753_v43 = vcombine.low %v4686_v30, %v4690_v25  ;;  %v7512_v23 = vpop.f32.mrf.mxu1  ;;  %v9722_v30 = vcombine.high %v4654_v4, %v4658_v6  ;;  %v4550_v25 = vld [vmem:[#allocation11 + $0x758] sm:$0xff] }
 0x4d8   :  { %8039 = vmatprep.subr.bf16.mxu0 %v9666_v39  ;;  %v9522_v39 = vcombine.high %v4454_v35, %v4458_v19  ;;  %v9721_v32 = vcombine.low %v4654_v4, %v4658_v6  ;;  %v4638_v49 = vld [vmem:[#allocation11 + $0xa18] sm:$0xff] }
 0x4d9   :  { %7935 = vmatmul.mubr.bf16.vlgmr.msra.gmra.mxu1 %v10697_v12  ;;  %v10735_v53 = vpop.f32.mrf.mxu1 }
 0x4da   :  { %7989 = vmatpush1.bf16.msra.mxu1 %v9569_v57  ;;  %8020 = vmatprep.mubr.bf16.mxu1 %v10641_v18  ;;  %v4470_v18 = vld [vmem:[#allocation11 + $0x4d8] sm:$0xff] }
 0x4db   :  { %8040 = vmatpush1.bf16.msra.mxu0 %v9665_v41  ;;  %7990 = vmatprep.subr.bf16.mxu1 %v9562_v60  ;;  %v9538_v16 = vcombine.high %v4470_v18, %v4474_v24  ;;  %v9537_v28 = vcombine.low %v4470_v18, %v4474_v24  ;;  %v4670_v57 = vld [vmem:[#allocation11 + $0xb18] sm:$0xff]  ;;  %v7469_v60 = vpop.f32.mrf.mxu0  ;;  %v10737_v24 = vld [vmem:[#allocation13] sm:$0xff] }
 0x4dc   :  { %8041 = vmatprep.subr.bf16.mxu0 %v9658_v13  ;;  %v4674_v41 = vld [vmem:[#allocation11 + $0xb38] sm:$0xff]  ;;  %v9521_v13 = vcombine.low %v4454_v35, %v4458_v19 }
 0x4dd   :  { %v10733_v1 = vpop.f32.mrf.mxu0  ;;  %v9737_v36 = vcombine.low %v4670_v57, %v4674_v41  ;;  %v4562_v18 = vld [vmem:[#allocation11 + $0x7b8] sm:$0xff] }
 0x4de   :  { %7991 = vmatpush1.bf16.msra.mxu1 %v9561_v5  ;;  %v9738_v5 = vcombine.high %v4670_v57, %v4674_v41  ;;  %v4642_v57 = vld [vmem:[#allocation11 + $0xa38] sm:$0xff] }
 0x4df   :  { %8042 = vmatpush1.bf16.msra.mxu0 %v9657_v38  ;;  %7992 = vmatprep.subr.bf16.mxu1 %v9554_v21  ;;  %v4566_v38 = vld [vmem:[#allocation11 + $0x7d8] sm:$0xff] }
 0x4e0   :  { %8043 = vmatprep.subr.bf16.mxu0 %v9650_v29  ;;  %v4570_v21 = vld [vmem:[#allocation11 + $0x7f8] sm:$0xff] }
 0x4e1   :  { %v4662_v29 = vld [vmem:[#allocation11 + $0xad8] sm:$0xff] }
 0x4e2   :  { %7993 = vmatpush1.bf16.msra.mxu1 %v9553_v62  ;;  %v9634_v62 = vcombine.high %v4566_v38, %v4570_v21 }
 0x4e3   :  { %8044 = vmatpush1.bf16.msra.mxu0 %v9649_v40  ;;  %7994 = vmatprep.subr.bf16.mxu1 %v9546_v37  ;;  %v7551_v40 = vpop.f32.mrf.mxu0  ;;  %v9730_v37 = vcombine.high %v4662_v29, %v4666_v2 }
 0x4e4   :  { %8045 = vmatprep.subr.bf16.mxu0 %v9642_v42  ;;  %v4558_v42 = vld [vmem:[#allocation11 + $0x798] sm:$0xff] }
 0x4e5   :  { %v9626_v10 = vcombine.high %v4558_v42, %v4562_v18  ;;  %v10741_v17 = vpop.f32.mrf.mxu0 }
 0x4e6   :  { %7995 = vmatpush1.bf16.msra.mxu1 %v9545_v34  ;;  %v4836_v34 = vrot.slane %v10737_v24, %v10463_v46  ;;  %v9625_v46 = vcombine.low %v4558_v42, %v4562_v18  ;;  %v4526_v42 = vld [vmem:[#allocation11 + $0x698] sm:$0xff] }
 0x4e7   :  { %8046 = vmatpush1.bf16.msra.mxu0 %v9641_v22  ;;  %7996 = vmatprep.subr.bf16.mxu1 %v9538_v16  ;;  %v7594_v22 = vpop.f32.mrf.mxu1  ;;  %v9633_v16 = vcombine.low %v4566_v38, %v4570_v21  ;;  %v4534_v38 = vld [vmem:[#allocation11 + $0x6d8] sm:$0xff] }
 0x4e8   :  { %8047 = vmatprep.subr.bf16.mxu0 %v9762_v27  ;;  %v9729_v27 = vcombine.low %v4662_v29, %v4666_v2  ;;  %v7466_v35 = vadd.f32 %v10725_v11, %v4836_v34  ;;  %v4538_v21 = vld [vmem:[#allocation11 + $0x6f8] sm:$0xff] }
 0x4e9   :  { %v10744_v19 = vpop.f32.mrf.mxu1  ;;  %v4530_v18 = vld [vmem:[#allocation11 + $0x6b8] sm:$0xff]  ;;  %v9601_v4 = vcombine.low %v4534_v38, %v4538_v21 }
 0x4ea   :  { %7997 = vmatpush1.bf16.msra.mxu1 %v9537_v28  ;;  %v4554_v28 = vld [vmem:[#allocation11 + $0x778] sm:$0xff]  ;;  %v7509_v41 = vadd.f32 %v10727_v20, %v7466_v35  ;;  %v9705_v20 = vcombine.low %v4638_v49, %v4642_v57 }
 0x4eb   :  { %8048 = vmatpush2.bf16.msra.mxu0 %v9761_v7  ;;  %7998 = vmatprep.subr.bf16.mxu1 %v9530_v44  ;;  %v7470_v7 = vadd.f32 %v7469_v60, %v4836_v34  ;;  %v4646_v44 = vld [vmem:[#allocation11 + $0xa58] sm:$0xff]  ;;  %v9618_v8 = vcombine.high %v4550_v25, %v4554_v28  ;;  %v7598_v60 = vpop.f32.mrf.mxu1  ;;  %v9617_v11 = vcombine.low %v4550_v25, %v4554_v28  ;;  %v10062_v34 = vld [vmem:[#allocation14 + $0x38] sm:$0xff]  }
 0x4ec   :  { %8049 = vmatprep.subr.bf16.mxu0 %v9754_v45  ;;  %v4650_v45 = vld [vmem:[#allocation11 + $0xa78] sm:$0xff]  ;;  %v7552_v29 = vadd.f32 %v7551_v40, %v7509_v41  ;;  %v9594_v40 = vcombine.high %v4526_v42, %v4530_v18  ;;  %v4832_v41 = vrot.slane %v10737_v24, %v10466_v47 }
 0x4ed   :  { %v7513_v52 = vadd.f32 %v7512_v23, %v7470_v7  ;;  %v10064_v25 = vld [vmem:[#allocation14 + $0x30] sm:$0xff]   ;;  %v10065_v7 = vld [vmem:[#allocation14 + $0x68] sm:$0xff]  }
 0x4ee   :  { %7999 = vmatpush1.bf16.msra.mxu1 %v9529_v26  ;;  %v7555_v26 = vpop.f32.mrf.mxu0 }
 0x4ef   :  { %8050 = vmatpush2.bf16.msra.mxu0 %v9753_v43  ;;  %8000 = vmatprep.subr.bf16.mxu1 %v9522_v39  ;;  %v9714_v43 = vcombine.high %v4646_v44, %v4650_v45  ;;  %v4542_v39 = vld [vmem:[#allocation11 + $0x718] sm:$0xff] }
 0x4f0   :  { %8051 = vmatprep.subr.bf16.mxu0 %v9746_v56  ;;  %v4546_v56 = vld [vmem:[#allocation11 + $0x738] sm:$0xff] }
 0x4f1   :  { %v9609_v23 = vcombine.low %v4542_v39, %v4546_v56 }
 0x4f2   :  { %8001 = vmatpush1.bf16.msra.mxu1 %v9521_v13  ;;  %v7556_v13 = vadd.f32 %v7555_v26, %v7513_v52  ;;  %v4758_v26 = vld [vmem:[#allocation11 + $0xdd8] sm:$0xff]  ;;  %v10069_v52 = vld [vmem:[#allocation14 + $0x58] sm:$0xff]  }
 0x4f3   :  { %8052 = vmatpush2.bf16.msra.mxu0 %v9745_v0  ;;  %8002 = vmatprep.subr.bf16.mxu1 %v9514_v33  ;;  %v9713_v0 = vcombine.low %v4646_v44, %v4650_v45  ;;  %v9610_v33 = vcombine.high %v4542_v39, %v4546_v56  ;;  %v4510_v44 = vld [vmem:[#allocation11 + $0x618] sm:$0xff]  ;;  %v10068_v39 = vld [vmem:[#allocation14 + $0x20] sm:$0xff]  }
 0x4f4   :  { %8053 = vmatprep.subr.bf16.mxu0 %v9738_v5  ;;  %v9706_v5 = vcombine.high %v4638_v49, %v4642_v57  ;;  %v7599_v2 = vadd.f32 %v7598_v60, %v7556_v13  ;;  %v4514_v45 = vld [vmem:[#allocation11 + $0x638] sm:$0xff] }
 0x4f5   :  { %v4750_v49 = vld [vmem:[#allocation11 + $0xd98] sm:$0xff] }
 0x4f6   :  { %8003 = vmatpush1.bf16.msra.mxu1 %v9513_v3  ;;  %v7595_v3 = vadd.f32 %v7594_v22, %v7552_v29  ;;  %v4522_v22 = vld [vmem:[#allocation11 + $0x678] sm:$0xff] }
 0x4f7   :  { %8054 = vmatpush2.bf16.msra.mxu0 %v9737_v36  ;;  %8004 = vmatprep.subr.bf16.mxu1 %v9634_v62  ;;  %v9602_v36 = vcombine.high %v4534_v38, %v4538_v21  ;;  %v10061_v62 = vld [vmem:[#allocation14 + $0x78] sm:$0xff]   ;;  %v4754_v57 = vld [vmem:[#allocation11 + $0xdb8] sm:$0xff]  ;;  %v7464_v21 = vadd.f32 %v10721_v55, %v4832_v41 }
 0x4f8   :  { %8055 = vmatprep.subr.bf16.mxu0 %v9730_v37  ;;  %v8126_v37 = vmax.f32 %v7599_v2, 0.0  ;;  %v8118_v6 = vmax.f32 %v7595_v3, 0.0  ;;  %v9818_v13 = vcombine.high %v4750_v49, %v4754_v57  ;;  %v4746_v38 = vld [vmem:[#allocation11 + $0xd78] sm:$0xff]  ;;  %v9817_v47 = vcombine.low %v4750_v49, %v4754_v57  ;;  %v10760_v57 = vpop.f32.mrf.mxu0 }
 0x4f9   :  { %v10072_v29 = vld [vmem:[#allocation14 + $0x10] sm:$0xff]  }
 0x4fa   :  { %8005 = vmatpush2.bf16.msra.mxu1 %v9633_v16  ;;  %v10063_v16 = vld [vmem:[#allocation14 + $0x70] sm:$0xff]  }
 0x4fb   :  { %8056 = vmatpush2.bf16.msra.mxu0 %v9729_v27  ;;  %8006 = vmatprep.subr.bf16.mxu1 %v9626_v10  ;;  %v4518_v27 = vld [vmem:[#allocation11 + $0x658] sm:$0xff]  ;;  %v8134_v10 = vpack.c.bf16 %v8126_v37, %v8118_v6 }
 0x4fc   :  { %8057 = vmatprep.subr.bf16.mxu0 %v9722_v30  ;;  %v9593_v30 = vcombine.low %v4526_v42, %v4530_v18  ;;  %v9586_v28 = vcombine.high %v4518_v27, %v4522_v22  ;;  %v9585_v35 = vcombine.low %v4518_v27, %v4522_v22  ;;  %v4734_v3 = vld [vmem:[#allocation11 + $0xd18] sm:$0xff]  ;;  %v10093_v22 = vld [vmem:[#allocation14 + $0x178] sm:$0xff]  }
 0x4fd   :  { %v4726_v18 = vld [vmem:[#allocation11 + $0xcd8] sm:$0xff] }
 0x4fe   :  { %8007 = vmatpush2.bf16.msra.mxu1 %v9625_v46  ;;  %v10066_v46 = vld [vmem:[#allocation14 + $0x28] sm:$0xff]   ;;  %v4722_v27 = vld [vmem:[#allocation11 + $0xcb8] sm:$0xff] }
 0x4ff   :  { %8058 = vmatpush2.bf16.msra.mxu0 %v9721_v32  ;;  %8008 = vmatprep.subr.bf16.mxu1 %v9618_v8  ;;  %v9578_v32 = vcombine.high %v4510_v44, %v4514_v45  ;;  %v10067_v8 = vld [vmem:[#allocation14 + $0x60] sm:$0xff]  }
 0x500   :  { %8059 = vmatprep.subr.bf16.mxu0 %v9714_v43  ;;  %v9577_v43 = vcombine.low %v4510_v44, %v4514_v45 }
 0x502   :  { %8009 = vmatpush2.bf16.msra.mxu1 %v9617_v11  ;;  %v10070_v11 = vld [vmem:[#allocation14 + $0x18] sm:$0xff]  }
 0x503   :  { %8060 = vmatpush2.bf16.msra.mxu0 %v9713_v0  ;;  %8010 = vmatprep.subr.bf16.mxu1 %v9610_v33  ;;  %v7468_v0 = vadd.f32 %v10729_v9, %v4832_v41  ;;  %v10071_v33 = vld [vmem:[#allocation14 + $0x50] sm:$0xff]   ;;  %v10073_v9 = vld [vmem:[#allocation14 + $0x48] sm:$0xff]   ;;  %v10762_v41 = vpop.f32.mrf.mxu1 }
 0x504   :  { %8061 = vmatprep.subr.bf16.mxu0 %v9706_v5  ;;  %v4742_v5 = vld [vmem:[#allocation11 + $0xd58] sm:$0xff] }
 0x505   :  { %v9810_v2 = vcombine.high %v4742_v5, %v4746_v38  ;;  %v9809_v55 = vcombine.low %v4742_v5, %v4746_v38  ;;  %v7637_v38 = vpop.f32.mrf.mxu0 }
 0x506   :  { %8011 = vmatpush2.bf16.msra.mxu1 %v9609_v23  ;;  %v7511_v23 = vadd.f32 %v10731_v14, %v7468_v0  ;;  %v10075_v14 = vld [vmem:[#allocation14 + $0x40] sm:$0xff]   ;;  %v4818_v0 = vld [vmem:[#allocation11 + $0xfb8] sm:$0xff] }
 0x507   :  { %8062 = vmatpush2.bf16.msra.mxu0 %v9705_v20  ;;  %8012 = vmatprep.subr.bf16.mxu1 %v9602_v36  ;;  %v4738_v20 = vld [vmem:[#allocation11 + $0xd38] sm:$0xff]  ;;  %v7507_v36 = vadd.f32 %v10723_v31, %v7464_v21  ;;  %v10764_v21 = vpop.f32.mrf.mxu1 }
 0x508   :  { %9956 = vmatprep.subr.bf16.mxu0 %v10061_v62  ;;  %v9802_v62 = vcombine.high %v4734_v3, %v4738_v20  ;;  %v9801_v31 = vcombine.low %v4734_v3, %v4738_v20  ;;  %v10766_v20 = vpop.f32.mrf.mxu0 }
 0x509   :  { %v7550_v37 = vadd.f32 %v10733_v1, %v7507_v36  ;;  %v10768_v36 = vpop.f32.mrf.mxu1 }
 0x50a   :  { %8013 = vmatpush2.bf16.msra.mxu1 %v9601_v4  ;;  %8064 = vmatmul.mubr.bf16.vlgmr.msra.gmra.mxu0 %v10687_v54  ;;  %v4762_v54 = vld [vmem:[#allocation11 + $0xdf8] sm:$0xff] }
 0x50b   :  { %9957 = vmatpush3.bf16.msra.mxu0 %v10062_v34  ;;  %8692 = vmatprep.mubr.bf16.mxu0 %v8134_v10  ;;  %v9826_v56 = vcombine.high %v4758_v26, %v4762_v54  ;;  %v9825_v60 = vcombine.low %v4758_v26, %v4762_v54  ;;  %v4730_v4 = vld [vmem:[#allocation11 + $0xcf8] sm:$0xff]  ;;  %v7593_v6 = vadd.f32 %v10735_v53, %v7550_v37  ;;  %v10105_v37 = vld [vmem:[#allocation14 + $0x148] sm:$0xff]  }
 0x50c   :  { %8014 = vmatprep.subr.bf16.mxu1 %v9594_v40  ;;  %9958 = vmatprep.subr.bf16.mxu0 %v10063_v16  ;;  %v9794_v34 = vcombine.high %v4726_v18, %v4730_v4  ;;  %v4718_v16 = vld [vmem:[#allocation11 + $0xc98] sm:$0xff] }
 0x50d   :  { %v8117_v1 = vmax.f32 %v7593_v6, 0.0  ;;  %v9786_v10 = vcombine.high %v4718_v16, %v4722_v27  ;;  %v4710_v53 = vld [vmem:[#allocation11 + $0xc58] sm:$0xff]  ;;  %v9785_v44 = vcombine.low %v4718_v16, %v4722_v27  ;;  %v10106_v6 = vld [vmem:[#allocation14 + $0x108] sm:$0xff]  }
 0x50e   :  { %8015 = vmatpush2.bf16.msra.mxu1 %v9593_v30  ;;  %v10094_v30 = vld [vmem:[#allocation14 + $0x138] sm:$0xff]  }
 0x50f   :  { %9959 = vmatpush3.bf16.msra.mxu0 %v10064_v25  ;;  %8016 = vmatprep.subr.bf16.mxu1 %v9586_v28  ;;  %v4714_v28 = vld [vmem:[#allocation11 + $0xc78] sm:$0xff] }
 0x510   :  { %9960 = vmatprep.subr.bf16.mxu0 %v10065_v7  ;;  %v10095_v7 = vld [vmem:[#allocation14 + $0x170] sm:$0xff]   ;;  %v9778_v45 = vcombine.high %v4710_v53, %v4714_v28  ;;  %v9777_v26 = vcombine.low %v4710_v53, %v4714_v28  ;;  %v4844_v53 = vrot.slane %v10737_v24, %v10469_v48 }
 0x511   :  { %v4770_v48 = vld [vmem:[#allocation11 + $0xe38] sm:$0xff] }
 0x512   :  { %8017 = vmatpush2.bf16.msra.mxu1 %v9585_v35  ;;  %v10096_v35 = vld [vmem:[#allocation14 + $0x130] sm:$0xff]  }
 0x513   :  { %9961 = vmatpush3.bf16.msra.mxu0 %v10066_v46  ;;  %8018 = vmatprep.subr.bf16.mxu1 %v9578_v32  ;;  %v4702_v46 = vld [vmem:[#allocation11 + $0xc18] sm:$0xff] }
 0x514   :  { %9962 = vmatprep.subr.bf16.mxu0 %v10067_v8  ;;  %v4706_v32 = vld [vmem:[#allocation11 + $0xc38] sm:$0xff]  ;;  %v10097_v8 = vld [vmem:[#allocation14 + $0x168] sm:$0xff]  }
 0x515   :  { %v9770_v54 = vcombine.high %v4702_v46, %v4706_v32  ;;  %v9769_v49 = vcombine.low %v4702_v46, %v4706_v32 }
 0x516   :  { %8019 = vmatpush2.bf16.msra.mxu1 %v9577_v43  ;;  %v10098_v43 = vld [vmem:[#allocation14 + $0x128] sm:$0xff]  }
 0x517   :  { %9963 = vmatpush3.bf16.msra.mxu0 %v10068_v39  ;;  %8074 = vmatprep.subr.bf16.mxu1 %v9826_v56  ;;  %v4822_v39 = vld [vmem:[#allocation11 + $0xfd8] sm:$0xff] }
 0x518   :  { %9964 = vmatprep.subr.bf16.mxu0 %v10069_v52  ;;  %v4826_v56 = vld [vmem:[#allocation11 + $0xff8] sm:$0xff]  ;;  %v10099_v52 = vld [vmem:[#allocation14 + $0x160] sm:$0xff]  }
 0x519   :  { %8021 = vmatmul.mubr.bf16.vlgmr.msra.gmra.mxu1 %v10616_v15  ;;  %v7554_v15 = vadd.f32 %v10741_v17, %v7511_v23  ;;  %v10076_v17 = vld [vmem:[#allocation14] sm:$0xff]   ;;  %v9889_v5 = vcombine.low %v4822_v39, %v4826_v56  ;;  %v4810_v23 = vld [vmem:[#allocation11 + $0xf78] sm:$0xff] }
 0x51a   :  { %8075 = vmatpush1.bf16.msra.mxu1 %v9825_v60  ;;  %8106 = vmatprep.mubr.bf16.mxu1 %v10695_v51  ;;  %v10074_v51 = vld [vmem:[#allocation14 + $0x8] sm:$0xff]   ;;  %v9890_v60 = vcombine.high %v4822_v39, %v4826_v56  ;;  %v4766_v56 = vld [vmem:[#allocation11 + $0xe18] sm:$0xff] }
 0x51b   :  { %9965 = vmatpush3.bf16.msra.mxu0 %v10070_v11  ;;  %8076 = vmatprep.subr.bf16.mxu1 %v9818_v13  ;;  %v7597_v42 = vadd.f32 %v10744_v19, %v7554_v15  ;;  %v9793_v19 = vcombine.low %v4726_v18, %v4730_v4  ;;  %v10100_v11 = vld [vmem:[#allocation14 + $0x120] sm:$0xff]   ;;  %v4814_v13 = vld [vmem:[#allocation11 + $0xf98] sm:$0xff]  ;;  %v7684_v18 = vpop.f32.mrf.mxu1 }
 0x51c   :  { %9966 = vmatprep.subr.bf16.mxu0 %v10071_v33  ;;  %v10101_v33 = vld [vmem:[#allocation14 + $0x158] sm:$0xff]   ;;  %v9881_v3 = vcombine.low %v4814_v13, %v4818_v0 }
 0x51d   :  { %v8125_v40 = vmax.f32 %v7597_v42, 0.0  ;;  %v10772_v16 = vpop.f32.mrf.mxu1 }
 0x51e   :  { %8077 = vmatpush1.bf16.msra.mxu1 %v9817_v47  ;;  %v9882_v47 = vcombine.high %v4814_v13, %v4818_v0  ;;  %v9834_v13 = vcombine.high %v4766_v56, %v4770_v48 }
 0x51f   :  { %9967 = vmatpush3.bf16.msra.mxu0 %v10072_v29  ;;  %8078 = vmatprep.subr.bf16.mxu1 %v9810_v2  ;;  %v8133_v25 = vpack.c.bf16 %v8125_v40, %v8117_v1  ;;  %v10102_v29 = vld [vmem:[#allocation14 + $0x118] sm:$0xff]   ;;  %v4806_v2 = vld [vmem:[#allocation11 + $0xf58] sm:$0xff]  ;;  %v10108_v1 = vld [vmem:[#allocation14 + $0x100] sm:$0xff]  }
 0x520   :  { %9968 = vmatprep.subr.bf16.mxu0 %v10073_v9  ;;  %v10103_v9 = vld [vmem:[#allocation14 + $0x150] sm:$0xff]   ;;  %v9874_v15 = vcombine.high %v4806_v2, %v4810_v23  ;;  %v9873_v42 = vcombine.low %v4806_v2, %v4810_v23 }
 0x521   :  { %v10079_v23 = vld [vmem:[#allocation14 + $0xf0] sm:$0xff]  }
 0x522   :  { %8079 = vmatpush1.bf16.msra.mxu1 %v9809_v55  ;;  %v10104_v55 = vld [vmem:[#allocation14 + $0x110] sm:$0xff]  }
 0x523   :  { %9969 = vmatpush3.bf16.msra.mxu0 %v10074_v51  ;;  %8080 = vmatprep.subr.bf16.mxu1 %v9802_v62  ;;  %v4798_v51 = vld [vmem:[#allocation11 + $0xf18] sm:$0xff] }
 0x524   :  { %9970 = vmatprep.subr.bf16.mxu0 %v10075_v14  ;;  %v4802_v62 = vld [vmem:[#allocation11 + $0xf38] sm:$0xff]  ;;  %v7641_v14 = vpop.f32.mrf.mxu0 }
 0x525   :  { %v9866_v4 = vcombine.high %v4798_v51, %v4802_v62  ;;  %v9865_v27 = vcombine.low %v4798_v51, %v4802_v62  ;;  %v10083_v51 = vld [vmem:[#allocation14 + $0xe0] sm:$0xff]  }
 0x526   :  { %8081 = vmatpush1.bf16.msra.mxu1 %v9801_v31  ;;  %v4790_v31 = vld [vmem:[#allocation11 + $0xed8] sm:$0xff]  ;;  %v10770_v40 = vpop.f32.mrf.mxu0  ;;  %v10084_v62 = vld [vmem:[#allocation14 + $0xa0] sm:$0xff]  }
 0x527   :  { %9971 = vmatpush3.bf16.msra.mxu0 %v10076_v17  ;;  %8082 = vmatprep.subr.bf16.mxu1 %v9794_v34  ;;  %v4794_v17 = vld [vmem:[#allocation11 + $0xef8] sm:$0xff]  ;;  %v10107_v34 = vld [vmem:[#allocation14 + $0x140] sm:$0xff]  }
 0x528   :  { %10000 = vmatprep.subr.bf16.mxu0 %v10093_v22  ;;  %v9858_v22 = vcombine.high %v4790_v31, %v4794_v17  ;;  %v9857_v28 = vcombine.low %v4790_v31, %v4794_v17  ;;  %v10088_v31 = vld [vmem:[#allocation14 + $0x90] sm:$0xff]  }
 0x52a   :  { %8083 = vmatpush1.bf16.msra.mxu1 %v9793_v19  ;;  %8693 = vmatmul.mubr.bf16.vlgmr.msra.gmra.mxu0 %v8133_v25  ;;  %v4782_v19 = vld [vmem:[#allocation11 + $0xe98] sm:$0xff]  ;;  %v7766_v25 = vpop.f32.mrf.mxu1 }
 0x52b   :  { %8084 = vmatprep.subr.bf16.mxu1 %v9786_v10  ;;  %10001 = vmatpush3.bf16.msra.mxu0 %v10094_v30  ;;  %v4786_v10 = vld [vmem:[#allocation11 + $0xeb8] sm:$0xff]  ;;  %v7723_v30 = vpop.f32.mrf.mxu0 }
 0x52c   :  { %10002 = vmatprep.subr.bf16.mxu0 %v10095_v7  ;;  %v9850_v7 = vcombine.high %v4782_v19, %v4786_v10  ;;  %v7768_v32 = vpop.f32.mrf.mxu1 }
 0x52d   :  { %v7725_v46 = vpop.f32.mrf.mxu0 }
 0x52e   :  { %8085 = vmatpush1.bf16.msra.mxu1 %v9785_v44  ;;  %v7642_v44 = vadd.f32 %v7641_v14, %v4844_v53  ;;  %v10086_v14 = vld [vmem:[#allocation14 + $0x98] sm:$0xff]  }
 0x52f   :  { %8086 = vmatprep.subr.bf16.mxu1 %v9778_v45  ;;  %10003 = vmatpush3.bf16.msra.mxu0 %v10096_v35  ;;  %v4774_v45 = vld [vmem:[#allocation11 + $0xe58] sm:$0xff] }
 0x530   :  { %10004 = vmatprep.subr.bf16.mxu0 %v10097_v8  ;;  %v4778_v35 = vld [vmem:[#allocation11 + $0xe78] sm:$0xff]  ;;  %v7638_v8 = vadd.f32 %v7637_v38, %v4844_v53  ;;  %v9833_v38 = vcombine.low %v4766_v56, %v4770_v48  ;;  %v4852_v56 = vrot.slane %v10737_v24, %v10485_v59  ;;  %v4848_v48 = vrot.slane %v10737_v24, %v10527_v58 }
 0x531   :  { %v10111_v53 = vld [vmem:[#allocation14 + $0x1f0] sm:$0xff]  }
 0x532   :  { %8087 = vmatpush1.bf16.msra.mxu1 %v9777_v26  ;;  %v7685_v26 = vadd.f32 %v7684_v18, %v7642_v44  ;;  %v7681_v39 = vadd.f32 %v10764_v21, %v7638_v8  ;;  %v10078_v21 = vld [vmem:[#allocation14 + $0xb8] sm:$0xff]   ;;  %v10087_v18 = vld [vmem:[#allocation14 + $0xd0] sm:$0xff]   ;;  %v10116_v44 = vld [vmem:[#allocation14 + $0x1a0] sm:$0xff]  }
 0x533   :  { %8088 = vmatprep.subr.bf16.mxu1 %v9770_v54  ;;  %10005 = vmatpush3.bf16.msra.mxu0 %v10098_v43  ;;  %v9849_v54 = vcombine.low %v4782_v19, %v4786_v10  ;;  %v9842_v43 = vcombine.high %v4774_v45, %v4778_v35 }
 0x534   :  { %10006 = vmatprep.subr.bf16.mxu0 %v10099_v52  ;;  %v7727_v52 = vpop.f32.mrf.mxu0  ;;  %v7724_v0 = vadd.f32 %v7723_v30, %v7681_v39 }
 0x536   :  { %8089 = vmatpush1.bf16.msra.mxu1 %v9769_v49  ;;  %v7770_v49 = vpop.f32.mrf.mxu1 }
 0x537   :  { %8090 = vmatprep.subr.bf16.mxu1 %v9890_v60  ;;  %10007 = vmatpush3.bf16.msra.mxu0 %v10100_v11  ;;  %v7728_v60 = vadd.f32 %v7727_v52, %v7685_v26  ;;  %v9841_v11 = vcombine.low %v4774_v45, %v4778_v35  ;;  %v7807_v45 = vpop.f32.mrf.mxu0  ;;  %v10117_v35 = vld [vmem:[#allocation14 + $0x1d8] sm:$0xff]  }
 0x538   :  { %10008 = vmatprep.subr.bf16.mxu0 %v10101_v33 }
 0x539   :  { %v7771_v33 = vadd.f32 %v7770_v49, %v7728_v60 }
 0x53a   :  { %8091 = vmatpush2.bf16.msra.mxu1 %v9889_v5  ;;  %v7767_v5 = vadd.f32 %v7766_v25, %v7724_v0 }
 0x53b   :  { %8092 = vmatprep.subr.bf16.mxu1 %v9882_v47  ;;  %10009 = vmatpush3.bf16.msra.mxu0 %v10102_v29  ;;  %v10077_v47 = vld [vmem:[#allocation14 + $0xf8] sm:$0xff]   ;;  %v8128_v29 = vmax.f32 %v7771_v33, 0.0 }
 0x53c   :  { %10010 = vmatprep.subr.bf16.mxu0 %v10103_v9  ;;  %v8120_v2 = vmax.f32 %v7767_v5, 0.0 }
 0x53e   :  { %8093 = vmatpush2.bf16.msra.mxu1 %v9881_v3  ;;  %v8136_v9 = vpack.c.bf16 %v8128_v29, %v8120_v2  ;;  %v10080_v3 = vld [vmem:[#allocation14 + $0xb0] sm:$0xff]  }
 0x53f   :  { %8094 = vmatprep.subr.bf16.mxu1 %v9874_v15  ;;  %10011 = vmatpush3.bf16.msra.mxu0 %v10104_v55  ;;  %v10081_v15 = vld [vmem:[#allocation14 + $0xe8] sm:$0xff]  }
 0x540   :  { %10012 = vmatprep.subr.bf16.mxu0 %v10105_v37  ;;  %v10082_v55 = vld [vmem:[#allocation14 + $0xa8] sm:$0xff]   ;;  %v10085_v37 = vld [vmem:[#allocation14 + $0xd8] sm:$0xff]  }
 0x542   :  { %8095 = vmatpush2.bf16.msra.mxu1 %v9873_v42  ;;  %v4840_v42 = vrot.slane %v10737_v24, %v10474_v50 }
 0x543   :  { %8096 = vmatprep.subr.bf16.mxu1 %v9866_v4  ;;  %10013 = vmatpush3.bf16.msra.mxu0 %v10106_v6 }
 0x544   :  { %10014 = vmatprep.subr.bf16.mxu0 %v10107_v34  ;;  %v7636_v4 = vadd.f32 %v10760_v57, %v4840_v42  ;;  %v10089_v34 = vld [vmem:[#allocation14 + $0xc8] sm:$0xff]   ;;  %v10092_v57 = vld [vmem:[#allocation14 + $0x80] sm:$0xff]  }
 0x546   :  { %8097 = vmatpush2.bf16.msra.mxu1 %v9865_v27  ;;  %v7679_v17 = vadd.f32 %v10762_v41, %v7636_v4  ;;  %v10110_v41 = vld [vmem:[#allocation14 + $0x1b8] sm:$0xff]   ;;  %v10122_v4 = vld [vmem:[#allocation14 + $0x188] sm:$0xff]  }
 0x547   :  { %8098 = vmatprep.subr.bf16.mxu1 %v9858_v22  ;;  %10015 = vmatpush3.bf16.msra.mxu0 %v10108_v1  ;;  %v10090_v22 = vld [vmem:[#allocation14 + $0x88] sm:$0xff]  }
 0x548   :  { %v7722_v50 = vadd.f32 %v10770_v40, %v7679_v17  ;;  %v10113_v40 = vld [vmem:[#allocation14 + $0x1e8] sm:$0xff]  }
 0x54a   :  { %8099 = vmatpush2.bf16.msra.mxu1 %v9857_v28  ;;  %v7765_v19 = vadd.f32 %v10772_v16, %v7722_v50  ;;  %v10112_v28 = vld [vmem:[#allocation14 + $0x1b0] sm:$0xff]   ;;  %v10115_v16 = vld [vmem:[#allocation14 + $0x1e0] sm:$0xff]  }
 0x54b   :  { %8100 = vmatprep.subr.bf16.mxu1 %v9850_v7  ;;  %v10114_v7 = vld [vmem:[#allocation14 + $0x1a8] sm:$0xff]   ;;  %v10124_v50 = vld [vmem:[#allocation14 + $0x180] sm:$0xff]  }
 0x54c   :  { %v8119_v30 = vmax.f32 %v7765_v19, 0.0 }
 0x54e   :  { %8101 = vmatpush2.bf16.msra.mxu1 %v9849_v54 }
 0x54f   :  { %8102 = vmatprep.subr.bf16.mxu1 %v9842_v43 }
 0x552   :  { %8103 = vmatpush2.bf16.msra.mxu1 %v9841_v11 }
 0x553   :  { %8104 = vmatprep.subr.bf16.mxu1 %v9834_v13  ;;  %v7808_v13 = vadd.f32 %v7807_v45, %v4848_v48 }
 0x556   :  { %8105 = vmatpush2.bf16.msra.mxu1 %v9833_v38 }
 0x557   :  { %9978 = vmatprep.subr.bf16.mxu1 %v10077_v47 }
 0x559   :  { %8107 = vmatmul.mubr.bf16.vlgmr.msra.gmra.mxu1 %v10697_v12  ;;  %v7640_v12 = vadd.f32 %v10766_v20, %v4840_v42  ;;  %v10091_v20 = vld [vmem:[#allocation14 + $0xc0] sm:$0xff]   ;;  %v7850_v26 = vpop.f32.mrf.mxu1 }
 0x55a   :  { %9979 = vmatpush3.bf16.msra.mxu1 %v10078_v21  ;;  %8733 = vmatprep.mubr.bf16.mxu1 %v8136_v9  ;;  %v7851_v29 = vadd.f32 %v7850_v26, %v7808_v13 }
 0x55b   :  { %9980 = vmatprep.subr.bf16.mxu1 %v10079_v23  ;;  %v7683_v6 = vadd.f32 %v10768_v36, %v7640_v12  ;;  %v10109_v36 = vld [vmem:[#allocation14 + $0x1f8] sm:$0xff]   ;;  %v7852_v43 = vpop.f32.mrf.mxu1  ;;  %v10119_v23 = vld [vmem:[#allocation14 + $0x1d0] sm:$0xff]  }
 0x55d   :  { %v7726_v27 = vadd.f32 %v7725_v46, %v7683_v6  ;;  %v10118_v46 = vld [vmem:[#allocation14 + $0x198] sm:$0xff]   ;;  %v7854_v52 = vpop.f32.mrf.mxu1 }
 0x55e   :  { %9981 = vmatpush3.bf16.msra.mxu1 %v10080_v3  ;;  %v10120_v3 = vld [vmem:[#allocation14 + $0x190] sm:$0xff]  }
 0x55f   :  { %9982 = vmatprep.subr.bf16.mxu1 %v10081_v15  ;;  %v7769_v1 = vadd.f32 %v7768_v32, %v7726_v27  ;;  %v7809_v32 = vpop.f32.mrf.mxu0  ;;  %v7856_v0 = vpop.f32.mrf.mxu1  ;;  %v10123_v27 = vld [vmem:[#allocation14 + $0x1c0] sm:$0xff]  }
 0x560   :  { %v7810_v60 = vadd.f32 %v7809_v32, %v4852_v56 }
 0x561   :  { %v8127_v10 = vmax.f32 %v7769_v1, 0.0  ;;  %v7811_v8 = vpop.f32.mrf.mxu0 }
 0x562   :  { %9983 = vmatpush3.bf16.msra.mxu1 %v10082_v55  ;;  %v7812_v11 = vadd.f32 %v7811_v8, %v4848_v48  ;;  %v7853_v5 = vadd.f32 %v7852_v43, %v7810_v60 }
 0x563   :  { %9984 = vmatprep.subr.bf16.mxu1 %v10083_v51  ;;  %v8135_v25 = vpack.c.bf16 %v8127_v10, %v8119_v30  ;;  %v7813_v54 = vpop.f32.mrf.mxu0 }
 0x564   :  { %v7814_v33 = vadd.f32 %v7813_v54, %v4852_v56  ;;  %v7855_v38 = vadd.f32 %v7854_v52, %v7812_v11 }
 0x565   :  { %v7893_v39 = vpop.f32.mrf.mxu0 }
 0x566   :  { %9985 = vmatpush3.bf16.msra.mxu1 %v10084_v62  ;;  %v7857_v21 = vadd.f32 %v7856_v0, %v7814_v33  ;;  %v7894_v55 = vadd.f32 %v7893_v39, %v7851_v29 }
 0x567   :  { %9986 = vmatprep.subr.bf16.mxu1 %v10085_v37  ;;  %v7895_v49 = vpop.f32.mrf.mxu0 }
 0x568   :  { %v7896_v59 = vadd.f32 %v7895_v49, %v7853_v5 }
 0x569   :  { %v7897_v47 = vpop.f32.mrf.mxu0 }
 0x56a   :  { %9987 = vmatpush3.bf16.msra.mxu1 %v10086_v14  ;;  %v7898_v15 = vadd.f32 %v7897_v47, %v7855_v38  ;;  %v10121_v14 = vld [vmem:[#allocation14 + $0x1c8] sm:$0xff]  }
 0x56b   :  { %9988 = vmatprep.subr.bf16.mxu1 %v10087_v18  ;;  %v7899_v58 = vpop.f32.mrf.mxu0 }
 0x56c   :  { %v7900_v42 = vadd.f32 %v7899_v58, %v7857_v21 }
 0x56e   :  { %9989 = vmatpush3.bf16.msra.mxu1 %v10088_v31 }
 0x56f   :  { %9990 = vmatprep.subr.bf16.mxu1 %v10089_v34 }
 0x572   :  { %9991 = vmatpush3.bf16.msra.mxu1 %v10090_v22 }
 0x573   :  { %9992 = vmatprep.subr.bf16.mxu1 %v10091_v20 }
 0x576   :  { %9993 = vmatpush3.bf16.msra.mxu1 %v10092_v57 }
 0x577   :  { %10022 = vmatprep.subr.bf16.mxu1 %v10109_v36 }
 0x579   :  { %8734 = vmatmul.mubr.bf16.vlgmr.msra.gmra.mxu1 %v8135_v25 }
 0x57a   :  { %10023 = vmatpush3.bf16.msra.mxu1 %v10110_v41 }
 0x57b   :  { %10024 = vmatprep.subr.bf16.mxu1 %v10111_v53  ;;  %v4860_v53 = vrot.slane %v10737_v24, %v10488_v61 }
 0x57e   :  { %10025 = vmatpush3.bf16.msra.mxu1 %v10112_v28  ;;  %v4856_v28 = vrot.slane %v10737_v24, %v10530_v63 }
 0x57f   :  { %10026 = vmatprep.subr.bf16.mxu1 %v10113_v40 }
 0x582   :  { %10027 = vmatpush3.bf16.msra.mxu1 %v10114_v7 }
 0x583   :  { %10028 = vmatprep.subr.bf16.mxu1 %v10115_v16 }
 0x586   :  { %10029 = vmatpush3.bf16.msra.mxu1 %v10116_v44 }
 0x587   :  { %10030 = vmatprep.subr.bf16.mxu1 %v10117_v35 }
 0x58a   :  { %10031 = vmatpush3.bf16.msra.mxu1 %v10118_v46  ;;  %v7979_v19 = vpop.f32.mrf.mxu0 }
 0x58b   :  { %10032 = vmatprep.subr.bf16.mxu1 %v10119_v23  ;;  %v7980_v45 = vadd.f32 %v7979_v19, %v4856_v28 }
 0x58c   :  { %v7981_v57 = vpop.f32.mrf.mxu0 }
 0x58d   :  { %v7982_v16 = vadd.f32 %v7981_v57, %v4860_v53 }
 0x58e   :  { %10033 = vmatpush3.bf16.msra.mxu1 %v10120_v3  ;;  %v7983_v10 = vpop.f32.mrf.mxu0 }
 0x58f   :  { %10034 = vmatprep.subr.bf16.mxu1 %v10121_v14  ;;  %v7984_v44 = vadd.f32 %v7983_v10, %v4856_v28 }
 0x590   :  { %v7985_v30 = vpop.f32.mrf.mxu0 }
 0x591   :  { %v7986_v46 = vadd.f32 %v7985_v30, %v4860_v53 }
 0x592   :  { %10035 = vmatpush3.bf16.msra.mxu1 %v10122_v4 }
 0x593   :  { %10036 = vmatprep.subr.bf16.mxu1 %v10123_v27 }
 0x596   :  { %10037 = vmatpush3.bf16.msra.mxu1 %v10124_v50 }
 0x599   :  { %v7936_v2 = vpop.f32.mrf.mxu1 }
 0x59a   :  { %v7937_v12 = vadd.f32 %v7936_v2, %v7894_v55 }
 0x59b   :  { %v7938_v9 = vpop.f32.mrf.mxu1 }
 0x59c   :  { %v7939_v62 = vadd.f32 %v7938_v9, %v7896_v59  ;;  %v8121_v22 = vmax.f32 %v7937_v12, 0.0 }
 0x59d   :  { %v7940_v51 = vpop.f32.mrf.mxu1 }
 0x59e   :  { %v7941_v37 = vadd.f32 %v7940_v51, %v7898_v15  ;;  %v8122_v17 = vmax.f32 %v7939_v62, 0.0 }
 0x59f   :  { %v7942_v18 = vpop.f32.mrf.mxu1 }
 0x5a0   :  { %v7943_v6 = vadd.f32 %v7942_v18, %v7900_v42  ;;  %v8129_v31 = vmax.f32 %v7941_v37, 0.0  ;;  %v9891_v42 = vld [vmem:[#allocation16] ss:$0 sm:$0xff] }
 0x5a2   :  { %v8130_v34 = vmax.f32 %v7943_v6, 0.0  ;;  %v8137_v20 = vpack.c.bf16 %v8129_v31, %v8121_v22 }
 0x5a4   :  { %v8138_v1 = vpack.c.bf16 %v8130_v34, %v8122_v17 }
 0x5a6   :  { %8774 = vmatprep.mubr.bf16.mxu0 %v8138_v1 }
 0x5a7   :  { %8775 = vmatmul.mubr.bf16.vlgmr.msra.gmra.mxu0 %v8137_v20 }
 0x5ca   :  { %v8065_v25 = vpop.f32.mrf.mxu0 }
 0x5cc   :  { %v8067_v7 = vpop.f32.mrf.mxu0 }
 0x5ce   :  { %v8069_v26 = vpop.f32.mrf.mxu0 }
 0x5d0   :  { %v8071_v61 = vpop.f32.mrf.mxu0 }
 0x5d9   :  { %v8022_v36 = vpop.f32.mrf.mxu1 }
 0x5da   :  { %v8023_v54 = vadd.f32 %v8022_v36, %v7980_v45 }
 0x5db   :  { %v8024_v41 = vpop.f32.mrf.mxu1 }
 0x5dc   :  { %v8025_v32 = vadd.f32 %v8024_v41, %v7982_v16  ;;  %v8066_v49 = vadd.f32 %v8065_v25, %v8023_v54 }
 0x5dd   :  { %v8026_v40 = vpop.f32.mrf.mxu1 }
 0x5de   :  { %v8027_v8 = vadd.f32 %v8026_v40, %v7984_v44  ;;  %v8068_v48 = vadd.f32 %v8067_v7, %v8025_v32 }
 0x5df   :  { %v8028_v35 = vpop.f32.mrf.mxu1 }
 0x5e0   :  { %v8029_v39 = vadd.f32 %v8028_v35, %v7986_v46  ;;  %v8070_v52 = vadd.f32 %v8069_v26, %v8027_v8 }
 0x5e2   :  { %v8072_v11 = vadd.f32 %v8071_v61, %v8029_v39 }
 0x5ea   :  { %v9972_v23 = vpop.f32.mrf.mxu0 }
 0x5ec   :  { %v9973_v9 = vpop.f32.mrf.mxu0 }
 0x5ed   :  { %v9974_v37 = vadd.f32 %v9973_v9, %v9972_v23 }
 0x5ee   :  { %v9975_v3 = vpop.f32.mrf.mxu0 }
 0x5ef   :  { %v8695_v4 = vadd.f32 %v9974_v37, %v9891_v42 }
 0x5f0   :  { %v9976_v59 = vpop.f32.mrf.mxu0 }
 0x5f1   :  { %v9977_v6 = vadd.f32 %v9976_v59, %v9975_v3 }
 0x5f3   :  { %v8698_v1 = vadd.f32 %v9977_v6, %v9891_v42 }
 0x619   :  { %v8108_v43 = vpop.f32.mrf.mxu1 }
 0x61a   :  { %v8109_v13 = vadd.f32 %v8108_v43, %v8066_v49 }
 0x61b   :  { %v8110_v56 = vpop.f32.mrf.mxu1 }
 0x61c   :  { %v8111_v63 = vadd.f32 %v8110_v56, %v8068_v48  ;;  %v8123_v29 = vmax.f32 %v8109_v13, 0.0 }
 0x61d   :  { %v8112_v60 = vpop.f32.mrf.mxu1 }
 0x61e   :  { %v8113_v24 = vadd.f32 %v8112_v60, %v8070_v52  ;;  %v8124_v38 = vmax.f32 %v8111_v63, 0.0 }
 0x61f   :  { %v8114_v0 = vpop.f32.mrf.mxu1 }
 0x620   :  { %v8115_v33 = vadd.f32 %v8114_v0, %v8072_v11  ;;  %v8131_v5 = vmax.f32 %v8113_v24, 0.0 }
 0x622   :  { %v8132_v47 = vmax.f32 %v8115_v33, 0.0  ;;  %v8139_v21 = vpack.c.bf16 %v8131_v5, %v8123_v29 }
 0x624   :  { %v8140_v2 = vpack.c.bf16 %v8132_v47, %v8124_v38 }
 0x626   :  { %8815 = vmatprep.mubr.bf16.mxu1 %v8140_v2 }
 0x627   :  { %8816 = vmatmul.mubr.bf16.vlgmr.msra.gmra.mxu1 %v8139_v21 }
 0x639   :  { %v9994_v15 = vpop.f32.mrf.mxu1 }
 0x63b   :  { %v9995_v55 = vpop.f32.mrf.mxu1 }
 0x63c   :  { %v9996_v12 = vadd.f32 %v9995_v55, %v9994_v15 }
 0x63d   :  { %v9997_v62 = vpop.f32.mrf.mxu1 }
 0x63e   :  { %v8736_v27 = vadd.f32 %v9996_v12, %v8695_v4 }
 0x63f   :  { %v9998_v18 = vpop.f32.mrf.mxu1 }
 0x640   :  { %v9999_v22 = vadd.f32 %v9998_v18, %v9997_v62 }
 0x642   :  { %v8739_v36 = vadd.f32 %v9999_v22, %v8698_v1 }
 0x667   :  { %v10016_v58 = vpop.f32.mrf.mxu0 }
 0x669   :  { %v10017_v51 = vpop.f32.mrf.mxu0 }
 0x66a   :  { %v10018_v31 = vadd.f32 %v10017_v51, %v10016_v58 }
 0x66b   :  { %v10019_v14 = vpop.f32.mrf.mxu0 }
 0x66c   :  { %v8777_v20 = vadd.f32 %v10018_v31, %v8736_v27 }
 0x66d   :  { %v10020_v17 = vpop.f32.mrf.mxu0 }
 0x66e   :  { %v10021_v19 = vadd.f32 %v10020_v17, %v10019_v14 }
 0x670   :  { %v8780_v25 = vadd.f32 %v10021_v19, %v8739_v36 }
 0x6e7   :  { %v10038_v34 = vpop.f32.mrf.mxu1 }
 0x6e9   :  { %v10039_v50 = vpop.f32.mrf.mxu1 }
 0x6ea   :  { %v10040_v57 = vadd.f32 %v10039_v50, %v10038_v34 }
 0x6eb   :  { %v10041_v10 = vpop.f32.mrf.mxu1 }
 0x6ec   :  { %v8818_v30 = vadd.f32 %v10040_v57, %v8777_v20 }
 0x6ed   :  { %v10042_v41 = vpop.f32.mrf.mxu1 }
 0x6ee   :  { %8824 = vst [vmem:[#allocation17] sm:$0xff] %v8818_v30  ;;  %v10043_v53 = vadd.f32 %v10042_v41, %v10041_v10 }
 0x6f0   :  { %v8821_v28 = vadd.f32 %v10043_v53, %v8780_v25 }
 0x6f2   :  { %8825 = vst [vmem:[#allocation17 + $0x8] sm:$0xff] %v8821_v28 }
 0x6f3   :  { %10318 = shalt.err (!%p10315_p7)
}
 0x6f4   :  { %8837 = dma.vmem_to_hbm [thread:$0]  %s8832_s8, 256, %s10809_s9, [#allocation4], %s10348_s12, %s10348_s12, %s10349_s13  }
 0x6f5   :  { %10337 = dma.done.wait [#allocation4], 256  }
 0x6f6   :  { %10338 = vsyncadd [#allocation4], 4294967040 }
 0x6f7   :  { %8841 = vsyncpa [#allocation3], 1 }
 0x6f8   :  { %8842 = vsyncpa [#allocation6], 1 }
 0x6f9   :  { %8843 = vsyncpa [#allocation9], 1 }
 0x6fa   :  { %8844 = vsyncpa [#allocation12], 1 }
 0x6fb   :  { %8845 = vsyncpa [#allocation15], 1 }
 0x6fc   :  { %8846 = vsyncpa [#allocation4], 1 }

</bundles_post_ra>
